<compile_context>
chip_gen: v7x
topology: tpu7x:2x2x1
jax: 0.10.0
libtpu: 0.0.40
codegen_flags: <defaults>
</compile_context>

<pallas_src>
import jax
import jax.numpy as jnp
from jax import lax
from jax.experimental import pallas as pl
from jax.experimental.pallas import tpu as pltpu


# ---------------------------------------------------------------------------
# Kernel
# ---------------------------------------------------------------------------
def gru_kernel(x_ref, wx_ref, b_ref, whrz_ref, whh_ref, out_ref, h_scr):
    """One grid step processes a chunk of Tc timesteps.

    x_ref    : (Bp, Tc, D)   input chunk (batch padded to a multiple of 8)
    wx_ref   : (D, 6H)       [fwd Wrx|Wzx|Whx | bwd Wrx|Wzx|Whx]  (x @ W layout)
    b_ref    : (1, 6H)       matching gate biases (folded into the projection)
    whrz_ref : (H, 2H)       fwd hidden weights for r and z, fused
    whh_ref  : (H, H)        fwd hidden weight for the candidate gate
    out_ref  : (Bp, 2H)      concat([h_fwd_final, h_bwd_last_step])
    h_scr    : (Bp, H) VMEM  forward hidden state, carried across grid steps
    """
    c = pl.program_id(0)
    nc = pl.num_programs(0)
    Bp, Tc, _ = x_ref.shape
    H = whh_ref.shape[0]

    @pl.when(c == 0)
    def _init():
        h_scr[...] = jnp.zeros_like(h_scr)

    # Hoisted input projection for the whole chunk: ONE MXU matmul with
    # M = Bp * Tc rows instead of 3 tiny (M = B) matmuls per timestep inside
    # the recurrence.  Biases are pre-added here as well.
    x2 = x_ref[...].reshape(Bp * Tc, x_ref.shape[2])
    proj2 = jnp.dot(x2, wx_ref[...], preferred_element_type=jnp.float32) + b_ref[...]
    proj = proj2.reshape(Bp, Tc, 6 * H)          # row (b, t) layout preserved

    whrz = whrz_ref[...]
    whh = whh_ref[...]

    # Forward recurrence over this chunk.  Tc is static -> fully unrolled, so
    # the scheduler can overlap the EUP sigmoid/tanh of step t with the MXU
    # work of step t+1.  Only two small matmuls remain on the serial chain:
    # h @ [Wrh|Wzh] (fused) and (r*h) @ Whh.
    h = h_scr[...]
    for t in range(Tc):
        p = proj[:, t, :]                         # (Bp, 6H), static slice
        rz = jax.nn.sigmoid(
            p[:, :2 * H]
            + jnp.dot(h, whrz, preferred_element_type=jnp.float32))
        r = rz[:, :H]
        z = rz[:, H:2 * H]
        h_tilde = jnp.tanh(
            p[:, 2 * H:3 * H]
            + jnp.dot(r * h, whh, preferred_element_type=jnp.float32))
        h = (1.0 - z) * h + z * h_tilde
    h_scr[...] = h

    @pl.when(c == nc - 1)
    def _finalize():
        # backward_outputs[-1] in the PyTorch module is one GRUCell step on the
        # LAST token with h0 = 0.  With h == 0 this is exactly
        #   z * tanh(x @ Whx + bh)
        # (r multiplies h == 0; (1-z) * h == 0), so only the bwd z / candidate
        # input projections are needed and they were folded into `proj`.
        # Column layout of proj: [fwd_r | fwd_z | fwd_h | bwd_r | bwd_z | bwd_h]
        p_last = proj[:, Tc - 1, :]
        z_b = jax.nn.sigmoid(p_last[:, 4 * H:5 * H])
        h_bwd = z_b * jnp.tanh(p_last[:, 5 * H:6 * H])
        # Single lane-dense store of the full output tile.
        out_ref[...] = jnp.concatenate([h, h_bwd], axis=-1).astype(out_ref.dtype)


# ---------------------------------------------------------------------------
# Parameter handling
# ---------------------------------------------------------------------------
def init_gru_params(key, input_size, hidden_size):
    """Deterministic PyTorch-style Linear init for both directions."""
    fan_in = input_size + hidden_size
    bound = 1.0 / jnp.sqrt(jnp.float32(fan_in))
    params = {}
    for direction in ("fwd", "bwd"):
        gates = {}
        for gate in ("r", "z", "h"):
            key, kw, kb = jax.random.split(key, 3)
            W = jax.random.uniform(kw, (hidden_size, fan_in), jnp.float32, -bound, bound)
            b = jax.random.uniform(kb, (hidden_size,), jnp.float32, -bound, bound)
            gates[gate] = (W, b)
        params[direction] = gates
    return params


def _split_gate(W, b, input_size):
    """torch Linear weight (H, D+H) -> Wx (D, H), Wh (H, H), b (H,) for x @ W."""
    Wx = W[:, :input_size].T
    Wh = W[:, input_size:].T
    return Wx, Wh, b


def _pack_weights(params, input_size, hidden_size):
    """Pack 18 weight/bias tensors into 4 kernel inputs."""
    D, H = input_size, hidden_size
    wx_cols, b_cols = [], []
    for direction in ("fwd", "bwd"):
        for gate in ("r", "z", "h"):
            W, b = params[direction][gate]
            Wx, _, bb = _split_gate(W, b, D)
            wx_cols.append(Wx)
            b_cols.append(bb)
    wx_cat = jnp.concatenate(wx_cols, axis=1)                    # (D, 6H)
    b_cat = jnp.concatenate(b_cols, axis=0).reshape(1, 6 * H)    # (1, 6H)

    # Only the forward direction needs hidden-to-hidden weights: the backward
    # output is a single step with h0 == 0, so its hidden matmuls are exactly 0.
    Wrh = _split_gate(*params["fwd"]["r"], D)[1]
    Wzh = _split_gate(*params["fwd"]["z"], D)[1]
    Whh = _split_gate(*params["fwd"]["h"], D)[1]
    whrz = jnp.concatenate([Wrh, Wzh], axis=1)                   # (H, 2H)
    return wx_cat, b_cat, whrz, Whh


# ---------------------------------------------------------------------------
# Wrapper
# ---------------------------------------------------------------------------
def gru_forward(inputs, params, hidden_size, *, t_chunk=None):
    """inputs: (B, T, D) float32  ->  (B, 2*H) float32.  No wrapper transpose."""
    B, T, D = inputs.shape
    H = hidden_size

    # Chunk of timesteps processed per grid step (streams x through VMEM so the
    # full sequence never has to be resident — important for long T on v7x).
    if t_chunk is None:
        t_chunk = T
        for tc in (128, 64, 32, 16, 8):
            if T % tc == 0:
                t_chunk = tc
                break
    assert T % t_chunk == 0, "T must be divisible by t_chunk"
    assert t_chunk == T or t_chunk % 8 == 0, "t_chunk must be sublane-aligned"
    num_chunks = T // t_chunk

    # Pad batch to a sublane multiple so vector loads/stores are unmasked.
    Bp = ((B + 7) // 8) * 8
    x = inputs if Bp == B else jnp.pad(inputs, ((0, Bp - B), (0, 0), (0, 0)))

    wx_cat, b_cat, whrz, whh = _pack_weights(params, D, H)

    # VMEM budget: weights + double-buffered x chunk + projection + out + scratch.
    est = 4 * (wx_cat.size + b_cat.size + whrz.size + whh.size
               + 2 * Bp * t_chunk * D
               + Bp * t_chunk * 6 * H
               + Bp * 2 * H + Bp * H)
    vmem_limit = int(min(max(8 * est, 4 * 1024 * 1024), 64 * 1024 * 1024))

    grid_spec = pltpu.PrefetchScalarGridSpec(
        num_scalar_prefetch=0,
        grid=(num_chunks,),
        in_specs=[
            pl.BlockSpec((Bp, t_chunk, D), lambda c: (0, c, 0)),   # streamed x
            pl.BlockSpec(wx_cat.shape, lambda c: (0, 0)),          # resident weights
            pl.BlockSpec(b_cat.shape, lambda c: (0, 0)),
            pl.BlockSpec(whrz.shape, lambda c: (0, 0)),
            pl.BlockSpec(whh.shape, lambda c: (0, 0)),
        ],
        out_specs=pl.BlockSpec((Bp, 2 * H), lambda c: (0, 0)),
        scratch_shapes=[pltpu.VMEM((Bp, H), jnp.float32)],          # carried h
    )

    out = pl.pallas_call(
        gru_kernel,
        out_shape=jax.ShapeDtypeStruct((Bp, 2 * H), jnp.float32),
        grid_spec=grid_spec,
        compiler_params=pltpu.CompilerParams(
            dimension_semantics=("arbitrary",),   # sequential recurrence over T
            vmem_limit_bytes=vmem_limit,
        ),
    )(x, wx_cat, b_cat, whrz, whh)
    return out[:B]


# ---------------------------------------------------------------------------
# Pure-JAX reference (mirrors the PyTorch module exactly)
# ---------------------------------------------------------------------------
def gru_reference(inputs, params, hidden_size):
    B, T, D = inputs.shape
    H = hidden_size

    def cell(x, h, gates):
        Wr, br = gates["r"]
        Wz, bz = gates["z"]
        Wh, bh = gates["h"]
        combined = jnp.concatenate([x, h], axis=-1)
        r = jax.nn.sigmoid(combined @ Wr.T + br)
        z = jax.nn.sigmoid(combined @ Wz.T + bz)
        cand_in = jnp.concatenate([x, r * h], axis=-1)
        h_tilde = jnp.tanh(cand_in @ Wh.T + bh)
        return (1.0 - z) * h + z * h_tilde

    h_f = jnp.zeros((B, H), jnp.float32)
    for t in range(T):
        h_f = cell(inputs[:, t, :], h_f, params["fwd"])

    h_b = jnp.zeros((B, H), jnp.float32)
    backward_outputs = []
    for t in range(T - 1, -1, -1):
        h_b = cell(inputs[:, t, :], h_b, params["bwd"])
        backward_outputs.insert(0, h_b)

    return jnp.concatenate([h_f, backward_outputs[-1]], axis=-1)


# ---------------------------------------------------------------------------
if __name__ == "__main__":
    B, T, D, H = 2, 16, 16, 32          # T=16 with t_chunk=8 exercises the
    key = jax.random.PRNGKey(0)         # multi-chunk carry path (grid = 2).
    k_x, k_p = jax.random.split(key)
    inputs = jax.random.normal(k_x, (B, T, D), jnp.float32)
    params = init_gru_params(k_p, D, H)

    out = gru_forward(inputs, params, H, t_chunk=8)
    out = jax.block_until_ready(out)

    ref = gru_reference(inputs, params, H)
    assert out.shape == (B, 2 * H), out.shape
    max_err = float(jnp.max(jnp.abs(out - ref)))
    assert jnp.allclose(out, ref, atol=2e-5, rtol=1e-5), max_err

    print("KERNEL_OK")
</pallas_src>

<mosaic_0001>
module attributes {stable_mosaic.version = 11 : i64} {
  func.func @gru_kernel(%arg0: i32, %arg1: memref<8x8x16xf32, #tpu.memory_space<vmem>>, %arg2: memref<16x192xf32, #tpu.memory_space<vmem>>, %arg3: memref<1x192xf32, #tpu.memory_space<vmem>>, %arg4: memref<32x64xf32, #tpu.memory_space<vmem>>, %arg5: memref<32x32xf32, #tpu.memory_space<vmem>>, %arg6: memref<8x64xf32, #tpu.memory_space<vmem>>, %arg7: memref<8x32xf32, #tpu.memory_space<vmem>>) attributes {dimension_semantics = [#tpu.dimension_semantics<arbitrary>], iteration_bounds = array<i64: 2>, scalar_prefetch = 0 : i64, scratch_operands = 1 : i64, tpu.core_type = #tpu.core_type<tc>, window_params = [{transform_indices = @transform_0, window_bounds = array<i64: 8, 8, 16>}, {pipeline_mode = #tpu.pipeline_mode<synchronous>, transform_indices = @transform_1, window_bounds = array<i64: 16, 192>}, {pipeline_mode = #tpu.pipeline_mode<synchronous>, transform_indices = @transform_2, window_bounds = array<i64: 1, 192>}, {pipeline_mode = #tpu.pipeline_mode<synchronous>, transform_indices = @transform_3, window_bounds = array<i64: 32, 64>}, {pipeline_mode = #tpu.pipeline_mode<synchronous>, transform_indices = @transform_4, window_bounds = array<i64: 32, 32>}, {pipeline_mode = #tpu.pipeline_mode<synchronous>, transform_indices = @transform_5, window_bounds = array<i64: 8, 64>}]} {
    %c0_i32 = arith.constant 0 : i32
    %0 = arith.cmpi eq, %arg0, %c0_i32 : i32
    %1 = arith.extui %0 : i1 to i32
    %c0_i32_0 = arith.constant 0 : i32
    %2 = arith.cmpi ne, %1, %c0_i32_0 : i32
    scf.if %2 {
      %cst_48 = arith.constant 0.000000e+00 : f32
      %194 = vector.broadcast %cst_48 : f32 to vector<8x32xf32>
      %c0_49 = arith.constant 0 : index
      %c0_50 = arith.constant 0 : index
      %195 = vector.load %arg7[%c0_49, %c0_50] : memref<8x32xf32, #tpu.memory_space<vmem>>, vector<8x32xf32>
      tpu.vector_store %arg7[%c0_49, %c0_50], %194 {strides = array<i32>} : memref<8x32xf32, #tpu.memory_space<vmem>>, vector<8x32xf32>,
    } else {
    }
    %c0 = arith.constant 0 : index
    %c0_1 = arith.constant 0 : index
    %c0_2 = arith.constant 0 : index
    %3 = vector.load %arg1[%c0, %c0_1, %c0_2] : memref<8x8x16xf32, #tpu.memory_space<vmem>>, vector<8x8x16xf32>
    %4 = vector.shape_cast %3 : vector<8x8x16xf32> to vector<64x16xf32>
    %c0_3 = arith.constant 0 : index
    %c0_4 = arith.constant 0 : index
    %5 = vector.load %arg2[%c0_3, %c0_4] : memref<16x192xf32, #tpu.memory_space<vmem>>, vector<16x192xf32>
    %cst = arith.constant dense<0.000000e+00> : vector<64x192xf32>
    %6 = tpu.matmul %4, %5, %cst {dimension_numbers = #tpu.dot_dimension_numbers<[1], [0], [0], [1], [0, 0, 1, 1], [], []>} : vector<64x16xf32>, vector<16x192xf32>, vector<64x192xf32> -> vector<64x192xf32>
    %c0_5 = arith.constant 0 : index
    %c0_6 = arith.constant 0 : index
    %7 = vector.load %arg3[%c0_5, %c0_6] : memref<1x192xf32, #tpu.memory_space<vmem>>, vector<1x192xf32>
    %8 = vector.broadcast %7 : vector<1x192xf32> to vector<64x192xf32>
    %9 = arith.addf %6, %8 : vector<64x192xf32>
    %10 = vector.shape_cast %9 : vector<64x192xf32> to vector<8x8x192xf32>
    %c0_7 = arith.constant 0 : index
    %c0_8 = arith.constant 0 : index
    %11 = vector.load %arg4[%c0_7, %c0_8] : memref<32x64xf32, #tpu.memory_space<vmem>>, vector<32x64xf32>
    %c0_9 = arith.constant 0 : index
    %c0_10 = arith.constant 0 : index
    %12 = vector.load %arg5[%c0_9, %c0_10] : memref<32x32xf32, #tpu.memory_space<vmem>>, vector<32x32xf32>
    %c0_11 = arith.constant 0 : index
    %c0_12 = arith.constant 0 : index
    %13 = vector.load %arg7[%c0_11, %c0_12] : memref<8x32xf32, #tpu.memory_space<vmem>>, vector<8x32xf32>
    %14 = vector.extract_strided_slice %10 {offsets = [0, 0, 0], sizes = [8, 1, 192], strides = [1, 1, 1]} : vector<8x8x192xf32> to vector<8x1x192xf32>
    %15 = vector.shape_cast %14 : vector<8x1x192xf32> to vector<8x192xf32>
    %16 = vector.extract_strided_slice %15 {offsets = [0, 0], sizes = [8, 64], strides = [1, 1]} : vector<8x192xf32> to vector<8x64xf32>
    %cst_13 = arith.constant dense<0.000000e+00> : vector<8x64xf32>
    %17 = tpu.matmul %13, %11, %cst_13 {dimension_numbers = #tpu.dot_dimension_numbers<[1], [0], [0], [1], [0, 0, 1, 1], [], []>} : vector<8x32xf32>, vector<32x64xf32>, vector<8x64xf32> -> vector<8x64xf32>
    %18 = arith.addf %16, %17 : vector<8x64xf32>
    %19 = arith.negf %18 : vector<8x64xf32>
    %20 = math.exp %19 : vector<8x64xf32>
    %cst_14 = arith.constant 1.000000e+00 : f32
    %21 = vector.broadcast %cst_14 : f32 to vector<8x64xf32>
    %22 = arith.addf %21, %20 : vector<8x64xf32>
    %23 = arith.divf %21, %22 : vector<8x64xf32>
    %24 = vector.extract_strided_slice %23 {offsets = [0, 0], sizes = [8, 32], strides = [1, 1]} : vector<8x64xf32> to vector<8x32xf32>
    %25 = vector.extract_strided_slice %23 {offsets = [0, 32], sizes = [8, 32], strides = [1, 1]} : vector<8x64xf32> to vector<8x32xf32>
    %26 = vector.extract_strided_slice %15 {offsets = [0, 64], sizes = [8, 32], strides = [1, 1]} : vector<8x192xf32> to vector<8x32xf32>
    %27 = arith.mulf %24, %13 : vector<8x32xf32>
    %cst_15 = arith.constant dense<0.000000e+00> : vector<8x32xf32>
    %28 = tpu.matmul %27, %12, %cst_15 {dimension_numbers = #tpu.dot_dimension_numbers<[1], [0], [0], [1], [0, 0, 1, 1], [], []>} : vector<8x32xf32>, vector<32x32xf32>, vector<8x32xf32> -> vector<8x32xf32>
    %29 = arith.addf %26, %28 : vector<8x32xf32>
    %30 = math.tanh %29 : vector<8x32xf32>
    %cst_16 = arith.constant 1.000000e+00 : f32
    %31 = vector.broadcast %cst_16 : f32 to vector<8x32xf32>
    %32 = arith.subf %31, %25 : vector<8x32xf32>
    %33 = arith.mulf %32, %13 : vector<8x32xf32>
    %34 = arith.mulf %25, %30 : vector<8x32xf32>
    %35 = arith.addf %33, %34 : vector<8x32xf32>
    %36 = vector.extract_strided_slice %10 {offsets = [0, 1, 0], sizes = [8, 1, 192], strides = [1, 1, 1]} : vector<8x8x192xf32> to vector<8x1x192xf32>
    %37 = vector.shape_cast %36 : vector<8x1x192xf32> to vector<8x192xf32>
    %38 = vector.extract_strided_slice %37 {offsets = [0, 0], sizes = [8, 64], strides = [1, 1]} : vector<8x192xf32> to vector<8x64xf32>
    %cst_17 = arith.constant dense<0.000000e+00> : vector<8x64xf32>
    %39 = tpu.matmul %35, %11, %cst_17 {dimension_numbers = #tpu.dot_dimension_numbers<[1], [0], [0], [1], [0, 0, 1, 1], [], []>} : vector<8x32xf32>, vector<32x64xf32>, vector<8x64xf32> -> vector<8x64xf32>
    %40 = arith.addf %38, %39 : vector<8x64xf32>
    %41 = arith.negf %40 : vector<8x64xf32>
    %42 = math.exp %41 : vector<8x64xf32>
    %cst_18 = arith.constant 1.000000e+00 : f32
    %43 = vector.broadcast %cst_18 : f32 to vector<8x64xf32>
    %44 = arith.addf %43, %42 : vector<8x64xf32>
    %45 = arith.divf %43, %44 : vector<8x64xf32>
    %46 = vector.extract_strided_slice %45 {offsets = [0, 0], sizes = [8, 32], strides = [1, 1]} : vector<8x64xf32> to vector<8x32xf32>
    %47 = vector.extract_strided_slice %45 {offsets = [0, 32], sizes = [8, 32], strides = [1, 1]} : vector<8x64xf32> to vector<8x32xf32>
    %48 = vector.extract_strided_slice %37 {offsets = [0, 64], sizes = [8, 32], strides = [1, 1]} : vector<8x192xf32> to vector<8x32xf32>
    %49 = arith.mulf %46, %35 : vector<8x32xf32>
    %cst_19 = arith.constant dense<0.000000e+00> : vector<8x32xf32>
    %50 = tpu.matmul %49, %12, %cst_19 {dimension_numbers = #tpu.dot_dimension_numbers<[1], [0], [0], [1], [0, 0, 1, 1], [], []>} : vector<8x32xf32>, vector<32x32xf32>, vector<8x32xf32> -> vector<8x32xf32>
    %51 = arith.addf %48, %50 : vector<8x32xf32>
    %52 = math.tanh %51 : vector<8x32xf32>
    %cst_20 = arith.constant 1.000000e+00 : f32
    %53 = vector.broadcast %cst_20 : f32 to vector<8x32xf32>
    %54 = arith.subf %53, %47 : vector<8x32xf32>
    %55 = arith.mulf %54, %35 : vector<8x32xf32>
    %56 = arith.mulf %47, %52 : vector<8x32xf32>
    %57 = arith.addf %55, %56 : vector<8x32xf32>
    %58 = vector.extract_strided_slice %10 {offsets = [0, 2, 0], sizes = [8, 1, 192], strides = [1, 1, 1]} : vector<8x8x192xf32> to vector<8x1x192xf32>
    %59 = vector.shape_cast %58 : vector<8x1x192xf32> to vector<8x192xf32>
    %60 = vector.extract_strided_slice %59 {offsets = [0, 0], sizes = [8, 64], strides = [1, 1]} : vector<8x192xf32> to vector<8x64xf32>
    %cst_21 = arith.constant dense<0.000000e+00> : vector<8x64xf32>
    %61 = tpu.matmul %57, %11, %cst_21 {dimension_numbers = #tpu.dot_dimension_numbers<[1], [0], [0], [1], [0, 0, 1, 1], [], []>} : vector<8x32xf32>, vector<32x64xf32>, vector<8x64xf32> -> vector<8x64xf32>
    %62 = arith.addf %60, %61 : vector<8x64xf32>
    %63 = arith.negf %62 : vector<8x64xf32>
    %64 = math.exp %63 : vector<8x64xf32>
    %cst_22 = arith.constant 1.000000e+00 : f32
    %65 = vector.broadcast %cst_22 : f32 to vector<8x64xf32>
    %66 = arith.addf %65, %64 : vector<8x64xf32>
    %67 = arith.divf %65, %66 : vector<8x64xf32>
    %68 = vector.extract_strided_slice %67 {offsets = [0, 0], sizes = [8, 32], strides = [1, 1]} : vector<8x64xf32> to vector<8x32xf32>
    %69 = vector.extract_strided_slice %67 {offsets = [0, 32], sizes = [8, 32], strides = [1, 1]} : vector<8x64xf32> to vector<8x32xf32>
    %70 = vector.extract_strided_slice %59 {offsets = [0, 64], sizes = [8, 32], strides = [1, 1]} : vector<8x192xf32> to vector<8x32xf32>
    %71 = arith.mulf %68, %57 : vector<8x32xf32>
    %cst_23 = arith.constant dense<0.000000e+00> : vector<8x32xf32>
    %72 = tpu.matmul %71, %12, %cst_23 {dimension_numbers = #tpu.dot_dimension_numbers<[1], [0], [0], [1], [0, 0, 1, 1], [], []>} : vector<8x32xf32>, vector<32x32xf32>, vector<8x32xf32> -> vector<8x32xf32>
    %73 = arith.addf %70, %72 : vector<8x32xf32>
    %74 = math.tanh %73 : vector<8x32xf32>
    %cst_24 = arith.constant 1.000000e+00 : f32
    %75 = vector.broadcast %cst_24 : f32 to vector<8x32xf32>
    %76 = arith.subf %75, %69 : vector<8x32xf32>
    %77 = arith.mulf %76, %57 : vector<8x32xf32>
    %78 = arith.mulf %69, %74 : vector<8x32xf32>
    %79 = arith.addf %77, %78 : vector<8x32xf32>
    %80 = vector.extract_strided_slice %10 {offsets = [0, 3, 0], sizes = [8, 1, 192], strides = [1, 1, 1]} : vector<8x8x192xf32> to vector<8x1x192xf32>
    %81 = vector.shape_cast %80 : vector<8x1x192xf32> to vector<8x192xf32>
    %82 = vector.extract_strided_slice %81 {offsets = [0, 0], sizes = [8, 64], strides = [1, 1]} : vector<8x192xf32> to vector<8x64xf32>
    %cst_25 = arith.constant dense<0.000000e+00> : vector<8x64xf32>
    %83 = tpu.matmul %79, %11, %cst_25 {dimension_numbers = #tpu.dot_dimension_numbers<[1], [0], [0], [1], [0, 0, 1, 1], [], []>} : vector<8x32xf32>, vector<32x64xf32>, vector<8x64xf32> -> vector<8x64xf32>
    %84 = arith.addf %82, %83 : vector<8x64xf32>
    %85 = arith.negf %84 : vector<8x64xf32>
    %86 = math.exp %85 : vector<8x64xf32>
    %cst_26 = arith.constant 1.000000e+00 : f32
    %87 = vector.broadcast %cst_26 : f32 to vector<8x64xf32>
    %88 = arith.addf %87, %86 : vector<8x64xf32>
    %89 = arith.divf %87, %88 : vector<8x64xf32>
    %90 = vector.extract_strided_slice %89 {offsets = [0, 0], sizes = [8, 32], strides = [1, 1]} : vector<8x64xf32> to vector<8x32xf32>
    %91 = vector.extract_strided_slice %89 {offsets = [0, 32], sizes = [8, 32], strides = [1, 1]} : vector<8x64xf32> to vector<8x32xf32>
    %92 = vector.extract_strided_slice %81 {offsets = [0, 64], sizes = [8, 32], strides = [1, 1]} : vector<8x192xf32> to vector<8x32xf32>
    %93 = arith.mulf %90, %79 : vector<8x32xf32>
    %cst_27 = arith.constant dense<0.000000e+00> : vector<8x32xf32>
    %94 = tpu.matmul %93, %12, %cst_27 {dimension_numbers = #tpu.dot_dimension_numbers<[1], [0], [0], [1], [0, 0, 1, 1], [], []>} : vector<8x32xf32>, vector<32x32xf32>, vector<8x32xf32> -> vector<8x32xf32>
    %95 = arith.addf %92, %94 : vector<8x32xf32>
    %96 = math.tanh %95 : vector<8x32xf32>
    %cst_28 = arith.constant 1.000000e+00 : f32
    %97 = vector.broadcast %cst_28 : f32 to vector<8x32xf32>
    %98 = arith.subf %97, %91 : vector<8x32xf32>
    %99 = arith.mulf %98, %79 : vector<8x32xf32>
    %100 = arith.mulf %91, %96 : vector<8x32xf32>
    %101 = arith.addf %99, %100 : vector<8x32xf32>
    %102 = vector.extract_strided_slice %10 {offsets = [0, 4, 0], sizes = [8, 1, 192], strides = [1, 1, 1]} : vector<8x8x192xf32> to vector<8x1x192xf32>
    %103 = vector.shape_cast %102 : vector<8x1x192xf32> to vector<8x192xf32>
    %104 = vector.extract_strided_slice %103 {offsets = [0, 0], sizes = [8, 64], strides = [1, 1]} : vector<8x192xf32> to vector<8x64xf32>
    %cst_29 = arith.constant dense<0.000000e+00> : vector<8x64xf32>
    %105 = tpu.matmul %101, %11, %cst_29 {dimension_numbers = #tpu.dot_dimension_numbers<[1], [0], [0], [1], [0, 0, 1, 1], [], []>} : vector<8x32xf32>, vector<32x64xf32>, vector<8x64xf32> -> vector<8x64xf32>
    %106 = arith.addf %104, %105 : vector<8x64xf32>
    %107 = arith.negf %106 : vector<8x64xf32>
    %108 = math.exp %107 : vector<8x64xf32>
    %cst_30 = arith.constant 1.000000e+00 : f32
    %109 = vector.broadcast %cst_30 : f32 to vector<8x64xf32>
    %110 = arith.addf %109, %108 : vector<8x64xf32>
    %111 = arith.divf %109, %110 : vector<8x64xf32>
    %112 = vector.extract_strided_slice %111 {offsets = [0, 0], sizes = [8, 32], strides = [1, 1]} : vector<8x64xf32> to vector<8x32xf32>
    %113 = vector.extract_strided_slice %111 {offsets = [0, 32], sizes = [8, 32], strides = [1, 1]} : vector<8x64xf32> to vector<8x32xf32>
    %114 = vector.extract_strided_slice %103 {offsets = [0, 64], sizes = [8, 32], strides = [1, 1]} : vector<8x192xf32> to vector<8x32xf32>
    %115 = arith.mulf %112, %101 : vector<8x32xf32>
    %cst_31 = arith.constant dense<0.000000e+00> : vector<8x32xf32>
    %116 = tpu.matmul %115, %12, %cst_31 {dimension_numbers = #tpu.dot_dimension_numbers<[1], [0], [0], [1], [0, 0, 1, 1], [], []>} : vector<8x32xf32>, vector<32x32xf32>, vector<8x32xf32> -> vector<8x32xf32>
    %117 = arith.addf %114, %116 : vector<8x32xf32>
    %118 = math.tanh %117 : vector<8x32xf32>
    %cst_32 = arith.constant 1.000000e+00 : f32
    %119 = vector.broadcast %cst_32 : f32 to vector<8x32xf32>
    %120 = arith.subf %119, %113 : vector<8x32xf32>
    %121 = arith.mulf %120, %101 : vector<8x32xf32>
    %122 = arith.mulf %113, %118 : vector<8x32xf32>
    %123 = arith.addf %121, %122 : vector<8x32xf32>
    %124 = vector.extract_strided_slice %10 {offsets = [0, 5, 0], sizes = [8, 1, 192], strides = [1, 1, 1]} : vector<8x8x192xf32> to vector<8x1x192xf32>
    %125 = vector.shape_cast %124 : vector<8x1x192xf32> to vector<8x192xf32>
    %126 = vector.extract_strided_slice %125 {offsets = [0, 0], sizes = [8, 64], strides = [1, 1]} : vector<8x192xf32> to vector<8x64xf32>
    %cst_33 = arith.constant dense<0.000000e+00> : vector<8x64xf32>
    %127 = tpu.matmul %123, %11, %cst_33 {dimension_numbers = #tpu.dot_dimension_numbers<[1], [0], [0], [1], [0, 0, 1, 1], [], []>} : vector<8x32xf32>, vector<32x64xf32>, vector<8x64xf32> -> vector<8x64xf32>
    %128 = arith.addf %126, %127 : vector<8x64xf32>
    %129 = arith.negf %128 : vector<8x64xf32>
    %130 = math.exp %129 : vector<8x64xf32>
    %cst_34 = arith.constant 1.000000e+00 : f32
    %131 = vector.broadcast %cst_34 : f32 to vector<8x64xf32>
    %132 = arith.addf %131, %130 : vector<8x64xf32>
    %133 = arith.divf %131, %132 : vector<8x64xf32>
    %134 = vector.extract_strided_slice %133 {offsets = [0, 0], sizes = [8, 32], strides = [1, 1]} : vector<8x64xf32> to vector<8x32xf32>
    %135 = vector.extract_strided_slice %133 {offsets = [0, 32], sizes = [8, 32], strides = [1, 1]} : vector<8x64xf32> to vector<8x32xf32>
    %136 = vector.extract_strided_slice %125 {offsets = [0, 64], sizes = [8, 32], strides = [1, 1]} : vector<8x192xf32> to vector<8x32xf32>
    %137 = arith.mulf %134, %123 : vector<8x32xf32>
    %cst_35 = arith.constant dense<0.000000e+00> : vector<8x32xf32>
    %138 = tpu.matmul %137, %12, %cst_35 {dimension_numbers = #tpu.dot_dimension_numbers<[1], [0], [0], [1], [0, 0, 1, 1], [], []>} : vector<8x32xf32>, vector<32x32xf32>, vector<8x32xf32> -> vector<8x32xf32>
    %139 = arith.addf %136, %138 : vector<8x32xf32>
    %140 = math.tanh %139 : vector<8x32xf32>
    %cst_36 = arith.constant 1.000000e+00 : f32
    %141 = vector.broadcast %cst_36 : f32 to vector<8x32xf32>
    %142 = arith.subf %141, %135 : vector<8x32xf32>
    %143 = arith.mulf %142, %123 : vector<8x32xf32>
    %144 = arith.mulf %135, %140 : vector<8x32xf32>
    %145 = arith.addf %143, %144 : vector<8x32xf32>
    %146 = vector.extract_strided_slice %10 {offsets = [0, 6, 0], sizes = [8, 1, 192], strides = [1, 1, 1]} : vector<8x8x192xf32> to vector<8x1x192xf32>
    %147 = vector.shape_cast %146 : vector<8x1x192xf32> to vector<8x192xf32>
    %148 = vector.extract_strided_slice %147 {offsets = [0, 0], sizes = [8, 64], strides = [1, 1]} : vector<8x192xf32> to vector<8x64xf32>
    %cst_37 = arith.constant dense<0.000000e+00> : vector<8x64xf32>
    %149 = tpu.matmul %145, %11, %cst_37 {dimension_numbers = #tpu.dot_dimension_numbers<[1], [0], [0], [1], [0, 0, 1, 1], [], []>} : vector<8x32xf32>, vector<32x64xf32>, vector<8x64xf32> -> vector<8x64xf32>
    %150 = arith.addf %148, %149 : vector<8x64xf32>
    %151 = arith.negf %150 : vector<8x64xf32>
    %152 = math.exp %151 : vector<8x64xf32>
    %cst_38 = arith.constant 1.000000e+00 : f32
    %153 = vector.broadcast %cst_38 : f32 to vector<8x64xf32>
    %154 = arith.addf %153, %152 : vector<8x64xf32>
    %155 = arith.divf %153, %154 : vector<8x64xf32>
    %156 = vector.extract_strided_slice %155 {offsets = [0, 0], sizes = [8, 32], strides = [1, 1]} : vector<8x64xf32> to vector<8x32xf32>
    %157 = vector.extract_strided_slice %155 {offsets = [0, 32], sizes = [8, 32], strides = [1, 1]} : vector<8x64xf32> to vector<8x32xf32>
    %158 = vector.extract_strided_slice %147 {offsets = [0, 64], sizes = [8, 32], strides = [1, 1]} : vector<8x192xf32> to vector<8x32xf32>
    %159 = arith.mulf %156, %145 : vector<8x32xf32>
    %cst_39 = arith.constant dense<0.000000e+00> : vector<8x32xf32>
    %160 = tpu.matmul %159, %12, %cst_39 {dimension_numbers = #tpu.dot_dimension_numbers<[1], [0], [0], [1], [0, 0, 1, 1], [], []>} : vector<8x32xf32>, vector<32x32xf32>, vector<8x32xf32> -> vector<8x32xf32>
    %161 = arith.addf %158, %160 : vector<8x32xf32>
    %162 = math.tanh %161 : vector<8x32xf32>
    %cst_40 = arith.constant 1.000000e+00 : f32
    %163 = vector.broadcast %cst_40 : f32 to vector<8x32xf32>
    %164 = arith.subf %163, %157 : vector<8x32xf32>
    %165 = arith.mulf %164, %145 : vector<8x32xf32>
    %166 = arith.mulf %157, %162 : vector<8x32xf32>
    %167 = arith.addf %165, %166 : vector<8x32xf32>
    %168 = vector.extract_strided_slice %10 {offsets = [0, 7, 0], sizes = [8, 1, 192], strides = [1, 1, 1]} : vector<8x8x192xf32> to vector<8x1x192xf32>
    %169 = vector.shape_cast %168 : vector<8x1x192xf32> to vector<8x192xf32>
    %170 = vector.extract_strided_slice %169 {offsets = [0, 0], sizes = [8, 64], strides = [1, 1]} : vector<8x192xf32> to vector<8x64xf32>
    %cst_41 = arith.constant dense<0.000000e+00> : vector<8x64xf32>
    %171 = tpu.matmul %167, %11, %cst_41 {dimension_numbers = #tpu.dot_dimension_numbers<[1], [0], [0], [1], [0, 0, 1, 1], [], []>} : vector<8x32xf32>, vector<32x64xf32>, vector<8x64xf32> -> vector<8x64xf32>
    %172 = arith.addf %170, %171 : vector<8x64xf32>
    %173 = arith.negf %172 : vector<8x64xf32>
    %174 = math.exp %173 : vector<8x64xf32>
    %cst_42 = arith.constant 1.000000e+00 : f32
    %175 = vector.broadcast %cst_42 : f32 to vector<8x64xf32>
    %176 = arith.addf %175, %174 : vector<8x64xf32>
    %177 = arith.divf %175, %176 : vector<8x64xf32>
    %178 = vector.extract_strided_slice %177 {offsets = [0, 0], sizes = [8, 32], strides = [1, 1]} : vector<8x64xf32> to vector<8x32xf32>
    %179 = vector.extract_strided_slice %177 {offsets = [0, 32], sizes = [8, 32], strides = [1, 1]} : vector<8x64xf32> to vector<8x32xf32>
    %180 = vector.extract_strided_slice %169 {offsets = [0, 64], sizes = [8, 32], strides = [1, 1]} : vector<8x192xf32> to vector<8x32xf32>
    %181 = arith.mulf %178, %167 : vector<8x32xf32>
    %cst_43 = arith.constant dense<0.000000e+00> : vector<8x32xf32>
    %182 = tpu.matmul %181, %12, %cst_43 {dimension_numbers = #tpu.dot_dimension_numbers<[1], [0], [0], [1], [0, 0, 1, 1], [], []>} : vector<8x32xf32>, vector<32x32xf32>, vector<8x32xf32> -> vector<8x32xf32>
    %183 = arith.addf %180, %182 : vector<8x32xf32>
    %184 = math.tanh %183 : vector<8x32xf32>
    %cst_44 = arith.constant 1.000000e+00 : f32
    %185 = vector.broadcast %cst_44 : f32 to vector<8x32xf32>
    %186 = arith.subf %185, %179 : vector<8x32xf32>
    %187 = arith.mulf %186, %167 : vector<8x32xf32>
    %188 = arith.mulf %179, %184 : vector<8x32xf32>
    %189 = arith.addf %187, %188 : vector<8x32xf32>
    %c0_45 = arith.constant 0 : index
    %c0_46 = arith.constant 0 : index
    %190 = vector.load %arg7[%c0_45, %c0_46] : memref<8x32xf32, #tpu.memory_space<vmem>>, vector<8x32xf32>
    tpu.vector_store %arg7[%c0_45, %c0_46], %189 {strides = array<i32>} : memref<8x32xf32, #tpu.memory_space<vmem>>, vector<8x32xf32>,
    %c1_i32 = arith.constant 1 : i32
    %191 = arith.cmpi eq, %arg0, %c1_i32 : i32
    %192 = arith.extui %191 : i1 to i32
    %c0_i32_47 = arith.constant 0 : i32
    %193 = arith.cmpi ne, %192, %c0_i32_47 : i32
    scf.if %193 {
      %194 = vector.extract_strided_slice %10 {offsets = [0, 7, 0], sizes = [8, 1, 192], strides = [1, 1, 1]} : vector<8x8x192xf32> to vector<8x1x192xf32>
      %195 = vector.shape_cast %194 : vector<8x1x192xf32> to vector<8x192xf32>
      %196 = vector.extract_strided_slice %195 {offsets = [0, 128], sizes = [8, 32], strides = [1, 1]} : vector<8x192xf32> to vector<8x32xf32>
      %197 = arith.negf %196 : vector<8x32xf32>
      %198 = math.exp %197 : vector<8x32xf32>
      %cst_48 = arith.constant 1.000000e+00 : f32
      %199 = vector.broadcast %cst_48 : f32 to vector<8x32xf32>
      %200 = arith.addf %199, %198 : vector<8x32xf32>
      %201 = arith.divf %199, %200 : vector<8x32xf32>
      %202 = vector.extract_strided_slice %195 {offsets = [0, 160], sizes = [8, 32], strides = [1, 1]} : vector<8x192xf32> to vector<8x32xf32>
      %203 = math.tanh %202 : vector<8x32xf32>
      %204 = arith.mulf %201, %203 : vector<8x32xf32>
      %205 = tpu.concatenate %189, %204 in 1 : vector<8x32xf32>, vector<8x32xf32> -> vector<8x64xf32>
      %c0_49 = arith.constant 0 : index
      %c0_50 = arith.constant 0 : index
      %206 = vector.load %arg6[%c0_49, %c0_50] : memref<8x64xf32, #tpu.memory_space<vmem>>, vector<8x64xf32>
      tpu.vector_store %arg6[%c0_49, %c0_50], %205 {strides = array<i32>} : memref<8x64xf32, #tpu.memory_space<vmem>>, vector<8x64xf32>,
    } else {
    }
    return
  }
  func.func @transform_0(%arg0: i32) -> (i32, i32, i32) {
    %c0_i32 = arith.constant 0 : i32
    %c0_i32_0 = arith.constant 0 : i32
    %c0_i32_1 = arith.constant 0 : i32
    return %c0_i32, %arg0, %c0_i32_0 : i32, i32, i32
  }
  func.func @transform_1(%arg0: i32) -> (i32, i32) {
    %c0_i32 = arith.constant 0 : i32
    %c0_i32_0 = arith.constant 0 : i32
    %c0_i32_1 = arith.constant 0 : i32
    return %c0_i32, %c0_i32_0 : i32, i32
  }
  func.func @transform_2(%arg0: i32) -> (i32, i32) {
    %c0_i32 = arith.constant 0 : i32
    %c0_i32_0 = arith.constant 0 : i32
    %c0_i32_1 = arith.constant 0 : i32
    return %c0_i32, %c0_i32_0 : i32, i32
  }
  func.func @transform_3(%arg0: i32) -> (i32, i32) {
    %c0_i32 = arith.constant 0 : i32
    %c0_i32_0 = arith.constant 0 : i32
    %c0_i32_1 = arith.constant 0 : i32
    return %c0_i32, %c0_i32_0 : i32, i32
  }
  func.func @transform_4(%arg0: i32) -> (i32, i32) {
    %c0_i32 = arith.constant 0 : i32
    %c0_i32_0 = arith.constant 0 : i32
    %c0_i32_1 = arith.constant 0 : i32
    return %c0_i32, %c0_i32_0 : i32, i32
  }
  func.func @transform_5(%arg0: i32) -> (i32, i32) {
    %c0_i32 = arith.constant 0 : i32
    %c0_i32_0 = arith.constant 0 : i32
    %c0_i32_1 = arith.constant 0 : i32
    return %c0_i32, %c0_i32_0 : i32, i32
  }
}

</mosaic_0001>

<bundles_post_ra>
// kernel: tpu_custom_call.1
= control target key start
LH: loop header
LB: loop body
LE: loop exit
PB: predicated region body
PF: predicated region fallthrough
CT: control target
= control target key end

     0   :  { %s6968_s0 = inlined_call_operand.hbm [shape: f32[8,16,16], index: 0, kind: input, shape index: {}]   ;;  %s6969_s1 = inlined_call_operand.hbm [shape: f32[16,192], index: 1, kind: input, shape index: {}]   ;;  %s6970_s2 = inlined_call_operand.vmem [shape: f32[1,192], index: 2, kind: input, shape index: {}]   ;;  %s6971_s3 = inlined_call_operand.hbm [shape: f32[32,64], index: 3, kind: input, shape index: {}]   ;;  %s6972_s4 = inlined_call_operand.hbm [shape: f32[32,32], index: 4, kind: input, shape index: {}]   ;;  %s6973_s5 = inlined_call_operand.hbm [shape: f32[8,64], index: 5, kind: output, shape index: {}]  }
   0x1   :  { %6984 = sst [smem:[#allocation17_spill]] %s6969_s1 }
   0x2   :  { %10 = vsyncpa [#allocation4], 0 }
   0x3   :  { %12 = vsyncpa [#allocation4 + $0x1], 0 }
   0x4   :  { %13 = vsyncpa [#allocation7], 0 }
   0x5   :  { %14 = vsyncpa [#allocation10], 0 }
   0x6   :  { %15 = vsyncpa [#allocation5], 0  ;;  %s5283_s18 = smov 0   ;;  %s5285_s19 = smov 0  }
   0x7   :  { %s5287_s20 = smov 0   ;;  %s5289_s21 = smov 0  }
   0x8 LB: > { %s5302_s22 = sadd.s32 4294967295, %s5233_s21   ;;  %s5305_s23 = sadd.s32 1, %s5233_s21   ;;  %s5233_s21 = sphi %s5289_s21, %s7011_s21   ;;  %s5229_s20 = sphi %s5287_s20, %s7010_s20   ;;  %s5225_s19 = sphi %s5285_s19, %s7009_s19   ;;  %s5221_s18 = sphi %s5283_s18, %s7008_s18  }
   0x9   : > { %s25_s24 = ssub.s32 %s5233_s21, %s5305_s23  ;;  %s28_s25 = sadd.s32 1, %s5229_s20 }
   0xa   : > { %p26_p0 = scmp.eq.s32.totalorder %s25_s24, 0  ;;  %p35_p1 = scmp.ne.s32.totalorder %s5229_s20, %s5225_s19 }
   0xb   : > { %p36_p2 = scmp.eq.s32.totalorder %s5233_s21, 0  ;;  %p41_p3 = scmp.ne.s32.totalorder %s5225_s19, %s5221_s18 }
   0xc   : > { %s5315_s26 = scalar_select %p26_p0, %s5229_s20, %s28_s25  }
   0xd   : > { %p5317_p4 = por %p36_p2, %p35_p1  ;;  %p6974_p5 = scmp.eq.s32.totalorder %s5302_s22, 0 }
   0xe   : > { %6985 = sst [smem:[#allocation16_spill]] %s5315_s26  ;;  %p4055_p6 = scmp.ge.s32.totalorder %s5233_s21, 1 }
   0xf   : > { %p157_p7 = scmp.lt.s32.totalorder %s5233_s21, 3  ;;  %p5326_p8 = por %p6974_p5, %p41_p3 }
  0x10   : > { %s5235_s30 = smov [#allocation6]   ;;  %p4560_p13 = scmp.lt.s32.totalorder %s5233_s21, 2 }
  0x11   : > { %s6987_s28 = scalar_select %p5326_p8, 1, 0 }
  0x12   : > { %p5331_p10 = pnand %p4055_p6, %p157_p7  ;;  %s169_s6 = sshll.u32 %s5235_s30, 4  ;;  %s170_s6 = int_to_ptr.vmem [resolvable:$true] %s169_s6 }
  0x13   : > { %p5346_p0 = pnand %p4560_p13, %p5317_p4  ;;  %s6991_s1 = sld [smem:[#allocation17_spill]] }
  0x14   : > { %s6988_s29 = scalar_select %p5331_p10, 1, 0 }
  0x15   : > { %p4543_p11 = pneg %p5331_p10 }
  0x16   : > { %s6990_s8 = scalar_select %p5346_p0, 1, 0 }
  0x17   : > { %p5339_p12 = pnand %p4543_p11, %p6974_p5 }
  0x19   : > { %s5047_s11 = scalar_lea.hbm %s6991_s1, 512  ;;  %p5358_p2 = pneg %p5339_p12 }
  0x1a   : > { %p5048_p1 = scmp.ne.s32.totalorder %s6991_s1, %s5047_s11  ;;  %p5054_p6 = scmp.lt.u32.totalorder %s5047_s11, %s6991_s1 }
  0x1c   : > { %p5050_p3 = pnand %p5358_p2, %p5048_p1 }
  0x1e   : > { %p5051_p4 = pneg %p5050_p3 }
  0x20   : > { %p5056_p7 = pnand %p5054_p6, %p5051_p4 }
  0x22   : > { %5059 = shalt.err (!%p5056_p7)
}
  0x23   : > { %s5060_s17 = scalar_lea.vmem %s170_s6, 512  ;;  %p5068_p5 = scmp.lt.s32.totalorder %s170_s6, %s170_s6 }
  0x24   : > { %p5061_p11 = scmp.ne.s32.totalorder %s170_s6, %s5060_s17  ;;  %p5069_p8 = scmp.lt.s32.totalorder %s5060_s17, %s5060_s17 }
  0x26   : > { %p5063_p13 = pnand %p5061_p11, %p5358_p2  ;;  %p5070_p10 = por %p5069_p8, %p5068_p5 }
  0x28   : > { %p5064_p9 = pneg %p5063_p13 }
  0x2a   : > { %p5071_p0 = pnand %p5070_p10, %p5064_p9 }
  0x2c   : > { %5074 = shalt.err (!%p5071_p0)
}
  0x2d   : > { %s6978_s18 = smov 256   ;;  %s5237_s24 = smov 16  }
  0x2e   : > { %4546 = dma.hbm_to_vmem [thread:$0]  (!%p5339_p12), %s6991_s1, 512, %s170_s6, [#allocation7], %s6978_s18, %s6978_s18, %s5237_s24  }
  0x2f   : > { %s5238_s30 = smov [#allocation8]   ;;  %s5075_s12 = scalar_lea.hbm %s6971_s3, 512 }
  0x30   : > { %s185_s9 = sshll.u32 %s5238_s30, 4  ;;  %p5076_p5 = scmp.ne.s32.totalorder %s6971_s3, %s5075_s12  ;;  %s186_s9 = int_to_ptr.vmem [resolvable:$true] %s185_s9 }
  0x31   : > { %p5082_p10 = scmp.lt.u32.totalorder %s5075_s12, %s6971_s3 }
  0x32   : > { %p5078_p8 = pnand %p5076_p5, %p5358_p2 }
  0x34   : > { %p5079_p9 = pneg %p5078_p8 }
  0x36   : > { %p5084_p0 = pnand %p5082_p10, %p5079_p9 }
  0x38   : > { %5087 = shalt.err (!%p5084_p0)
}
  0x39   : > { %s5088_s6 = scalar_lea.vmem %s186_s9, 512  ;;  %p5096_p6 = scmp.lt.s32.totalorder %s186_s9, %s186_s9 }
  0x3a   : > { %p5089_p1 = scmp.ne.s32.totalorder %s186_s9, %s5088_s6  ;;  %p5097_p7 = scmp.lt.s32.totalorder %s5088_s6, %s5088_s6 }
  0x3c   : > { %p5091_p3 = pnand %p5089_p1, %p5358_p2  ;;  %p5098_p11 = por %p5097_p7, %p5096_p6 }
  0x3e   : > { %p5092_p4 = pneg %p5091_p3 }
  0x40   : > { %p5099_p13 = pnand %p5098_p11, %p5092_p4 }
  0x42   : > { %5102 = shalt.err (!%p5099_p13)
}
  0x43   : > { %s5239_s24 = smov 128   ;;  %s5240_s25 = smov 8  }
  0x44   : > { %4549 = dma.hbm_to_vmem [thread:$0]  (!%p5339_p12), %s6971_s3, 512, %s186_s9, [#allocation7], %s5239_s24, %s5239_s24, %s5240_s25  }
  0x45   : > { %s212_s10 = sand.u32 1, %s5229_s20   ;;  %s5241_s11 = smov [#allocation9]  }
  0x46   : > { %s198_s12 = sshll.u32 %s5241_s11, 4  ;;  %s4060_s13 = sshll.u32 %s212_s10, 6  ;;  %s199_s12 = int_to_ptr.vmem [resolvable:$true] %s198_s12 }
  0x47   : > { %s5103_s17 = scalar_lea.hbm %s6972_s4, 512 }
  0x48   : > { %p5104_p5 = scmp.ne.s32.totalorder %s6972_s4, %s5103_s17  ;;  %p5110_p10 = scmp.lt.u32.totalorder %s5103_s17, %s6972_s4 }
  0x4a   : > { %p5106_p8 = pnand %p5104_p5, %p5358_p2 }
  0x4c   : > { %p5107_p9 = pneg %p5106_p8 }
  0x4e   : > { %p5112_p0 = pnand %p5110_p10, %p5107_p9 }
  0x50   : > { %5115 = shalt.err (!%p5112_p0)
}
  0x51   : > { %s5116_s9 = scalar_lea.vmem %s199_s12, 512  ;;  %p5124_p6 = scmp.lt.s32.totalorder %s199_s12, %s199_s12 }
  0x52   : > { %p5117_p1 = scmp.ne.s32.totalorder %s199_s12, %s5116_s9  ;;  %p5125_p7 = scmp.lt.s32.totalorder %s5116_s9, %s5116_s9 }
  0x54   : > { %p5119_p3 = pnand %p5117_p1, %p5358_p2  ;;  %p5126_p11 = por %p5125_p7, %p5124_p6 }
  0x56   : > { %p5120_p4 = pneg %p5119_p3 }
  0x58   : > { %p5127_p13 = pnand %p5126_p11, %p5120_p4 }
  0x5a   : > { %5130 = shalt.err (!%p5127_p13)
}
  0x5b   : > { %4552 = dma.hbm_to_vmem [thread:$0]  (!%p5339_p12), %s6972_s4, 512, %s199_s12, [#allocation10], %s5239_s24, %s5239_s24, %s5240_s25  }
  0x5c   : > { %s4061_s14 = sshll.u32 %s5233_s21, 7  ;;  %s216_s7 = scalar_lea.vmem [#allocation3], %s4060_s13 }
  0x5d   : > { %s5423_s30 = scalar_lea.hbm %s6968_s0, %s4061_s14  ;;  %s222_s11 = sshll.u32 %s216_s7, 4  ;;  %s5425_s11 = int_to_ptr.vmem [resolvable:$true] %s222_s11 }
  0x5e   : > { %s5427_s15 = scalar_lea.sflag [#allocation4], %s212_s10  ;;  %s5131_s16 = scalar_lea.hbm %s5423_s30, 1024 }
  0x5f   : > { %p5132_p2 = scmp.ne.s32.totalorder %s5423_s30, %s5131_s16  ;;  %p6993_p5 = scmp.ne.s32.totalorder %s6990_s8, 0 }
  0x60   : > { %s5136_s17 = scalar_lea.hbm %s6968_s0, 2048  ;;  %p5137_p10 = scmp.lt.u32.totalorder %s5423_s30, %s6968_s0 }
  0x61   : > { %p5133_p12 = pneg %p6993_p5  ;;  %p5138_p0 = scmp.lt.u32.totalorder %s5136_s17, %s5131_s16 }
  0x62   : > { %p5140_p3 = scmp.lt.u32.totalorder %s5131_s16, %s5423_s30 }
  0x63   : > { %p5134_p8 = pnand %p5133_p12, %p5132_p2  ;;  %p5139_p1 = por %p5138_p0, %p5137_p10 }
  0x65   : > { %p5135_p9 = pneg %p5134_p8  ;;  %p5141_p4 = por %p5140_p3, %p5139_p1 }
  0x67   : > { %p5142_p6 = pnand %p5141_p4, %p5135_p9 }
  0x69   : > { %5145 = shalt.err (!%p5142_p6)
}
  0x6a   : > { %s5146_s10 = scalar_lea.vmem %s5425_s11, 1024  ;;  %s5242_s13 = smov [#allocation3]  }
  0x6b   : > { %p5147_p7 = scmp.ne.s32.totalorder %s5425_s11, %s5146_s10  ;;  %s5151_s1 = sshll.u32 %s5242_s13, 4  ;;  %s5152_s1 = int_to_ptr.vmem [resolvable:$false] %s5151_s1 }
  0x6c   : > { %s5153_s26 = scalar_lea.vmem %s5152_s1, 2048  ;;  %p5154_p2 = scmp.lt.s32.totalorder %s5425_s11, %s5152_s1 }
  0x6d   : > { %p5149_p11 = pnand %p5147_p7, %p5133_p12  ;;  %p5155_p8 = scmp.lt.s32.totalorder %s5153_s26, %s5146_s10 }
  0x6f   : > { %p5150_p13 = pneg %p5149_p11  ;;  %p5156_p10 = por %p5155_p8, %p5154_p2 }
  0x71   : > { %p5157_p0 = pnand %p5156_p10, %p5150_p13 }
  0x73   : > { %5160 = shalt.err (!%p5157_p0)
}
  0x74   : > { %s6994_s14 = smov 256   ;;  %p6995_p12 = scmp.ne.s32.totalorder %s6988_s29, 0 }
  0x75   : > { %4556 = dma.hbm_to_vmem [thread:$0]  (!%p6993_p5), %s5423_s30, 1024, %s5425_s11, %s5427_s15, %s6994_s14, %s5239_s24, %s5240_s25  }
  0x76   : > { %234 = sbr.rel (%p6995_p12) target bundleno = 7108 (0x1bc4), region = 40  ;;  %s236_s18 = sand.u32 (!%p6995_p12), 1, %s5225_s19  }
  0x77   : > { %s4063_s27 = sshll.u32 (!%p6995_p12), %s236_s18, 6  ;;  %s237_s7 = scalar_lea.sflag (!%p6995_p12), [#allocation4], %s236_s18 }
  0x78   : > { %s5461_s16 = scalar_lea.vmem (!%p6995_p12), [#allocation3], %s4063_s27  ;;  %p6996_p9 = scmp.ne.s32.totalorder (!%p6995_p12), %s6987_s28, 0 }
  0x7d   : > { %5204 = dma.done.wait (%p6996_p9), %s237_s7, 1024  }
  0x7e   : > { %5206 = vsyncadd (%p6996_p9), %s237_s7, 4294966272  ;;  %p6997_p1 = scmp.eq.s32.totalorder %s5302_s22, 0 }
  0x80   : > { %5208 = dma.done.wait (%p6997_p1), [#allocation7], 1024   ;;  %p6998_p5 = pmov %p6997_p1 }
  0x81   : > { %p6999_p3 = pmov %p6997_p1 }
  0x82   : > { %5210 = vsyncadd (%p6998_p5), [#allocation7], 4294966272 }
  0x83   : > { %5212 = dma.done.wait (%p6999_p3), [#allocation10], 512   ;;  %p7000_p4 = pmov %p6997_p1 }
  0x84   : > { %p7001_p6 = scmp.ne.s32.totalorder %s5302_s22, 0 }
  0x85   : > { %5214 = vsyncadd (%p7000_p4), [#allocation10], 4294966784  ;;  %vm278_vm0 = vcmask (!%p7001_p6), 261120   ;;  %v5243_v0 = vmov (!%p7001_p6), 0.0  }
  0x86   : > { %277 = sbr.rel (%p7001_p6) target bundleno = 141 (0x8d), region = 60  ;;  %279 = vst.msk [vmem:[#allocation2] sm:$0xff] (!%p7001_p6), %vm278_vm0, %v5243_v0 }
  0x8d PF: > { %v289_v1 = vld [vmem:[#allocation6 + $0x8] sm:$0xff]  ;;  %v291_v2 = vld [vmem:[#allocation6 + $0x18] sm:$0xff]  ;;  %v442_v3 = vld [vmem:[#allocation8] sm:$0xff]  ;;  %v5244_v4 = vmov 0.0|0.0   ;;  %v5245_v9 = vmov 0.0   ;;  %vm5246_vm1 = vmmov 0   ;;  %v294_v30 = vlaneseq }
  0x8e   : > { %4429 = vmatprep.subr.bf16.mxu1 %v5244_v4  ;;  %v4425_v5 = vpack.c.bf16 %v291_v2, %v289_v1  ;;  %v443_v6 = vld [vmem:[#allocation8 + $0x8] sm:$0xff]  ;;  %v288_v7 = vld [vmem:[#allocation6] sm:$0xff]  ;;  %v290_v8 = vld [vmem:[#allocation6 + $0x10] sm:$0xff]  ;;  %393 = vmatprep.mubr.f32.mxu0 %v5245_v9  ;;  %vm304_vm2 = vcmask 130048   ;;  %vm451_vm3 = vcmask 261120   ;;  %vm629_vm4 = vcmask 1041409  }
  0x8f   : > { %v5479_v10 = vpack.c.bf16 %v443_v6, %v442_v3  ;;  %v4427_v11 = vpack.c.bf16 %v290_v8, %v288_v7  ;;  %v444_v12 = vld [vmem:[#allocation8 + $0x10] sm:$0xff]  ;;  %v445_v13 = vld [vmem:[#allocation8 + $0x18] sm:$0xff]  ;;  %4257 = vmatprep.mubr.msk.f32.mxu1 %vm5246_vm1, %v5245_v9  ;;  %v280_v14 = vld [vmem:[%s5461_s16] sm:$0xff]  ;;  %v295_v31 = vshrl.u32 %v294_v30, 7  ;;  %vm632_vm5 = vcmask 1042434   ;;  %s5247_s8 = smov 64  }
  0x90   : > { %4426 = vmatprep.subr.bf16.mxu0 %v4425_v5  ;;  %v5485_v15 = vpack.c.bf16 %v445_v13, %v444_v12  ;;  %v5492_v16 = vld [vmem:[#allocation2] sm:$0xff]  ;;  %v281_v17 = vld [vmem:[%s5461_s16 + $0x8] sm:$0xff]  ;;  %v282_v18 = vld [vmem:[%s5461_s16 + $0x10] sm:$0xff]  ;;  %vm635_vm6 = vcmask 1043459   ;;  %vm638_vm7 = vcmask 1044484   ;;  %vm641_vm8 = vcmask 1045509  }
  0x91   : > { %4431 = vmatpush3.bf16.msra.mxu1 %v5479_v10  ;;  %4428 = vmatpush1.bf16.msra.mxu0 %v4427_v11  ;;  %v283_v19 = vld [vmem:[%s5461_s16 + $0x18] sm:$0xff]  ;;  %v284_v20 = vld [vmem:[%s5461_s16 + $0x20] sm:$0xff]  ;;  %v285_v21 = vld [vmem:[%s5461_s16 + $0x28] sm:$0xff]  ;;  %v300_v32 = vsub.s32 1, %v295_v31  ;;  %v296_v36 = vsub.s32 0, %v295_v31  ;;  %vm644_vm9 = vcmask 1046534  }
  0x92   : > { %4432 = vmatprep.subr.bf16.mxu1 %v5244_v4  ;;  %4453 = vmatprep.subr.bf16.mxu0 %v5244_v4  ;;  %v286_v22 = vld [vmem:[%s5461_s16 + $0x30] sm:$0xff]  ;;  %v287_v23 = vld [vmem:[%s5461_s16 + $0x38] sm:$0xff]  ;;  %v446_v24 = vld [vmem:[#allocation9] sm:$0xff]  ;;  %vm647_vm10 = vcmask 1047559   ;;  %s5248_s24 = smov 32   ;;  %s5249_s25 = smov 96  }
  0x93   : > { %v447_v25 = vld [vmem:[#allocation9 + $0x8] sm:$0xff]  ;;  %v448_v26 = vld [vmem:[#allocation9 + $0x10] sm:$0xff]  ;;  %v449_v28 = vld [vmem:[#allocation9 + $0x18] sm:$0xff]  ;;  %vm3831_vm11 = vcmask 261127   ;;  %vm3833_vm12 = vcmask 260096   ;;  %p4156_p7 = scmp.ne.s32.totalorder %s5302_s22, 1 }
  0x94   : > { %4068 = vmatmul.mubr.msk.f32.vlgmr.msra.gmra.mrb[0].mxu0 %vm304_vm2, %v280_v14  ;;  %v5525_v27 = vpack.c.bf16 %v447_v25, %v446_v24  ;;  %v5528_v29 = vpack.c.bf16 %v449_v28, %v448_v26  ;;  %v292_v33 = vld [vmem:[%s6970_s2] sm:$0x3]  ;;  %s5250_s30 = smov (!%p4156_p7), 96   ;;  %s5251_s11 = smov (!%p4156_p7), 32   ;;  %vm3964_vm13 = vcmask (!%p4156_p7), 523271   ;;  %vm3966_vm14 = vcmask (!%p4156_p7), 522240  }
  0x95   : > { %4434 = vmatpush3.bf16.msra.mxu1 %v5485_v15  ;;  %399 = vmatprep.mubr.f32.mxu0 %v5245_v9  ;;  %v5536_v34 = vrot.slane %v292_v33, %v300_v32  ;;  %v297_v41 = vrot.slane %v292_v33, %v296_v36 }
  0x96   : > { %4435 = vmatprep.subr.bf16.mxu1 %v5244_v4  ;;  %4455 = vmatpush3.bf16.msra.mxu0 %v5479_v10 }
  0x97   : > { %4456 = vmatprep.subr.bf16.mxu0 %v5244_v4 }
  0x98   : > { %4258 = vmatmul.mubr.msk.f32.vlgmr.msra.gmra.mrb[0].mxu1 %vm451_vm3, %v5492_v16  ;;  %4069 = vmatmul.mubr.msk.f32.gmra.mrb[2].mxu0 %vm304_vm2, %v281_v17 }
  0x99   : > { %405 = vmatprep.mubr.f32.mxu0 %v5245_v9  ;;  %4268 = vmatprep.mubr.msk.f32.mxu1 %vm5246_vm1, %v5245_v9 }
  0x9a   : > { %4458 = vmatpush3.bf16.msra.mxu0 %v5485_v15  ;;  %4437 = vmatpush3.bf16.msra.mxu1 %v5525_v27 }
  0x9b   : > { %4465 = vmatprep.subr.bf16.mxu0 %v5244_v4  ;;  %4438 = vmatprep.subr.bf16.mxu1 %v5244_v4 }
  0x9c   : > { %4070 = vmatmul.mubr.msk.f32.gmra.mrb[4].mxu0 %vm304_vm2, %v282_v18 }
  0x9d   : > { %411 = vmatprep.mubr.f32.mxu0 %v5245_v9 }
  0x9e   : > { %4440 = vmatpush3.bf16.msra.mxu1 %v5528_v29 }
  0x9f   : > { %4441 = vmatprep.subr.bf16.mxu1 %v5244_v4 }
  0xa0   : > { %4071 = vmatmul.mubr.msk.f32.gmra.mrb[6].mxu0 %vm304_vm2, %v283_v19 }
  0xa1   : > { %417 = vmatprep.mubr.f32.mxu0 %v5245_v9 }
  0xa4   : > { %4072 = vmatmul.mubr.msk.f32.gmra.mrb[8].mxu0 %vm304_vm2, %v284_v20 }
  0xa5   : > { %423 = vmatprep.mubr.f32.mxu0 %v5245_v9 }
  0xa8   : > { %4073 = vmatmul.mubr.msk.f32.gmra.mrb[10].mxu0 %vm304_vm2, %v285_v21 }
  0xa9   : > { %429 = vmatprep.mubr.f32.mxu0 %v5245_v9 }
  0xac   : > { %4074 = vmatmul.mubr.msk.f32.gmra.mrb[12].mxu0 %vm304_vm2, %v286_v22 }
  0xad   : > { %435 = vmatprep.mubr.f32.mxu0 %v5245_v9 }
  0xb0   : > { %4075 = vmatmul.mubr.msk.f32.gmra.mrb[14].mxu0 %vm304_vm2, %v287_v23 }
  0xb1   : > { %4301 = vmatprep.mubr.msk.f32.mxu0 %vm5246_vm1, %v5245_v9 }
 0x167   : > { %v395_v35 = vpop.f32.mrb[0].mxu0 }
 0x168   : > { %v397_v37 = vpop.f32.mrb[1].mxu0  ;;  %v5558_v56 = vadd.f32 %v395_v35, %v297_v41 }
 0x169   : > { %v5539_v38 = vadd.f32 %v397_v37, %v5536_v34 }
 0x16b   : > { %v5541_v39 = vpop.f32.mrb[0].mxu1  ;;  %v401_v40 = vpop.f32.mrb[2].mxu0 }
 0x16c   : > { %v403_v42 = vpop.f32.mrb[3].mxu0  ;;  %v4259_v43 = vpop.f32.mrb[1].mxu1  ;;  %v526_v44 = vrot.slane %v5541_v39, 1  ;;  %v5544_v45 = vadd.f32 %v401_v40, %v297_v41  ;;  %v527_v47 = vrot.slane %v5541_v39, 2  ;;  %v528_v52 = vrot.slane %v5541_v39, 3 }
 0x16d   : > { %v5547_v46 = vadd.f32 %v403_v42, %v5536_v34  ;;  %v529_v60 = vrot.slane %v5541_v39, 4  ;;  %v541_v1 = vadd.f32 %v5541_v39, %v5558_v56  ;;  %v530_v7 = vrot.slane %v5541_v39, 5 }
 0x16e   : > { %v542_v53 = vadd.f32 %v526_v44, %v5544_v45  ;;  %v531_v21 = vrot.slane %v5541_v39, 6  ;;  %v532_v31 = vrot.slane %v5541_v39, 7 }
 0x16f   : > { %v407_v48 = vpop.f32.mrb[4].mxu0  ;;  %v4077_v12 = vmul.f32 -1.442695, %v541_v1  ;;  %v599_v1 = vrot.slane %v5492_v16, 3 }
 0x170   : > { %v5550_v49 = vadd.f32 %v407_v48, %v297_v41  ;;  %v409_v50 = vpop.f32.mrb[5].mxu0  ;;  %v4078_v62 = vmul.f32 -1.442695, %v542_v53 }
 0x171   : > { %v5553_v51 = vadd.f32 %v409_v50, %v5536_v34 }
 0x172   : > { %v543_v55 = vadd.f32 %v527_v47, %v5550_v49  ;;  %4615 = vpow2.f32 %v4078_v62 }
 0x173   : > { %v413_v54 = vpop.f32.mrb[6].mxu0 }
 0x174   : > { %v5560_v57 = vadd.f32 %v413_v54, %v297_v41  ;;  %v415_v58 = vpop.f32.mrb[7].mxu0  ;;  %v4079_v0 = vmul.f32 -1.442695, %v543_v55 }
 0x175   : > { %v5563_v59 = vadd.f32 %v415_v58, %v5536_v34 }
 0x176   : > { %v544_v61 = vadd.f32 %v528_v52, %v5560_v57  ;;  %4617 = vpow2.f32 %v4079_v0 }
 0x177   : > { %v419_v63 = vpop.f32.mrb[8].mxu0 }
 0x178   : > { %v5569_v2 = vadd.f32 %v419_v63, %v297_v41  ;;  %v421_v3 = vpop.f32.mrb[9].mxu0  ;;  %v4080_v5 = vmul.f32 -1.442695, %v544_v61  ;;  %v598_v63 = vrot.slane %v5492_v16, 2 }
 0x179   : > { %v5572_v6 = vadd.f32 %v421_v3, %v5536_v34 }
 0x17a   : > { %v545_v8 = vadd.f32 %v529_v60, %v5569_v2  ;;  %4619 = vpow2.f32 %v4080_v5  ;;  %v597_v60 = vrot.slane %v5492_v16, 1  ;;  %v600_v5 = vrot.slane %v5492_v16, 4 }
 0x17b   : > { %v425_v11 = vpop.f32.mrb[10].mxu0 }
 0x17c   : > { %v5576_v13 = vadd.f32 %v425_v11, %v297_v41  ;;  %v427_v14 = vpop.f32.mrb[11].mxu0  ;;  %v4081_v17 = vmul.f32 -1.442695, %v545_v8  ;;  %v4616_v30 = vpop.eup %4615  ;;  %v601_v8 = vrot.slane %v5492_v16, 5 }
 0x17d   : > { %v5579_v18 = vadd.f32 %v427_v14, %v5536_v34  ;;  %v574_v43 = vadd.f32 1.0, %v4616_v30  ;;  %v603_v30 = vrot.slane %v5492_v16, 7 }
 0x17e   : > { %v546_v19 = vadd.f32 %v530_v7, %v5576_v13  ;;  %4621 = vpow2.f32 %v4081_v17  ;;  %v602_v17 = vrot.slane %v5492_v16, 6 }
 0x17f   : > { %v431_v20 = vpop.f32.mrb[12].mxu0  ;;  %4623 = vpow2.f32 %v4077_v12 }
 0x180   : > { %v5583_v22 = vadd.f32 %v431_v20, %v297_v41  ;;  %v433_v23 = vpop.f32.mrb[13].mxu0  ;;  %v4082_v24 = vmul.f32 -1.442695, %v546_v19  ;;  %v4618_v36 = vpop.eup %4617 }
 0x181   : > { %v5586_v25 = vadd.f32 %v433_v23, %v5536_v34  ;;  %v575_v47 = vadd.f32 1.0, %v4618_v36 }
 0x182   : > { %v547_v26 = vadd.f32 %v531_v21, %v5583_v22  ;;  %4625 = vpow2.f32 %v4082_v24 }
 0x183   : > { %v437_v28 = vpop.f32.mrb[14].mxu0 }
 0x184   : > { %v5590_v32 = vadd.f32 %v437_v28, %v297_v41  ;;  %v439_v33 = vpop.f32.mrb[15].mxu0  ;;  %v4083_v35 = vmul.f32 -1.442695, %v547_v26  ;;  %v4620_v40 = vpop.eup %4619 }
 0x185   : > { %v5593_v37 = vadd.f32 %v439_v33, %v5536_v34  ;;  %v576_v50 = vadd.f32 1.0, %v4620_v40 }
 0x186   : > { %v548_v42 = vadd.f32 %v532_v31, %v5590_v32  ;;  %4627 = vpow2.f32 %v4083_v35 }
 0x188   : > { %v4084_v44 = vmul.f32 -1.442695, %v548_v42  ;;  %v4622_v48 = vpop.eup %4621 }
 0x189   : > { %v4624_v52 = vpop.eup %4623  ;;  %v577_v39 = vadd.f32 1.0, %v4622_v48 }
 0x18a   : > { %4629 = vpow2.f32 %v4084_v44  ;;  %v573_v53 = vadd.f32 1.0, %v4624_v52 }
 0x18b   : > { %4631 = vrcp.f32 %v574_v43 }
 0x18c   : > { %v4626_v41 = vpop.eup %4625  ;;  %4633 = vrcp.f32 %v575_v47 }
 0x18d   : > { %v578_v54 = vadd.f32 1.0, %v4626_v41  ;;  %4635 = vrcp.f32 %v576_v50 }
 0x18e   : > { %4637 = vrcp.f32 %v577_v39 }
 0x18f   : > { %4639 = vrcp.f32 %v578_v54 }
 0x190   : > { %v4628_v34 = vpop.eup %4627  ;;  %4641 = vrcp.f32 %v573_v53 }
 0x191   : > { %v579_v55 = vadd.f32 1.0, %v4628_v34 }
 0x193   : > { %4643 = vrcp.f32 %v579_v55 }
 0x194   : > { %v4630_v58 = vpop.eup %4629 }
 0x195   : > { %v5597_v61 = vpop.eup %4631  ;;  %v580_v62 = vadd.f32 1.0, %v4630_v58 }
 0x196   : > { %v5600_v0 = vpop.eup %4633  ;;  %v613_v11 = vmul.f32 %v5597_v61, %v597_v60 }
 0x197   : > { %v5603_v3 = vpop.eup %4635  ;;  %4645 = vrcp.f32 %v580_v62  ;;  %v614_v14 = vmul.f32 %v5600_v0, %v598_v63 }
 0x198   : > { %v5606_v7 = vpop.eup %4637  ;;  %v615_v19 = vmul.f32 %v5603_v3, %v599_v1  ;;  %v628_v24 = vrot.slane %v613_v11, 7 }
 0x199   : > { %v5612_v12 = vpop.eup %4639  ;;  %v616_v21 = vmul.f32 %v5606_v7, %v600_v5  ;;  %v631_v28 = vrot.slane %v614_v14, 6 }
 0x19a   : > { %v5621_v20 = vpop.eup %4641  ;;  %v617_v23 = vmul.f32 %v5612_v12, %v601_v8  ;;  %v634_v35 = vrot.slane %v615_v19, 5 }
 0x19b   : > { %v612_v31 = vmul.f32 %v5621_v20, %v5492_v16  ;;  %v637_v36 = vrot.slane %v616_v21, 4 }
 0x19c   : > { %v640_v42 = vrot.slane %v617_v23, 3 }
 0x19d   : > { %v5629_v26 = vpop.eup %4643  ;;  %v630_v40 = vsel %vm629_vm4, %v628_v24, %v612_v31 }
 0x19e   : > { %v618_v33 = vmul.f32 %v5629_v26, %v602_v17  ;;  %v633_v44 = vsel %vm632_vm5, %v631_v28, %v630_v40 }
 0x19f   : > { %v636_v50 = vsel %vm635_vm6, %v634_v35, %v633_v44 }
 0x1a0   : > { %v643_v47 = vrot.slane %v618_v33, 2  ;;  %v639_v52 = vsel %vm638_vm7, %v637_v36, %v636_v50 }
 0x1a1   : > { %v5636_v43 = vpop.eup %4645  ;;  %v642_v39 = vsel %vm641_vm8, %v640_v42, %v639_v52 }
 0x1a2   : > { %v619_v48 = vmul.f32 %v5636_v43, %v603_v30  ;;  %v645_v53 = vsel %vm644_vm9, %v643_v47, %v642_v39 }
 0x1a4   : > { %v646_v41 = vrot.slane %v619_v48, 1 }
 0x1a6   : > { %v648_v54 = vsel %vm647_vm10, %v646_v41, %v645_v53 }
 0x1a7   : > { %4269 = vmatmul.mubr.msk.f32.vlgmr.msra.gmra.mrb[2].mxu1 %vm451_vm3, %v648_v54 }
 0x1a8   : > { %4443 = vmatpush3.bf16.msra.mxu1 %v5479_v10  ;;  %4279 = vmatprep.mubr.msk.f32.mxu1 %vm5246_vm1, %v5245_v9 }
 0x1a9   : > { %4444 = vmatprep.subr.bf16.mxu1 %v5244_v4 }
 0x1ac   : > { %4446 = vmatpush3.bf16.msra.mxu1 %v5485_v15 }
 0x1ad   : > { %4447 = vmatprep.subr.bf16.mxu1 %v5244_v4 }
 0x27a   : > { %v717_v34 = vpop.f32.mrb[2].mxu1 }
 0x27b   : > { %729 = vrot.lane.b32.xlu1 %v717_v34, %s5247_s8  ;;  %v4270_v55 = vpop.f32.mrb[3].mxu1  ;;  %v722_v58 = vrot.slane %v717_v34, 1  ;;  %v724_v62 = vrot.slane %v717_v34, 3  ;;  %v723_v11 = vrot.slane %v717_v34, 2  ;;  %v726_v14 = vrot.slane %v717_v34, 5 }
 0x27c   : > { %v725_v19 = vrot.slane %v717_v34, 4  ;;  %v728_v21 = vrot.slane %v717_v34, 7  ;;  %v727_v23 = vrot.slane %v717_v34, 6 }
 0x27d   : > { %731 = vrot.lane.b32.xlu0 %v722_v58, %s5247_s8 }
 0x27f   : > { %735 = vrot.lane.b32.xlu1 %v724_v62, %s5247_s8 }
 0x281   : > { %733 = vrot.lane.b32.xlu0 %v723_v11, %s5247_s8 }
 0x283   : > { %739 = vrot.lane.b32.xlu1 %v726_v14, %s5247_s8 }
 0x285   : > { %737 = vrot.lane.b32.xlu0 %v725_v19, %s5247_s8  ;;  %v769_v19 = vsub.f32 1.0, %v5621_v20 }
 0x287   : > { %743 = vrot.lane.b32.xlu1 %v728_v21, %s5247_s8 }
 0x289   : > { %741 = vrot.lane.b32.xlu0 %v727_v23, %s5247_s8  ;;  %v770_v23 = vsub.f32 1.0, %v5597_v61 }
 0x28b   : > { %783 = vrot.lane.b32.xlu1 %v599_v1, %s5248_s24 }
 0x28d   : > { %779 = vrot.lane.b32.xlu0 %v597_v60, %s5248_s24 }
 0x291   : > { %781 = vrot.lane.b32.xlu0 %v598_v63, %s5248_s24 }
 0x295   : > { %777 = vrot.lane.b32.xlu0 %v5492_v16, %s5248_s24 }
 0x299   : > { %785 = vrot.lane.b32.xlu0 %v600_v5, %s5248_s24 }
 0x29d   : > { %787 = vrot.lane.b32.xlu0 %v601_v8, %s5248_s24 }
 0x2a1   : > { %789 = vrot.lane.b32.xlu0 %v602_v17, %s5248_s24 }
 0x2ed   : > { %v730_v1 = vpop.permute.xlu1 %729 }
 0x2ee   : > { %v753_v60 = vadd.f32 %v730_v1, %v5558_v56 }
 0x2ef   : > { %v732_v24 = vpop.permute.xlu0 %731 }
 0x2f0   : > { %4647 = vtanh.f32 %v753_v60  ;;  %v754_v63 = vadd.f32 %v732_v24, %v5544_v45 }
 0x2f1   : > { %v736_v28 = vpop.permute.xlu1 %735 }
 0x2f2   : > { %4649 = vtanh.f32 %v754_v63  ;;  %v756_v5 = vadd.f32 %v736_v28, %v5560_v57 }
 0x2f3   : > { %v734_v31 = vpop.permute.xlu0 %733 }
 0x2f4   : > { %v755_v33 = vadd.f32 %v734_v31, %v5550_v49 }
 0x2f5   : > { %v740_v17 = vpop.permute.xlu1 %739 }
 0x2f6   : > { %4651 = vtanh.f32 %v755_v33  ;;  %v758_v42 = vadd.f32 %v740_v17, %v5576_v13 }
 0x2f7   : > { %v738_v35 = vpop.permute.xlu0 %737  ;;  %4653 = vtanh.f32 %v756_v5 }
 0x2f8   : > { %v757_v8 = vadd.f32 %v738_v35, %v5569_v2 }
 0x2f9   : > { %v744_v50 = vpop.permute.xlu1 %743 }
 0x2fa   : > { %v4648_v36 = vpop.eup %4647  ;;  %4655 = vtanh.f32 %v757_v8  ;;  %v760_v39 = vadd.f32 %v744_v50, %v5590_v32 }
 0x2fb   : > { %817 = vrot.lane.b32.xlu0 %v4648_v36, %s5249_s25  ;;  %v742_v44 = vpop.permute.xlu0 %741  ;;  %4657 = vtanh.f32 %v758_v42  ;;  %v771_v42 = vsub.f32 1.0, %v5600_v0 }
 0x2fc   : > { %v4650_v40 = vpop.eup %4649  ;;  %v759_v48 = vadd.f32 %v742_v44, %v5583_v22 }
 0x2fd   : > { %819 = vrot.lane.b32.xlu1 %v4650_v40, %s5249_s25  ;;  %v784_v14 = vpop.permute.xlu1 %783 }
 0x2fe   : > { %4659 = vtanh.f32 %v759_v48 }
 0x2ff   : > { %791 = vrot.lane.b32.xlu0 %v603_v30, %s5248_s24  ;;  %4661 = vtanh.f32 %v760_v39  ;;  %v780_v54 = vpop.permute.xlu0 %779 }
 0x300   : > { %v4652_v47 = vpop.eup %4651  ;;  %v802_v63 = vmul.f32 %v780_v54, %v770_v23 }
 0x301   : > { %821 = vrot.lane.b32.xlu1 %v4652_v47, %s5249_s25  ;;  %v4654_v52 = vpop.eup %4653  ;;  %v772_v47 = vsub.f32 1.0, %v5603_v3 }
 0x303   : > { %v782_v34 = vpop.permute.xlu0 %781 }
 0x304   : > { %v4656_v41 = vpop.eup %4655 }
 0x305   : > { %823 = vrot.lane.b32.xlu1 %v4654_v52, %s5249_s25  ;;  %v4658_v53 = vpop.eup %4657  ;;  %v803_v52 = vmul.f32 %v782_v34, %v771_v42 }
 0x307   : > { %v778_v55 = vpop.permute.xlu0 %777 }
 0x308   : > { %v4660_v16 = vpop.eup %4659  ;;  %v801_v1 = vmul.f32 %v778_v55, %v769_v19  ;;  %v776_v19 = vsub.f32 1.0, %v5636_v43 }
 0x309   : > { %825 = vrot.lane.b32.xlu1 %v4656_v41, %s5249_s25  ;;  %v4662_v30 = vpop.eup %4661  ;;  %v804_v41 = vmul.f32 %v784_v14, %v772_v47 }
 0x30b   : > { %v786_v58 = vpop.permute.xlu0 %785 }
 0x30d   : > { %827 = vrot.lane.b32.xlu1 %v4658_v53, %s5249_s25  ;;  %v774_v53 = vsub.f32 1.0, %v5612_v12 }
 0x30f   : > { %v788_v62 = vpop.permute.xlu0 %787 }
 0x310   : > { %v806_v54 = vmul.f32 %v788_v62, %v774_v53 }
 0x311   : > { %829 = vrot.lane.b32.xlu1 %v4660_v16, %s5249_s25 }
 0x313   : > { %v790_v11 = vpop.permute.xlu0 %789 }
 0x315   : > { %831 = vrot.lane.b32.xlu1 %v4662_v30, %s5249_s25 }
 0x36d   : > { %v818_v21 = vpop.permute.xlu0 %817 }
 0x36e   : > { %v841_v60 = vmul.f32 %v5621_v20, %v818_v21  ;;  %v773_v20 = vsub.f32 1.0, %v5606_v7 }
 0x36f   : > { %v820_v24 = vpop.permute.xlu1 %819 }
 0x370   : > { %v5702_v28 = vadd.f32 %v841_v60, %v801_v1  ;;  %v842_v31 = vmul.f32 %v5597_v61, %v820_v24  ;;  %v805_v40 = vmul.f32 %v786_v58, %v773_v20 }
 0x371   : > { %v792_v58 = vpop.permute.xlu0 %791 }
 0x372   : > { %v850_v33 = vadd.f32 %v842_v31, %v802_v63  ;;  %v1025_v5 = vrot.slane %v5702_v28, 7  ;;  %v808_v1 = vmul.f32 %v792_v58, %v776_v19 }
 0x373   : > { %v822_v35 = vpop.permute.xlu1 %821 }
 0x374   : > { %1032 = vrot.lane.b32.xlu1 %v1025_v5, %s5249_s25  ;;  %v5709_v36 = vrot.slane %v850_v33, 7  ;;  %v843_v44 = vmul.f32 %v5600_v0, %v822_v35  ;;  %v775_v0 = vsub.f32 1.0, %v5629_v26 }
 0x376   : > { %v807_v34 = vmul.f32 %v790_v11, %v775_v0  ;;  %v866_v11 = vsel %vm629_vm4, %v5709_v36, %v5702_v28 }
 0x377   : > { %v824_v8 = vpop.permute.xlu1 %823 }
 0x378   : > { %1034 = vrot.lane.b32.xlu1 %v5709_v36, %s5249_s25  ;;  %v844_v48 = vmul.f32 %v5603_v3, %v824_v8 }
 0x37a   : > { %v5727_v55 = vadd.f32 %v844_v48, %v804_v41 }
 0x37b   : > { %v826_v17 = vpop.permute.xlu1 %825 }
 0x37c   : > { %v845_v61 = vmul.f32 %v5606_v7, %v826_v17  ;;  %v5724_v7 = vadd.f32 %v843_v44, %v803_v52  ;;  %v869_v62 = vrot.slane %v5727_v55, 5  ;;  %v1027_v47 = vrot.slane %v5727_v55, 7 }
 0x37e   : > { %v5719_v50 = vadd.f32 %v845_v61, %v805_v40  ;;  %v867_v21 = vrot.slane %v5724_v7, 6  ;;  %v1026_v44 = vrot.slane %v5724_v7, 7 }
 0x37f   : > { %v828_v39 = vpop.permute.xlu1 %827 }
 0x380   : > { %v846_v16 = vmul.f32 %v5612_v12, %v828_v39  ;;  %v1028_v30 = vrot.slane %v5719_v50, 7  ;;  %v871_v60 = vrot.slane %v5719_v50, 4  ;;  %v868_v33 = vsel %vm632_vm5, %v867_v21, %v866_v11 }
 0x381   : > { %v870_v20 = vsel %vm635_vm6, %v869_v62, %v868_v33 }
 0x382   : > { %1040 = vrot.lane.b32.xlu1 %v1028_v30, %s5249_s25  ;;  %v5732_v14 = vadd.f32 %v846_v16, %v806_v54  ;;  %v872_v17 = vsel %vm638_vm7, %v871_v60, %v870_v20 }
 0x383   : > { %v830_v3 = vpop.permute.xlu1 %829 }
 0x384   : > { %v847_v12 = vmul.f32 %v5629_v26, %v830_v3  ;;  %v873_v63 = vrot.slane %v5732_v14, 3  ;;  %v1029_v48 = vrot.slane %v5732_v14, 7 }
 0x386   : > { %v5738_v23 = vadd.f32 %v847_v12, %v807_v34 }
 0x387   : > { %v832_v24 = vpop.permute.xlu1 %831 }
 0x388   : > { %v848_v26 = vmul.f32 %v5636_v43, %v832_v24  ;;  %v1030_v31 = vrot.slane %v5738_v23, 7  ;;  %v875_v35 = vrot.slane %v5738_v23, 2  ;;  %v874_v43 = vsel %vm641_vm8, %v873_v63, %v872_v17 }
 0x38a   : > { %v5749_v8 = vadd.f32 %v848_v26, %v808_v1  ;;  %1044 = vrot.lane.b32.xlu1 %v1030_v31, %s5249_s25  ;;  %v876_v61 = vsel %vm644_vm9, %v875_v35, %v874_v43 }
 0x38c   : > { %v877_v40 = vrot.slane %v5749_v8, 1  ;;  %v1031_v52 = vrot.slane %v5749_v8, 7 }
 0x38e   : > { %v878_v42 = vsel %vm647_vm10, %v877_v40, %v876_v61 }
 0x38f   : > { %879 = vrot.lane.b32.xlu0 %v878_v42, %s5249_s25 }
 0x393   : > { %1036 = vrot.lane.b32.xlu0 %v1026_v44, %s5249_s25 }
 0x397   : > { %1038 = vrot.lane.b32.xlu0 %v1027_v47, %s5249_s25 }
 0x39b   : > { %1042 = vrot.lane.b32.xlu0 %v1029_v48, %s5249_s25 }
 0x39f   : > { %1046 = vrot.lane.b32.xlu0 %v1031_v52, %s5249_s25 }
 0x401   : > { %v880_v39 = vpop.permute.xlu0 %879 }
 0x402   : > { %4280 = vmatmul.mubr.msk.f32.vlgmr.msra.gmra.mrb[4].mxu1 %vm451_vm3, %v880_v39 }
 0x403   : > { %4449 = vmatpush3.bf16.msra.mxu1 %v5525_v27  ;;  %4290 = vmatprep.mubr.msk.f32.mxu1 %vm5246_vm1, %v5245_v9 }
 0x404   : > { %4450 = vmatprep.subr.bf16.mxu1 %v5244_v4 }
 0x407   : > { %4452 = vmatpush3.bf16.msra.mxu1 %v5528_v29 }
 0x408   : > { %4459 = vmatprep.subr.bf16.mxu1 %v5244_v4 }
 0x4d5   : > { %v949_v41 = vpop.f32.mrb[4].mxu1 }
 0x4d6   : > { %v954_v53 = vrot.slane %v949_v41, 7  ;;  %v955_v16 = vrot.slane %v949_v41, 1  ;;  %v956_v54 = vrot.slane %v949_v41, 2  ;;  %v957_v0 = vrot.slane %v949_v41, 3  ;;  %v4281_v3 = vpop.f32.mrb[5].mxu1 }
 0x4d7   : > { %v958_v34 = vrot.slane %v949_v41, 4  ;;  %v959_v58 = vrot.slane %v949_v41, 5  ;;  %v960_v12 = vrot.slane %v949_v41, 6  ;;  %v970_v19 = vadd.f32 %v949_v41, %v5544_v45 }
 0x4d8   : > { %v969_v21 = vadd.f32 %v954_v53, %v5558_v56  ;;  %v971_v62 = vadd.f32 %v955_v16, %v5550_v49  ;;  %v972_v1 = vadd.f32 %v956_v54, %v5560_v57  ;;  %v973_v60 = vadd.f32 %v957_v0, %v5569_v2  ;;  %v1037_v16 = vpop.permute.xlu0 %1036 }
 0x4d9   : > { %v974_v24 = vadd.f32 %v958_v34, %v5576_v13  ;;  %v975_v11 = vadd.f32 %v959_v58, %v5583_v22  ;;  %v4088_v63 = vmul.f32 -1.442695, %v970_v19  ;;  %v976_v26 = vadd.f32 %v960_v12, %v5590_v32  ;;  %v1033_v19 = vpop.permute.xlu1 %1032 }
 0x4da   : > { %v4087_v33 = vmul.f32 -1.442695, %v969_v21  ;;  %v4089_v35 = vmul.f32 -1.442695, %v971_v62  ;;  %v4090_v20 = vmul.f32 -1.442695, %v972_v1 }
 0x4db   : > { %4663 = vpow2.f32 %v4088_v63  ;;  %v4091_v17 = vmul.f32 -1.442695, %v973_v60  ;;  %v4092_v40 = vmul.f32 -1.442695, %v974_v24  ;;  %v4093_v43 = vmul.f32 -1.442695, %v975_v11 }
 0x4dc   : > { %4665 = vpow2.f32 %v4087_v33  ;;  %v4094_v61 = vmul.f32 -1.442695, %v976_v26  ;;  %v1039_v11 = vpop.permute.xlu0 %1038 }
 0x4dd   : > { %4667 = vpow2.f32 %v4089_v35  ;;  %v1035_v26 = vpop.permute.xlu1 %1034 }
 0x4de   : > { %4669 = vpow2.f32 %v4090_v20 }
 0x4df   : > { %4671 = vpow2.f32 %v4091_v17 }
 0x4e0   : > { %4673 = vpow2.f32 %v4092_v40  ;;  %v1043_v20 = vpop.permute.xlu0 %1042 }
 0x4e1   : > { %4675 = vpow2.f32 %v4093_v43  ;;  %v1041_v40 = vpop.permute.xlu1 %1040 }
 0x4e2   : > { %4677 = vpow2.f32 %v4094_v61 }
 0x4e5   : > { %v4664_v42 = vpop.eup %4663 }
 0x4e6   : > { %v4666_v39 = vpop.eup %4665  ;;  %v1002_v41 = vadd.f32 1.0, %v4664_v42 }
 0x4e7   : > { %v4668_v53 = vpop.eup %4667  ;;  %v1001_v54 = vadd.f32 1.0, %v4666_v39 }
 0x4e8   : > { %v4670_v0 = vpop.eup %4669  ;;  %v1003_v3 = vadd.f32 1.0, %v4668_v53  ;;  %4679 = vrcp.f32 %v1002_v41 }
 0x4e9   : > { %v4672_v34 = vpop.eup %4671  ;;  %v1004_v58 = vadd.f32 1.0, %v4670_v0  ;;  %4681 = vrcp.f32 %v1001_v54 }
 0x4ea   : > { %v4674_v12 = vpop.eup %4673  ;;  %v1005_v21 = vadd.f32 1.0, %v4672_v34  ;;  %4683 = vrcp.f32 %v1003_v3 }
 0x4eb   : > { %v4676_v62 = vpop.eup %4675  ;;  %v1006_v1 = vadd.f32 1.0, %v4674_v12  ;;  %4685 = vrcp.f32 %v1004_v58  ;;  %v1045_v12 = vpop.permute.xlu1 %1044 }
 0x4ec   : > { %v4678_v60 = vpop.eup %4677  ;;  %v1007_v24 = vadd.f32 1.0, %v4676_v62  ;;  %4687 = vrcp.f32 %v1005_v21 }
 0x4ed   : > { %v1008_v63 = vadd.f32 1.0, %v4678_v60  ;;  %4689 = vrcp.f32 %v1006_v1  ;;  %v1047_v1 = vpop.permute.xlu0 %1046 }
 0x4ee   : > { %4691 = vrcp.f32 %v1007_v24 }
 0x4ef   : > { %4693 = vrcp.f32 %v1008_v63 }
 0x4f2   : > { %v5792_v33 = vpop.eup %4679 }
 0x4f3   : > { %v5794_v35 = vpop.eup %4681  ;;  %v1057_v41 = vmul.f32 %v5792_v33, %v1035_v26 }
 0x4f4   : > { %v5796_v17 = vpop.eup %4683  ;;  %v1056_v43 = vmul.f32 %v5794_v35, %v1033_v19 }
 0x4f5   : > { %v5799_v61 = vpop.eup %4685  ;;  %v1058_v42 = vmul.f32 %v5796_v17, %v1037_v16 }
 0x4f6   : > { %v5802_v39 = vpop.eup %4687  ;;  %v1059_v53 = vmul.f32 %v5799_v61, %v1039_v11  ;;  %v1072_v54 = vrot.slane %v1056_v43, 1 }
 0x4f7   : > { %v5806_v0 = vpop.eup %4689  ;;  %v1060_v3 = vmul.f32 %v5802_v39, %v1041_v40  ;;  %v1074_v34 = vrot.slane %v1058_v42, 7 }
 0x4f8   : > { %v5809_v58 = vpop.eup %4691  ;;  %v1061_v19 = vmul.f32 %v5806_v0, %v1043_v20  ;;  %v1073_v21 = vsel %vm629_vm4, %v1057_v41, %v1072_v54  ;;  %v1076_v16 = vrot.slane %v1059_v53, 6 }
 0x4f9   : > { %v5813_v62 = vpop.eup %4693  ;;  %v1062_v60 = vmul.f32 %v5809_v58, %v1045_v12  ;;  %v1075_v24 = vsel %vm632_vm5, %v1074_v34, %v1073_v21  ;;  %v1078_v11 = vrot.slane %v1060_v3, 5 }
 0x4fa   : > { %v1063_v63 = vmul.f32 %v5813_v62, %v1047_v1  ;;  %v1077_v26 = vsel %vm635_vm6, %v1076_v16, %v1075_v24  ;;  %v1080_v40 = vrot.slane %v1061_v19, 4  ;;  %v1213_v50 = vsub.f32 1.0, %v5813_v62 }
 0x4fb   : > { %v1079_v43 = vsel %vm638_vm7, %v1078_v11, %v1077_v26  ;;  %v1082_v42 = vrot.slane %v1062_v60, 3 }
 0x4fc   : > { %v1081_v20 = vsel %vm641_vm8, %v1080_v40, %v1079_v43  ;;  %v1084_v41 = vrot.slane %v1063_v63, 2 }
 0x4fd   : > { %v1083_v53 = vsel %vm644_vm9, %v1082_v42, %v1081_v20 }
 0x4fe   : > { %v1085_v54 = vsel %vm647_vm10, %v1084_v41, %v1083_v53 }
 0x4ff   : > { %4291 = vmatmul.mubr.msk.f32.vlgmr.msra.gmra.mrb[6].mxu1 %vm451_vm3, %v1085_v54 }
 0x500   : > { %4461 = vmatpush3.bf16.msra.mxu1 %v5525_v27  ;;  %4312 = vmatprep.mubr.msk.f32.mxu1 %vm5246_vm1, %v5245_v9 }
 0x501   : > { %4462 = vmatprep.subr.bf16.mxu1 %v5244_v4 }
 0x504   : > { %4464 = vmatpush3.bf16.msra.mxu1 %v5528_v29 }
 0x505   : > { %4471 = vmatprep.subr.bf16.mxu1 %v5244_v4 }
 0x5d2   : > { %v1154_v3 = vpop.f32.mrb[6].mxu1 }
 0x5d3   : > { %1168 = vrot.lane.b32.xlu1 %v1154_v3, %s5247_s8  ;;  %v4292_v34 = vpop.f32.mrb[7].mxu1  ;;  %v1160_v12 = vrot.slane %v1154_v3, 1  ;;  %v1159_v19 = vrot.slane %v1154_v3, 7  ;;  %v1161_v21 = vrot.slane %v1154_v3, 2  ;;  %v1162_v16 = vrot.slane %v1154_v3, 3 }
 0x5d4   : > { %v1163_v1 = vrot.slane %v1154_v3, 4  ;;  %v1164_v60 = vrot.slane %v1154_v3, 5  ;;  %v1165_v24 = vrot.slane %v1154_v3, 6 }
 0x5d5   : > { %1170 = vrot.lane.b32.xlu0 %v1160_v12, %s5247_s8 }
 0x5d7   : > { %1166 = vrot.lane.b32.xlu1 %v1159_v19, %s5247_s8 }
 0x5d9   : > { %1172 = vrot.lane.b32.xlu0 %v1161_v21, %s5247_s8 }
 0x5db   : > { %1174 = vrot.lane.b32.xlu1 %v1162_v16, %s5247_s8 }
 0x5dd   : > { %1176 = vrot.lane.b32.xlu0 %v1163_v1, %s5247_s8 }
 0x5df   : > { %1178 = vrot.lane.b32.xlu1 %v1164_v60, %s5247_s8 }
 0x5e1   : > { %1180 = vrot.lane.b32.xlu0 %v1165_v24, %s5247_s8 }
 0x645   : > { %v1169_v11 = vpop.permute.xlu1 %1168 }
 0x646   : > { %v1191_v63 = vadd.f32 %v1169_v11, %v5544_v45 }
 0x647   : > { %v1171_v26 = vpop.permute.xlu0 %1170 }
 0x648   : > { %4695 = vtanh.f32 %v1191_v63  ;;  %v1192_v40 = vadd.f32 %v1171_v26, %v5550_v49 }
 0x649   : > { %v1167_v43 = vpop.permute.xlu1 %1166 }
 0x64a   : > { %4697 = vtanh.f32 %v1192_v40  ;;  %v1190_v42 = vadd.f32 %v1167_v43, %v5558_v56 }
 0x64b   : > { %v1173_v20 = vpop.permute.xlu0 %1172 }
 0x64c   : > { %4699 = vtanh.f32 %v1190_v42  ;;  %v1193_v41 = vadd.f32 %v1173_v20, %v5560_v57  ;;  %v1208_v20 = vsub.f32 1.0, %v5796_v17 }
 0x64d   : > { %v1175_v53 = vpop.permute.xlu1 %1174 }
 0x64e   : > { %4701 = vtanh.f32 %v1193_v41  ;;  %v1194_v54 = vadd.f32 %v1175_v53, %v5569_v2  ;;  %v1206_v41 = vsub.f32 1.0, %v5794_v35  ;;  %v1207_v53 = vsub.f32 1.0, %v5792_v33 }
 0x64f   : > { %v1177_v3 = vpop.permute.xlu0 %1176 }
 0x650   : > { %4703 = vtanh.f32 %v1194_v54  ;;  %v1195_v34 = vadd.f32 %v1177_v3, %v5576_v13 }
 0x651   : > { %v1179_v12 = vpop.permute.xlu1 %1178 }
 0x652   : > { %v4696_v19 = vpop.eup %4695  ;;  %4705 = vtanh.f32 %v1195_v34  ;;  %v1196_v21 = vadd.f32 %v1179_v12, %v5583_v22  ;;  %v1209_v34 = vsub.f32 1.0, %v5799_v61 }
 0x653   : > { %v1181_v16 = vpop.permute.xlu0 %1180  ;;  %1240 = vrot.lane.b32.xlu1 %v4696_v19, %s5249_s25  ;;  %v1224_v19 = vmul.f32 %v1208_v20, %v1026_v44 }
 0x654   : > { %v4698_v1 = vpop.eup %4697  ;;  %4707 = vtanh.f32 %v1196_v21  ;;  %v1197_v60 = vadd.f32 %v1181_v16, %v5590_v32  ;;  %v1210_v16 = vsub.f32 1.0, %v5802_v39  ;;  %v1225_v7 = vmul.f32 %v1209_v34, %v1027_v47 }
 0x655   : > { %1242 = vrot.lane.b32.xlu0 %v4698_v1, %s5249_s25  ;;  %v1222_v1 = vmul.f32 %v1206_v41, %v1025_v5 }
 0x656   : > { %v4700_v24 = vpop.eup %4699  ;;  %4709 = vtanh.f32 %v1197_v60  ;;  %v1226_v28 = vmul.f32 %v1210_v16, %v1028_v30 }
 0x657   : > { %1238 = vrot.lane.b32.xlu1 %v4700_v24, %s5249_s25  ;;  %v1223_v24 = vmul.f32 %v1207_v53, %v5709_v36 }
 0x658   : > { %v4702_v11 = vpop.eup %4701 }
 0x659   : > { %1244 = vrot.lane.b32.xlu0 %v4702_v11, %s5249_s25 }
 0x65a   : > { %v4704_v63 = vpop.eup %4703 }
 0x65b   : > { %1246 = vrot.lane.b32.xlu1 %v4704_v63, %s5249_s25 }
 0x65c   : > { %v4706_v26 = vpop.eup %4705 }
 0x65d   : > { %1248 = vrot.lane.b32.xlu0 %v4706_v26, %s5249_s25 }
 0x65e   : > { %v4708_v40 = vpop.eup %4707 }
 0x65f   : > { %1250 = vrot.lane.b32.xlu1 %v4708_v40, %s5249_s25 }
 0x660   : > { %v4710_v43 = vpop.eup %4709 }
 0x661   : > { %1252 = vrot.lane.b32.xlu0 %v4710_v43, %s5249_s25 }
 0x6c5   : > { %v1241_v42 = vpop.permute.xlu1 %1240 }
 0x6c6   : > { %v1263_v12 = vmul.f32 %v5792_v33, %v1241_v42 }
 0x6c7   : > { %v1243_v54 = vpop.permute.xlu0 %1242 }
 0x6c8   : > { %v1264_v3 = vmul.f32 %v5796_v17, %v1243_v54  ;;  %v1211_v17 = vsub.f32 1.0, %v5806_v0  ;;  %v5873_v33 = vadd.f32 %v1263_v12, %v1223_v24 }
 0x6c9   : > { %v1239_v21 = vpop.permute.xlu1 %1238 }
 0x6ca   : > { %v1262_v60 = vmul.f32 %v5794_v35, %v1239_v21  ;;  %v1272_v11 = vadd.f32 %v1264_v3, %v1224_v19  ;;  %v1212_v35 = vsub.f32 1.0, %v5809_v58  ;;  %v1227_v47 = vmul.f32 %v1211_v17, %v1029_v48 }
 0x6cb   : > { %v1245_v63 = vpop.permute.xlu0 %1244  ;;  %v1229_v19 = vmul.f32 %v1213_v50, %v1031_v52  ;;  %v1447_v17 = vrot.slane %v5873_v33, 7 }
 0x6cc   : > { %v5868_v26 = vadd.f32 %v1262_v60, %v1222_v1  ;;  %v1265_v44 = vmul.f32 %v5799_v61, %v1245_v63  ;;  %v5883_v55 = vrot.slane %v1272_v11, 7  ;;  %v1228_v48 = vmul.f32 %v1212_v35, %v1030_v31 }
 0x6cd   : > { %v1247_v5 = vpop.permute.xlu1 %1246 }
 0x6ce   : > { %v1286_v36 = vrot.slane %v5868_v26, 1  ;;  %v5879_v40 = vadd.f32 %v1265_v44, %v1225_v7  ;;  %v1266_v43 = vmul.f32 %v5802_v39, %v1247_v5  ;;  %v1446_v42 = vrot.slane %v5868_v26, 7 }
 0x6cf   : > { %v1249_v61 = vpop.permute.xlu0 %1248 }
 0x6d0   : > { %v1287_v30 = vsel %vm629_vm4, %v5873_v33, %v1286_v36  ;;  %v1290_v20 = vrot.slane %v5879_v40, 6  ;;  %v5891_v41 = vadd.f32 %v1266_v43, %v1226_v28  ;;  %v1267_v53 = vmul.f32 %v5806_v0, %v1249_v61  ;;  %1453 = vrot.lane.b32.xlu0 %v1446_v42, %s5249_s25 }
 0x6d1   : > { %v1289_v14 = vsel %vm632_vm5, %v5883_v55, %v1287_v30  ;;  %v1251_v39 = vpop.permute.xlu1 %1250  ;;  %v1448_v54 = vrot.slane %v5879_v40, 7 }
 0x6d2   : > { %v1291_v3 = vsel %vm635_vm6, %v1290_v20, %v1289_v14  ;;  %v1292_v34 = vrot.slane %v5891_v41, 5  ;;  %v5904_v12 = vadd.f32 %v1267_v53, %v1227_v47  ;;  %v1268_v0 = vmul.f32 %v5809_v58, %v1251_v39 }
 0x6d3   : > { %v1253_v21 = vpop.permute.xlu0 %1252  ;;  %v1449_v8 = vrot.slane %v5891_v41, 7 }
 0x6d4   : > { %v1294_v16 = vrot.slane %v5904_v12, 4  ;;  %v5910_v1 = vadd.f32 %v1268_v0, %v1228_v48  ;;  %v1269_v23 = vmul.f32 %v5813_v62, %v1253_v21  ;;  %1459 = vrot.lane.b32.xlu0 %v1448_v54, %s5249_s25  ;;  %v1293_v31 = vsel %vm638_vm7, %v1292_v34, %v1291_v3 }
 0x6d5   : > { %v1450_v7 = vrot.slane %v5904_v12, 7 }
 0x6d6   : > { %v1296_v60 = vrot.slane %v5910_v1, 3  ;;  %v5918_v24 = vadd.f32 %v1269_v23, %v1229_v19  ;;  %v1295_v52 = vsel %vm641_vm8, %v1294_v16, %v1293_v31  ;;  %v6979_v63 = vrot.slane %v5910_v1, 7 }
 0x6d8   : > { %v1298_v58 = vrot.slane %v5918_v24, 2  ;;  %1461 = vrot.lane.b32.xlu0 %v1449_v8, %s5249_s25  ;;  %v1297_v62 = vsel %vm644_vm9, %v1296_v60, %v1295_v52  ;;  %v6980_v44 = vrot.slane %v5918_v24, 7 }
 0x6da   : > { %v1299_v11 = vsel %vm647_vm10, %v1298_v58, %v1297_v62 }
 0x6db   : > { %1300 = vrot.lane.b32.xlu1 %v1299_v11, %s5249_s25 }
 0x6dc   : > { %1465 = vrot.lane.b32.xlu0 %v6979_v63, %s5249_s25 }
 0x6df   : > { %1455 = vrot.lane.b32.xlu1 %v1447_v17, %s5249_s25 }
 0x6e3   : > { %1457 = vrot.lane.b32.xlu1 %v5883_v55, %s5249_s25 }
 0x6e7   : > { %1463 = vrot.lane.b32.xlu1 %v1450_v7, %s5249_s25 }
 0x6eb   : > { %1467 = vrot.lane.b32.xlu1 %v6980_v44, %s5249_s25 }
 0x74d   : > { %v1301_v28 = vpop.permute.xlu1 %1300 }
 0x74e   : > { %4302 = vmatmul.mubr.msk.f32.vlgmr.msra.gmra.mrb[16].mxu0 %vm451_vm3, %v1301_v28 }
 0x74f   : > { %4467 = vmatpush3.bf16.msra.mxu0 %v5479_v10  ;;  %4323 = vmatprep.mubr.msk.f32.mxu0 %vm5246_vm1, %v5245_v9 }
 0x750   : > { %4468 = vmatprep.subr.bf16.mxu0 %v5244_v4 }
 0x753   : > { %4470 = vmatpush3.bf16.msra.mxu0 %v5485_v15 }
 0x754   : > { %4477 = vmatprep.subr.bf16.mxu0 %v5244_v4 }
 0x821   : > { %v1370_v5 = vpop.f32.mrb[16].mxu0 }
 0x822   : > { %v1375_v35 = vrot.slane %v1370_v5, 6  ;;  %v1376_v36 = vrot.slane %v1370_v5, 7  ;;  %v1377_v43 = vrot.slane %v1370_v5, 1  ;;  %v1378_v47 = vrot.slane %v1370_v5, 2  ;;  %v4303_v61 = vpop.f32.mrb[17].mxu0 }
 0x823   : > { %v1379_v50 = vrot.slane %v1370_v5, 3  ;;  %v1380_v30 = vrot.slane %v1370_v5, 4  ;;  %v1381_v20 = vrot.slane %v1370_v5, 5  ;;  %v1392_v53 = vadd.f32 %v1370_v5, %v5550_v49  ;;  %v1454_v5 = vpop.permute.xlu0 %1453 }
 0x824   : > { %v1390_v14 = vadd.f32 %v1375_v35, %v5558_v56  ;;  %v1391_v48 = vadd.f32 %v1376_v36, %v5544_v45  ;;  %v1393_v39 = vadd.f32 %v1377_v43, %v5560_v57  ;;  %v1394_v3 = vadd.f32 %v1378_v47, %v5569_v2  ;;  %v1456_v43 = vpop.permute.xlu1 %1455 }
 0x825   : > { %v1395_v34 = vadd.f32 %v1379_v50, %v5576_v13  ;;  %v1396_v0 = vadd.f32 %v1380_v30, %v5583_v22  ;;  %v4099_v19 = vmul.f32 -1.442695, %v1392_v53  ;;  %v1397_v21 = vadd.f32 %v1381_v20, %v5590_v32 }
 0x826   : > { %v4097_v16 = vmul.f32 -1.442695, %v1390_v14  ;;  %v4098_v23 = vmul.f32 -1.442695, %v1391_v48  ;;  %v4100_v31 = vmul.f32 -1.442695, %v1393_v39 }
 0x827   : > { %4711 = vpow2.f32 %v4099_v19  ;;  %v4101_v60 = vmul.f32 -1.442695, %v1394_v3  ;;  %v4102_v52 = vmul.f32 -1.442695, %v1395_v34  ;;  %v4103_v58 = vmul.f32 -1.442695, %v1396_v0  ;;  %v1460_v34 = vpop.permute.xlu0 %1459 }
 0x828   : > { %4713 = vpow2.f32 %v4097_v16  ;;  %v4104_v62 = vmul.f32 -1.442695, %v1397_v21  ;;  %v1458_v19 = vpop.permute.xlu1 %1457 }
 0x829   : > { %4715 = vpow2.f32 %v4098_v23 }
 0x82a   : > { %4717 = vpow2.f32 %v4100_v31 }
 0x82b   : > { %4719 = vpow2.f32 %v4101_v60  ;;  %v1462_v23 = vpop.permute.xlu0 %1461 }
 0x82c   : > { %4721 = vpow2.f32 %v4102_v52  ;;  %v1464_v60 = vpop.permute.xlu1 %1463 }
 0x82d   : > { %4723 = vpow2.f32 %v4103_v58 }
 0x82e   : > { %4725 = vpow2.f32 %v4104_v62 }
 0x831   : > { %v4712_v11 = vpop.eup %4711 }
 0x832   : > { %v4714_v28 = vpop.eup %4713  ;;  %v1424_v35 = vadd.f32 1.0, %v4712_v11 }
 0x833   : > { %v4716_v36 = vpop.eup %4715  ;;  %v1422_v47 = vadd.f32 1.0, %v4714_v28 }
 0x834   : > { %v4718_v61 = vpop.eup %4717  ;;  %v1423_v50 = vadd.f32 1.0, %v4716_v36  ;;  %4727 = vrcp.f32 %v1424_v35 }
 0x835   : > { %v4720_v30 = vpop.eup %4719  ;;  %v1425_v20 = vadd.f32 1.0, %v4718_v61  ;;  %4729 = vrcp.f32 %v1422_v47 }
 0x836   : > { %v4722_v53 = vpop.eup %4721  ;;  %v1426_v14 = vadd.f32 1.0, %v4720_v30  ;;  %4731 = vrcp.f32 %v1423_v50 }
 0x837   : > { %v4724_v48 = vpop.eup %4723  ;;  %v1427_v39 = vadd.f32 1.0, %v4722_v53  ;;  %4733 = vrcp.f32 %v1425_v20  ;;  %v1466_v20 = vpop.permute.xlu0 %1465 }
 0x838   : > { %v4726_v3 = vpop.eup %4725  ;;  %v1428_v0 = vadd.f32 1.0, %v4724_v48  ;;  %4735 = vrcp.f32 %v1426_v14 }
 0x839   : > { %v1429_v21 = vadd.f32 1.0, %v4726_v3  ;;  %4737 = vrcp.f32 %v1427_v39 }
 0x83a   : > { %4739 = vrcp.f32 %v1428_v0 }
 0x83b   : > { %4741 = vrcp.f32 %v1429_v21 }
 0x83e   : > { %v5962_v16 = vpop.eup %4727 }
 0x83f   : > { %v5964_v31 = vpop.eup %4729  ;;  %v1479_v53 = vmul.f32 %v5962_v16, %v1458_v19 }
 0x840   : > { %v5966_v52 = vpop.eup %4731  ;;  %v1477_v58 = vmul.f32 %v5964_v31, %v1454_v5 }
 0x841   : > { %v5969_v62 = vpop.eup %4733  ;;  %v1478_v11 = vmul.f32 %v5966_v52, %v1456_v43  ;;  %v1468_v43 = vpop.permute.xlu1 %1467 }
 0x842   : > { %v5972_v28 = vpop.eup %4735  ;;  %v1480_v35 = vmul.f32 %v5969_v62, %v1460_v34  ;;  %v1493_v36 = vrot.slane %v1477_v58, 2 }
 0x843   : > { %v5975_v47 = vpop.eup %4737  ;;  %v1481_v61 = vmul.f32 %v5972_v28, %v1462_v23  ;;  %v1494_v50 = vrot.slane %v1478_v11, 1 }
 0x844   : > { %v5978_v30 = vpop.eup %4739  ;;  %v1482_v5 = vmul.f32 %v5975_v47, %v1464_v60  ;;  %v1497_v3 = vrot.slane %v1480_v35, 7 }
 0x845   : > { %v5982_v14 = vpop.eup %4741  ;;  %v1483_v48 = vmul.f32 %v5978_v30, %v1466_v20  ;;  %v1495_v39 = vsel %vm629_vm4, %v1494_v50, %v1493_v36  ;;  %v1499_v21 = vrot.slane %v1481_v61, 6 }
 0x846   : > { %v1484_v34 = vmul.f32 %v5982_v14, %v1468_v43  ;;  %v1496_v0 = vsel %vm632_vm5, %v1479_v53, %v1495_v39  ;;  %v1501_v58 = vrot.slane %v1482_v5, 5 }
 0x847   : > { %v1498_v23 = vsel %vm635_vm6, %v1497_v3, %v1496_v0  ;;  %v1503_v11 = vrot.slane %v1483_v48, 4 }
 0x848   : > { %v1500_v19 = vsel %vm638_vm7, %v1499_v21, %v1498_v23  ;;  %v1505_v63 = vrot.slane %v1484_v34, 3 }
 0x849   : > { %v1502_v60 = vsel %vm641_vm8, %v1501_v58, %v1500_v19 }
 0x84a   : > { %v1504_v44 = vsel %vm644_vm9, %v1503_v11, %v1502_v60 }
 0x84b   : > { %v1506_v20 = vsel %vm647_vm10, %v1505_v63, %v1504_v44 }
 0x84c   : > { %4313 = vmatmul.mubr.msk.f32.vlgmr.msra.gmra.mrb[8].mxu1 %vm451_vm3, %v1506_v20 }
 0x84d   : > { %4473 = vmatpush3.bf16.msra.mxu1 %v5525_v27  ;;  %4334 = vmatprep.mubr.msk.f32.mxu1 %vm5246_vm1, %v5245_v9 }
 0x84e   : > { %4474 = vmatprep.subr.bf16.mxu1 %v5244_v4 }
 0x851   : > { %4476 = vmatpush3.bf16.msra.mxu1 %v5528_v29 }
 0x852   : > { %4483 = vmatprep.subr.bf16.mxu1 %v5244_v4 }
 0x91f   : > { %v1575_v35 = vpop.f32.mrb[8].mxu1 }
 0x920   : > { %1591 = vrot.lane.b32.xlu1 %v1575_v35, %s5247_s8  ;;  %v4314_v36 = vpop.f32.mrb[9].mxu1  ;;  %v1580_v61 = vrot.slane %v1575_v35, 6  ;;  %v1581_v63 = vrot.slane %v1575_v35, 7  ;;  %v1582_v44 = vrot.slane %v1575_v35, 1  ;;  %v1584_v50 = vrot.slane %v1575_v35, 3 }
 0x921   : > { %v1583_v53 = vrot.slane %v1575_v35, 2  ;;  %v1586_v5 = vrot.slane %v1575_v35, 5  ;;  %v1585_v43 = vrot.slane %v1575_v35, 4 }
 0x922   : > { %1587 = vrot.lane.b32.xlu0 %v1580_v61, %s5247_s8 }
 0x924   : > { %1589 = vrot.lane.b32.xlu1 %v1581_v63, %s5247_s8 }
 0x926   : > { %1593 = vrot.lane.b32.xlu0 %v1582_v44, %s5247_s8 }
 0x928   : > { %1597 = vrot.lane.b32.xlu1 %v1584_v50, %s5247_s8 }
 0x92a   : > { %1595 = vrot.lane.b32.xlu0 %v1583_v53, %s5247_s8 }
 0x92c   : > { %1601 = vrot.lane.b32.xlu1 %v1586_v5, %s5247_s8 }
 0x92e   : > { %1599 = vrot.lane.b32.xlu0 %v1585_v43, %s5247_s8 }
 0x992   : > { %v1592_v48 = vpop.permute.xlu1 %1591 }
 0x993   : > { %v1613_v39 = vadd.f32 %v1592_v48, %v5550_v49 }
 0x994   : > { %v1588_v3 = vpop.permute.xlu0 %1587 }
 0x995   : > { %4743 = vtanh.f32 %v1613_v39  ;;  %v1611_v34 = vadd.f32 %v1588_v3, %v5558_v56 }
 0x996   : > { %v1590_v0 = vpop.permute.xlu1 %1589 }
 0x997   : > { %4745 = vtanh.f32 %v1611_v34  ;;  %v1612_v21 = vadd.f32 %v1590_v0, %v5544_v45  ;;  %v1627_v34 = vsub.f32 1.0, %v5964_v31 }
 0x998   : > { %v1594_v23 = vpop.permute.xlu0 %1593 }
 0x999   : > { %4747 = vtanh.f32 %v1612_v21  ;;  %v1614_v58 = vadd.f32 %v1594_v23, %v5560_v57  ;;  %v1629_v21 = vsub.f32 1.0, %v5962_v16  ;;  %v1628_v23 = vsub.f32 1.0, %v5966_v52 }
 0x99a   : > { %v1598_v19 = vpop.permute.xlu1 %1597 }
 0x99b   : > { %4749 = vtanh.f32 %v1614_v58  ;;  %v1616_v11 = vadd.f32 %v1598_v19, %v5576_v13  ;;  %v1630_v19 = vsub.f32 1.0, %v5969_v62 }
 0x99c   : > { %v1596_v60 = vpop.permute.xlu0 %1595 }
 0x99d   : > { %4751 = vtanh.f32 %v1616_v11  ;;  %v1615_v20 = vadd.f32 %v1596_v60, %v5569_v2  ;;  %v1643_v60 = vmul.f32 %v1627_v34, %v1446_v42 }
 0x99e   : > { %v1602_v35 = vpop.permute.xlu1 %1601 }
 0x99f   : > { %v4744_v36 = vpop.eup %4743  ;;  %4753 = vtanh.f32 %v1615_v20  ;;  %v1618_v61 = vadd.f32 %v1602_v35, %v5590_v32 }
 0x9a0   : > { %1663 = vrot.lane.b32.xlu1 %v4744_v36, %s5249_s25  ;;  %v1600_v63 = vpop.permute.xlu0 %1599  ;;  %v1645_v36 = vmul.f32 %v1629_v21, %v5883_v55 }
 0x9a1   : > { %v4746_v44 = vpop.eup %4745  ;;  %4755 = vtanh.f32 %v1618_v61  ;;  %v1617_v50 = vadd.f32 %v1600_v63, %v5583_v22  ;;  %v1644_v63 = vmul.f32 %v1628_v23, %v1447_v17 }
 0x9a2   : > { %1659 = vrot.lane.b32.xlu0 %v4746_v44, %s5249_s25 }
 0x9a3   : > { %v4748_v53 = vpop.eup %4747  ;;  %4757 = vtanh.f32 %v1617_v50  ;;  %v1646_v50 = vmul.f32 %v1630_v19, %v1448_v54  ;;  %v7002_v19 = vrot.slane %v5918_v24, 7 }
 0x9a4   : > { %1661 = vrot.lane.b32.xlu1 %v4748_v53, %s5249_s25 }
 0x9a5   : > { %v4750_v5 = vpop.eup %4749 }
 0x9a6   : > { %1665 = vrot.lane.b32.xlu0 %v4750_v5, %s5249_s25  ;;  %v1632_v5 = vsub.f32 1.0, %v5975_v47 }
 0x9a7   : > { %v4752_v43 = vpop.eup %4751 }
 0x9a8   : > { %1669 = vrot.lane.b32.xlu1 %v4752_v43, %s5249_s25  ;;  %v1648_v21 = vmul.f32 %v1632_v5, %v1450_v7 }
 0x9a9   : > { %v4754_v48 = vpop.eup %4753 }
 0x9aa   : > { %1667 = vrot.lane.b32.xlu0 %v4754_v48, %s5249_s25  ;;  %v1634_v48 = vsub.f32 1.0, %v5982_v14 }
 0x9ab   : > { %v4756_v39 = vpop.eup %4755 }
 0x9ac   : > { %1673 = vrot.lane.b32.xlu1 %v4756_v39, %s5249_s25  ;;  %v1650_v12 = vmul.f32 %v1634_v48, %v7002_v19 }
 0x9ad   : > { %v4758_v3 = vpop.eup %4757 }
 0x9ae   : > { %1671 = vrot.lane.b32.xlu0 %v4758_v3, %s5249_s25 }
 0xa12   : > { %v1664_v0 = vpop.permute.xlu1 %1663 }
 0xa13   : > { %v1685_v11 = vmul.f32 %v5962_v16, %v1664_v0  ;;  %v1631_v16 = vsub.f32 1.0, %v5972_v28  ;;  %v1633_v0 = vsub.f32 1.0, %v5978_v30 }
 0xa14   : > { %v1660_v58 = vpop.permute.xlu0 %1659 }
 0xa15   : > { %v1683_v20 = vmul.f32 %v5964_v31, %v1660_v58  ;;  %v6041_v26 = vadd.f32 %v1685_v11, %v1645_v36  ;;  %v1647_v43 = vmul.f32 %v1631_v16, %v1449_v8 }
 0xa16   : > { %v1662_v35 = vpop.permute.xlu1 %1661 }
 0xa17   : > { %v6033_v61 = vadd.f32 %v1683_v20, %v1643_v60  ;;  %v1684_v44 = vmul.f32 %v5966_v52, %v1662_v35  ;;  %v1869_v34 = vrot.slane %v6041_v26, 7  ;;  %v7003_v60 = vrot.slane %v5910_v1, 7 }
 0xa18   : > { %v1666_v53 = vpop.permute.xlu0 %1665 }
 0xa19   : > { %v6043_v42 = vadd.f32 %v1684_v44, %v1644_v63  ;;  %v1686_v31 = vmul.f32 %v5969_v62, %v1666_v53  ;;  %v1867_v55 = vrot.slane %v6033_v61, 7  ;;  %v1707_v17 = vrot.slane %v6033_v61, 2 }
 0xa1a   : > { %v1670_v33 = vpop.permute.xlu1 %1669  ;;  %v1649_v20 = vmul.f32 %v1633_v0, %v7003_v60 }
 0xa1b   : > { %v1708_v52 = vrot.slane %v6043_v42, 1  ;;  %v1694_v40 = vadd.f32 %v1686_v31, %v1646_v50  ;;  %1874 = vrot.lane.b32.xlu1 %v1867_v55, %s5249_s25  ;;  %v1688_v54 = vmul.f32 %v5975_v47, %v1670_v33  ;;  %v1868_v5 = vrot.slane %v6043_v42, 7 }
 0xa1c   : > { %v1668_v62 = vpop.permute.xlu0 %1667 }
 0xa1d   : > { %v1709_v39 = vsel %vm629_vm4, %v1708_v52, %v1707_v17  ;;  %v1687_v3 = vmul.f32 %v5972_v28, %v1668_v62  ;;  %v6063_v58 = vrot.slane %v1694_v40, 7  ;;  %v6073_v28 = vadd.f32 %v1688_v54, %v1648_v21 }
 0xa1e   : > { %v1674_v23 = vpop.permute.xlu1 %1673  ;;  %v1710_v8 = vsel %vm632_vm5, %v6041_v26, %v1709_v39 }
 0xa1f   : > { %v6065_v47 = vadd.f32 %v1687_v3, %v1647_v43  ;;  %v1690_v41 = vmul.f32 %v5982_v14, %v1674_v23  ;;  %1878 = vrot.lane.b32.xlu1 %v1869_v34, %s5249_s25  ;;  %v1712_v36 = vsel %vm635_vm6, %v6063_v58, %v1710_v8  ;;  %v1715_v44 = vrot.slane %v6073_v28, 5 }
 0xa20   : > { %v1672_v7 = vpop.permute.xlu0 %1671  ;;  %v1871_v17 = vrot.slane %v6073_v28, 7 }
 0xa21   : > { %v1713_v11 = vrot.slane %v6065_v47, 6  ;;  %v1689_v14 = vmul.f32 %v5978_v30, %v1672_v7  ;;  %v6081_v35 = vadd.f32 %v1690_v41, %v1650_v12  ;;  %v1870_v33 = vrot.slane %v6065_v47, 7 }
 0xa23   : > { %v6085_v63 = vadd.f32 %v1689_v14, %v1649_v20  ;;  %1880 = vrot.lane.b32.xlu1 %v6063_v58, %s5249_s25  ;;  %v1714_v24 = vsel %vm638_vm7, %v1713_v11, %v1712_v36  ;;  %v1719_v30 = vrot.slane %v6081_v35, 3  ;;  %v6981_v52 = vrot.slane %v6081_v35, 7 }
 0xa24   : > { %v1716_v53 = vsel %vm641_vm8, %v1715_v44, %v1714_v24 }
 0xa25   : > { %v1717_v50 = vrot.slane %v6085_v63, 4  ;;  %v1872_v1 = vrot.slane %v6085_v63, 7 }
 0xa27   : > { %1886 = vrot.lane.b32.xlu1 %v1872_v1, %s5249_s25  ;;  %v1718_v16 = vsel %vm644_vm9, %v1717_v50, %v1716_v53 }
 0xa28   : > { %v1720_v31 = vsel %vm647_vm10, %v1719_v30, %v1718_v16 }
 0xa29   : > { %1721 = vrot.lane.b32.xlu0 %v1720_v31, %s5249_s25 }
 0xa2d   : > { %1876 = vrot.lane.b32.xlu0 %v1868_v5, %s5249_s25 }
 0xa31   : > { %1882 = vrot.lane.b32.xlu0 %v1870_v33, %s5249_s25 }
 0xa35   : > { %1884 = vrot.lane.b32.xlu0 %v1871_v17, %s5249_s25 }
 0xa39   : > { %1888 = vrot.lane.b32.xlu0 %v6981_v52, %s5249_s25 }
 0xa9b   : > { %v1722_v40 = vpop.permute.xlu0 %1721 }
 0xa9c   : > { %4324 = vmatmul.mubr.msk.f32.vlgmr.msra.gmra.mrb[18].mxu0 %vm451_vm3, %v1722_v40 }
 0xa9d   : > { %4479 = vmatpush3.bf16.msra.mxu0 %v5479_v10  ;;  %4345 = vmatprep.mubr.msk.f32.mxu0 %vm5246_vm1, %v5245_v9 }
 0xa9e   : > { %4480 = vmatprep.subr.bf16.mxu0 %v5244_v4 }
 0xaa1   : > { %4482 = vmatpush3.bf16.msra.mxu0 %v5485_v15 }
 0xaa2   : > { %4489 = vmatprep.subr.bf16.mxu0 %v5244_v4 }
 0xb6f   : > { %v1791_v54 = vpop.f32.mrb[18].mxu0 }
 0xb70   : > { %v1796_v43 = vrot.slane %v1791_v54, 5  ;;  %v1797_v62 = vrot.slane %v1791_v54, 6  ;;  %v1798_v48 = vrot.slane %v1791_v54, 7  ;;  %v1799_v39 = vrot.slane %v1791_v54, 1  ;;  %v4325_v3 = vpop.f32.mrb[19].mxu0 }
 0xb71   : > { %v1800_v0 = vrot.slane %v1791_v54, 2  ;;  %v1801_v21 = vrot.slane %v1791_v54, 3  ;;  %v1802_v23 = vrot.slane %v1791_v54, 4  ;;  %v1814_v41 = vadd.f32 %v1791_v54, %v5560_v57  ;;  %v1875_v54 = vpop.permute.xlu1 %1874 }
 0xb72   : > { %v1811_v8 = vadd.f32 %v1796_v43, %v5558_v56  ;;  %v1812_v19 = vadd.f32 %v1797_v62, %v5544_v45  ;;  %v1813_v12 = vadd.f32 %v1798_v48, %v5550_v49  ;;  %v1815_v7 = vadd.f32 %v1799_v39, %v5569_v2  ;;  %v1877_v48 = vpop.permute.xlu0 %1876 }
 0xb73   : > { %v1816_v11 = vadd.f32 %v1800_v0, %v5576_v13  ;;  %v1817_v60 = vadd.f32 %v1801_v21, %v5583_v22  ;;  %v4110_v20 = vmul.f32 -1.442695, %v1814_v41  ;;  %v1818_v14 = vadd.f32 %v1802_v23, %v5590_v32 }
 0xb74   : > { %v4107_v36 = vmul.f32 -1.442695, %v1811_v8  ;;  %v4108_v24 = vmul.f32 -1.442695, %v1812_v19  ;;  %v4109_v44 = vmul.f32 -1.442695, %v1813_v12 }
 0xb75   : > { %4759 = vpow2.f32 %v4110_v20  ;;  %v4111_v50 = vmul.f32 -1.442695, %v1815_v7  ;;  %v4112_v30 = vmul.f32 -1.442695, %v1816_v11  ;;  %v4113_v53 = vmul.f32 -1.442695, %v1817_v60  ;;  %v1879_v11 = vpop.permute.xlu1 %1878 }
 0xb76   : > { %4761 = vpow2.f32 %v4107_v36  ;;  %v4114_v16 = vmul.f32 -1.442695, %v1818_v14  ;;  %v1883_v20 = vpop.permute.xlu0 %1882 }
 0xb77   : > { %4763 = vpow2.f32 %v4108_v24 }
 0xb78   : > { %4765 = vpow2.f32 %v4109_v44 }
 0xb79   : > { %4767 = vpow2.f32 %v4111_v50  ;;  %v1881_v24 = vpop.permute.xlu1 %1880 }
 0xb7a   : > { %4769 = vpow2.f32 %v4112_v30  ;;  %v1885_v50 = vpop.permute.xlu0 %1884 }
 0xb7b   : > { %4771 = vpow2.f32 %v4113_v53 }
 0xb7c   : > { %4773 = vpow2.f32 %v4114_v16 }
 0xb7f   : > { %v4760_v31 = vpop.eup %4759 }
 0xb80   : > { %v4762_v40 = vpop.eup %4761  ;;  %v1846_v43 = vadd.f32 1.0, %v4760_v31 }
 0xb81   : > { %v4764_v62 = vpop.eup %4763  ;;  %v1843_v39 = vadd.f32 1.0, %v4762_v40 }
 0xb82   : > { %v4766_v3 = vpop.eup %4765  ;;  %v1844_v0 = vadd.f32 1.0, %v4764_v62  ;;  %4775 = vrcp.f32 %v1846_v43 }
 0xb83   : > { %v4768_v21 = vpop.eup %4767  ;;  %v1845_v23 = vadd.f32 1.0, %v4766_v3  ;;  %4777 = vrcp.f32 %v1843_v39 }
 0xb84   : > { %v4770_v41 = vpop.eup %4769  ;;  %v1847_v8 = vadd.f32 1.0, %v4768_v21  ;;  %4779 = vrcp.f32 %v1844_v0 }
 0xb85   : > { %v4772_v19 = vpop.eup %4771  ;;  %v1848_v12 = vadd.f32 1.0, %v4770_v41  ;;  %4781 = vrcp.f32 %v1845_v23  ;;  %v1887_v23 = vpop.permute.xlu1 %1886 }
 0xb86   : > { %v4774_v7 = vpop.eup %4773  ;;  %v1849_v60 = vadd.f32 1.0, %v4772_v19  ;;  %4783 = vrcp.f32 %v1847_v8  ;;  %v1889_v19 = vpop.permute.xlu0 %1888 }
 0xb87   : > { %v1850_v14 = vadd.f32 1.0, %v4774_v7  ;;  %4785 = vrcp.f32 %v1848_v12 }
 0xb88   : > { %4787 = vrcp.f32 %v1849_v60 }
 0xb89   : > { %4789 = vrcp.f32 %v1850_v14 }
 0xb8c   : > { %v6132_v36 = vpop.eup %4775 }
 0xb8d   : > { %v6134_v44 = vpop.eup %4777 }
 0xb8e   : > { %v6136_v30 = vpop.eup %4779  ;;  %v1898_v53 = vmul.f32 %v6134_v44, %v1875_v54 }
 0xb8f   : > { %v6139_v16 = vpop.eup %4781  ;;  %v1899_v31 = vmul.f32 %v6136_v30, %v1877_v48  ;;  %v1901_v48 = vmul.f32 %v6132_v36, %v1881_v24 }
 0xb90   : > { %v6142_v40 = vpop.eup %4783  ;;  %v1900_v43 = vmul.f32 %v6139_v16, %v1879_v11  ;;  %v1914_v62 = vrot.slane %v1898_v53, 3 }
 0xb91   : > { %v6145_v39 = vpop.eup %4785  ;;  %v1902_v3 = vmul.f32 %v6142_v40, %v1883_v20  ;;  %v1915_v0 = vrot.slane %v1899_v31, 2 }
 0xb92   : > { %v6148_v21 = vpop.eup %4787  ;;  %v1903_v41 = vmul.f32 %v6145_v39, %v1885_v50  ;;  %v1917_v54 = vrot.slane %v1900_v43, 1 }
 0xb93   : > { %v6151_v8 = vpop.eup %4789  ;;  %v1904_v12 = vmul.f32 %v6148_v21, %v1887_v23  ;;  %v1916_v7 = vsel %vm629_vm4, %v1915_v0, %v1914_v62  ;;  %v1920_v20 = vrot.slane %v1902_v3, 7 }
 0xb94   : > { %v1905_v11 = vmul.f32 %v6151_v8, %v1889_v19  ;;  %v1918_v60 = vsel %vm632_vm5, %v1917_v54, %v1916_v7  ;;  %v1922_v53 = vrot.slane %v1903_v41, 6 }
 0xb95   : > { %v1919_v14 = vsel %vm635_vm6, %v1901_v48, %v1918_v60  ;;  %v1924_v31 = vrot.slane %v1904_v12, 5 }
 0xb96   : > { %v1921_v50 = vsel %vm638_vm7, %v1920_v20, %v1919_v14  ;;  %v1926_v52 = vrot.slane %v1905_v11, 4 }
 0xb97   : > { %v1923_v43 = vsel %vm641_vm8, %v1922_v53, %v1921_v50 }
 0xb98   : > { %v1925_v24 = vsel %vm644_vm9, %v1924_v31, %v1923_v43 }
 0xb99   : > { %v1927_v23 = vsel %vm647_vm10, %v1926_v52, %v1925_v24 }
 0xb9a   : > { %4335 = vmatmul.mubr.msk.f32.vlgmr.msra.gmra.mrb[10].mxu1 %vm451_vm3, %v1927_v23 }
 0xb9b   : > { %4485 = vmatpush3.bf16.msra.mxu1 %v5525_v27  ;;  %4356 = vmatprep.mubr.msk.f32.mxu1 %vm5246_vm1, %v5245_v9 }
 0xb9c   : > { %4486 = vmatprep.subr.bf16.mxu1 %v5244_v4 }
 0xb9f   : > { %4488 = vmatpush3.bf16.msra.mxu1 %v5528_v29 }
 0xba0   : > { %4495 = vmatprep.subr.bf16.mxu1 %v5244_v4 }
 0xc6d   : > { %v1996_v62 = vpop.f32.mrb[10].mxu1 }
 0xc6e   : > { %2014 = vrot.lane.b32.xlu1 %v1996_v62, %s5247_s8  ;;  %v4336_v3 = vpop.f32.mrb[11].mxu1  ;;  %v2002_v0 = vrot.slane %v1996_v62, 6  ;;  %v2001_v52 = vrot.slane %v1996_v62, 5  ;;  %v2004_v41 = vrot.slane %v1996_v62, 1  ;;  %v2003_v54 = vrot.slane %v1996_v62, 7 }
 0xc6f   : > { %v2005_v19 = vrot.slane %v1996_v62, 2  ;;  %v2006_v48 = vrot.slane %v1996_v62, 3  ;;  %v2007_v12 = vrot.slane %v1996_v62, 4 }
 0xc70   : > { %2010 = vrot.lane.b32.xlu0 %v2002_v0, %s5247_s8 }
 0xc72   : > { %2008 = vrot.lane.b32.xlu1 %v2001_v52, %s5247_s8 }
 0xc74   : > { %2016 = vrot.lane.b32.xlu0 %v2004_v41, %s5247_s8 }
 0xc76   : > { %2012 = vrot.lane.b32.xlu1 %v2003_v54, %s5247_s8 }
 0xc78   : > { %2018 = vrot.lane.b32.xlu0 %v2005_v19, %s5247_s8 }
 0xc7a   : > { %2020 = vrot.lane.b32.xlu1 %v2006_v48, %s5247_s8 }
 0xc7c   : > { %2022 = vrot.lane.b32.xlu0 %v2007_v12, %s5247_s8 }
 0xce0   : > { %v2015_v7 = vpop.permute.xlu1 %2014 }
 0xce1   : > { %v2035_v11 = vadd.f32 %v2015_v7, %v5560_v57 }
 0xce2   : > { %v2011_v60 = vpop.permute.xlu0 %2010 }
 0xce3   : > { %4791 = vtanh.f32 %v2035_v11  ;;  %v2033_v20 = vadd.f32 %v2011_v60, %v5544_v45 }
 0xce4   : > { %v2009_v14 = vpop.permute.xlu1 %2008 }
 0xce5   : > { %4793 = vtanh.f32 %v2033_v20  ;;  %v2032_v53 = vadd.f32 %v2009_v14, %v5558_v56 }
 0xce6   : > { %v2017_v50 = vpop.permute.xlu0 %2016 }
 0xce7   : > { %4795 = vtanh.f32 %v2032_v53  ;;  %v2036_v31 = vadd.f32 %v2017_v50, %v5569_v2  ;;  %v2048_v53 = vsub.f32 1.0, %v6134_v44  ;;  %v2049_v50 = vsub.f32 1.0, %v6136_v30 }
 0xce8   : > { %v2013_v43 = vpop.permute.xlu1 %2012 }
 0xce9   : > { %4797 = vtanh.f32 %v2036_v31  ;;  %v2034_v24 = vadd.f32 %v2013_v43, %v5550_v49 }
 0xcea   : > { %v2019_v23 = vpop.permute.xlu0 %2018 }
 0xceb   : > { %4799 = vtanh.f32 %v2034_v24  ;;  %v2037_v62 = vadd.f32 %v2019_v23, %v5576_v13  ;;  %v2064_v23 = vmul.f32 %v2048_v53, %v1867_v55 }
 0xcec   : > { %v2021_v3 = vpop.permute.xlu1 %2020 }
 0xced   : > { %v4792_v0 = vpop.eup %4791  ;;  %4801 = vtanh.f32 %v2037_v62  ;;  %v2038_v52 = vadd.f32 %v2021_v3, %v5583_v22  ;;  %v2052_v3 = vsub.f32 1.0, %v6142_v40 }
 0xcee   : > { %v2023_v41 = vpop.permute.xlu0 %2022  ;;  %2086 = vrot.lane.b32.xlu1 %v4792_v0, %s5249_s25  ;;  %v2050_v0 = vsub.f32 1.0, %v6139_v16 }
 0xcef   : > { %v4794_v54 = vpop.eup %4793  ;;  %4803 = vtanh.f32 %v2038_v52  ;;  %v2039_v19 = vadd.f32 %v2023_v41, %v5590_v32  ;;  %v2065_v52 = vmul.f32 %v2049_v50, %v1868_v5  ;;  %v2068_v42 = vmul.f32 %v2052_v3, %v1870_v33 }
 0xcf0   : > { %2082 = vrot.lane.b32.xlu0 %v4794_v54, %s5249_s25  ;;  %v2066_v5 = vmul.f32 %v2050_v0, %v1869_v34 }
 0xcf1   : > { %v4796_v48 = vpop.eup %4795  ;;  %4805 = vtanh.f32 %v2039_v19 }
 0xcf2   : > { %2080 = vrot.lane.b32.xlu1 %v4796_v48, %s5249_s25  ;;  %v2051_v48 = vsub.f32 1.0, %v6132_v36 }
 0xcf3   : > { %v4798_v12 = vpop.eup %4797 }
 0xcf4   : > { %2088 = vrot.lane.b32.xlu0 %v4798_v12, %s5249_s25  ;;  %v2067_v26 = vmul.f32 %v2051_v48, %v6063_v58 }
 0xcf5   : > { %v4800_v7 = vpop.eup %4799 }
 0xcf6   : > { %2084 = vrot.lane.b32.xlu1 %v4800_v7, %s5249_s25 }
 0xcf7   : > { %v4802_v11 = vpop.eup %4801 }
 0xcf8   : > { %2090 = vrot.lane.b32.xlu0 %v4802_v11, %s5249_s25 }
 0xcf9   : > { %v4804_v60 = vpop.eup %4803 }
 0xcfa   : > { %2092 = vrot.lane.b32.xlu1 %v4804_v60, %s5249_s25 }
 0xcfb   : > { %v4806_v20 = vpop.eup %4805 }
 0xcfc   : > { %2094 = vrot.lane.b32.xlu0 %v4806_v20, %s5249_s25 }
 0xd60   : > { %v2087_v14 = vpop.permute.xlu1 %2086 }
 0xd62   : > { %v2083_v31 = vpop.permute.xlu0 %2082 }
 0xd63   : > { %v2105_v43 = vmul.f32 %v6136_v30, %v2083_v31  ;;  %v2053_v30 = vsub.f32 1.0, %v6145_v39 }
 0xd64   : > { %v2081_v24 = vpop.permute.xlu1 %2080 }
 0xd65   : > { %v2104_v62 = vmul.f32 %v6134_v44, %v2081_v24  ;;  %v6209_v61 = vadd.f32 %v2105_v43, %v2065_v52  ;;  %v2054_v44 = vsub.f32 1.0, %v6148_v21  ;;  %v2069_v50 = vmul.f32 %v2053_v30, %v1871_v17 }
 0xd66   : > { %v2089_v41 = vpop.permute.xlu0 %2088 }
 0xd67   : > { %v6204_v54 = vadd.f32 %v2104_v62, %v2064_v23  ;;  %v2108_v19 = vmul.f32 %v6142_v40, %v2089_v41  ;;  %v2107_v40 = vmul.f32 %v6132_v36, %v2087_v14  ;;  %v2129_v34 = vrot.slane %v6209_v61, 2 }
 0xd68   : > { %v2085_v55 = vpop.permute.xlu1 %2084  ;;  %v2070_v47 = vmul.f32 %v2054_v44, %v1872_v1  ;;  %v2055_v36 = vsub.f32 1.0, %v6151_v8  ;;  %v7004_v62 = vrot.slane %v6081_v35, 7 }
 0xd69   : > { %v2288_v12 = vrot.slane %v6204_v54, 7  ;;  %v2106_v7 = vmul.f32 %v6139_v16, %v2085_v55  ;;  %v2128_v11 = vrot.slane %v6204_v54, 3  ;;  %v2116_v20 = vadd.f32 %v2108_v19, %v2068_v42 }
 0xd6a   : > { %v2091_v60 = vpop.permute.xlu0 %2090  ;;  %v6238_v14 = vadd.f32 %v2107_v40, %v2067_v26  ;;  %v2289_v42 = vrot.slane %v6209_v61, 7 }
 0xd6b   : > { %v6220_v53 = vadd.f32 %v2106_v7, %v2066_v5  ;;  %v2109_v31 = vmul.f32 %v6145_v39, %v2091_v60  ;;  %2295 = vrot.lane.b32.xlu0 %v2288_v12, %s5249_s25  ;;  %v2130_v58 = vsel %vm629_vm4, %v2129_v34, %v2128_v11  ;;  %v6241_v24 = vrot.slane %v2116_v20, 7 }
 0xd6c   : > { %v2093_v33 = vpop.permute.xlu1 %2092  ;;  %v2291_v5 = vrot.slane %v6238_v14, 7 }
 0xd6d   : > { %v2131_v16 = vrot.slane %v6220_v53, 1  ;;  %v2290_v28 = vrot.slane %v6220_v53, 7  ;;  %v6235_v17 = vadd.f32 %v2109_v31, %v2069_v50  ;;  %v2110_v39 = vmul.f32 %v6148_v21, %v2093_v33 }
 0xd6e   : > { %v2095_v43 = vpop.permute.xlu0 %2094  ;;  %v2071_v21 = vmul.f32 %v2055_v36, %v7004_v62 }
 0xd6f   : > { %v2132_v63 = vsel %vm632_vm5, %v2131_v16, %v2130_v58  ;;  %v2136_v1 = vrot.slane %v6235_v17, 6  ;;  %v6245_v23 = vadd.f32 %v2110_v39, %v2070_v47  ;;  %2299 = vrot.lane.b32.xlu0 %v2290_v28, %s5249_s25  ;;  %v2111_v3 = vmul.f32 %v6151_v8, %v2095_v43 }
 0xd70   : > { %v2133_v0 = vsel %vm635_vm6, %v6238_v14, %v2132_v63  ;;  %v2292_v52 = vrot.slane %v6235_v17, 7 }
 0xd71   : > { %v2138_v41 = vrot.slane %v6245_v23, 5  ;;  %v2135_v19 = vsel %vm638_vm7, %v6241_v24, %v2133_v0  ;;  %v6259_v30 = vadd.f32 %v2111_v3, %v2071_v21  ;;  %v6982_v55 = vrot.slane %v6245_v23, 7 }
 0xd72   : > { %v2137_v48 = vsel %vm641_vm8, %v2136_v1, %v2135_v19 }
 0xd73   : > { %2305 = vrot.lane.b32.xlu0 %v2292_v52, %s5249_s25  ;;  %v2139_v35 = vsel %vm644_vm9, %v2138_v41, %v2137_v48  ;;  %v2140_v8 = vrot.slane %v6259_v30, 4  ;;  %v2294_v7 = vrot.slane %v6259_v30, 7 }
 0xd75   : > { %v2141_v44 = vsel %vm647_vm10, %v2140_v8, %v2139_v35 }
 0xd76   : > { %2142 = vrot.lane.b32.xlu1 %v2141_v44, %s5249_s25 }
 0xd77   : > { %2307 = vrot.lane.b32.xlu0 %v6982_v55, %s5249_s25 }
 0xd7a   : > { %2297 = vrot.lane.b32.xlu1 %v2289_v42, %s5249_s25 }
 0xd7e   : > { %2301 = vrot.lane.b32.xlu1 %v2291_v5, %s5249_s25 }
 0xd82   : > { %2303 = vrot.lane.b32.xlu1 %v6241_v24, %s5249_s25 }
 0xd86   : > { %2309 = vrot.lane.b32.xlu1 %v2294_v7, %s5249_s25 }
 0xde8   : > { %v2143_v40 = vpop.permute.xlu1 %2142 }
 0xde9   : > { %4346 = vmatmul.mubr.msk.f32.vlgmr.msra.gmra.mrb[20].mxu0 %vm451_vm3, %v2143_v40 }
 0xdea   : > { %4491 = vmatpush3.bf16.msra.mxu0 %v5479_v10  ;;  %4367 = vmatprep.mubr.msk.f32.mxu0 %vm5246_vm1, %v5245_v9 }
 0xdeb   : > { %4492 = vmatprep.subr.bf16.mxu0 %v5244_v4 }
 0xdee   : > { %4494 = vmatpush3.bf16.msra.mxu0 %v5485_v15 }
 0xdef   : > { %4501 = vmatprep.subr.bf16.mxu0 %v5244_v4 }
 0xebc   : > { %v2212_v11 = vpop.f32.mrb[20].mxu0 }
 0xebd   : > { %v2217_v60 = vrot.slane %v2212_v11, 4  ;;  %v2218_v20 = vrot.slane %v2212_v11, 5  ;;  %v2219_v50 = vrot.slane %v2212_v11, 6  ;;  %v2220_v31 = vrot.slane %v2212_v11, 7  ;;  %v4347_v26 = vpop.f32.mrb[21].mxu0 }
 0xebe   : > { %v2221_v34 = vrot.slane %v2212_v11, 1  ;;  %v2222_v47 = vrot.slane %v2212_v11, 2  ;;  %v2223_v33 = vrot.slane %v2212_v11, 3  ;;  %v2236_v36 = vadd.f32 %v2212_v11, %v5569_v2  ;;  %v2296_v11 = vpop.permute.xlu0 %2295 }
 0xebf   : > { %v2232_v16 = vadd.f32 %v2217_v60, %v5558_v56  ;;  %v2233_v39 = vadd.f32 %v2218_v20, %v5544_v45  ;;  %v2234_v58 = vadd.f32 %v2219_v50, %v5550_v49  ;;  %v2235_v43 = vadd.f32 %v2220_v31, %v5560_v57  ;;  %v2298_v50 = vpop.permute.xlu1 %2297 }
 0xec0   : > { %v2237_v63 = vadd.f32 %v2221_v34, %v5576_v13  ;;  %v2238_v1 = vadd.f32 %v2222_v47, %v5583_v22  ;;  %v4121_v62 = vmul.f32 -1.442695, %v2236_v36  ;;  %v2239_v21 = vadd.f32 %v2223_v33, %v5590_v32 }
 0xec1   : > { %v4117_v3 = vmul.f32 -1.442695, %v2232_v16  ;;  %v4118_v0 = vmul.f32 -1.442695, %v2233_v39  ;;  %v4119_v41 = vmul.f32 -1.442695, %v2234_v58 }
 0xec2   : > { %v4120_v19 = vmul.f32 -1.442695, %v2235_v43  ;;  %4807 = vpow2.f32 %v4121_v62  ;;  %v4122_v48 = vmul.f32 -1.442695, %v2237_v63  ;;  %v4123_v35 = vmul.f32 -1.442695, %v2238_v1  ;;  %v2300_v63 = vpop.permute.xlu0 %2299 }
 0xec3   : > { %4809 = vpow2.f32 %v4117_v3  ;;  %v4124_v8 = vmul.f32 -1.442695, %v2239_v21  ;;  %v2302_v62 = vpop.permute.xlu1 %2301 }
 0xec4   : > { %4811 = vpow2.f32 %v4118_v0 }
 0xec5   : > { %4813 = vpow2.f32 %v4119_v41 }
 0xec6   : > { %4815 = vpow2.f32 %v4120_v19  ;;  %v2306_v0 = vpop.permute.xlu0 %2305 }
 0xec7   : > { %4817 = vpow2.f32 %v4122_v48  ;;  %v2304_v19 = vpop.permute.xlu1 %2303 }
 0xec8   : > { %4819 = vpow2.f32 %v4123_v35 }
 0xec9   : > { %4821 = vpow2.f32 %v4124_v8 }
 0xecc   : > { %v4808_v44 = vpop.eup %4807 }
 0xecd   : > { %v4810_v40 = vpop.eup %4809  ;;  %v2268_v60 = vadd.f32 1.0, %v4808_v44 }
 0xece   : > { %v4812_v20 = vpop.eup %4811  ;;  %v2264_v31 = vadd.f32 1.0, %v4810_v40 }
 0xecf   : > { %v4814_v26 = vpop.eup %4813  ;;  %v2265_v34 = vadd.f32 1.0, %v4812_v20  ;;  %4823 = vrcp.f32 %v2268_v60 }
 0xed0   : > { %v4816_v47 = vpop.eup %4815  ;;  %v2266_v33 = vadd.f32 1.0, %v4814_v26  ;;  %4825 = vrcp.f32 %v2264_v31 }
 0xed1   : > { %v4818_v36 = vpop.eup %4817  ;;  %v2267_v16 = vadd.f32 1.0, %v4816_v47  ;;  %4827 = vrcp.f32 %v2265_v34 }
 0xed2   : > { %v4820_v39 = vpop.eup %4819  ;;  %v2269_v58 = vadd.f32 1.0, %v4818_v36  ;;  %4829 = vrcp.f32 %v2266_v33  ;;  %v2308_v33 = vpop.permute.xlu0 %2307 }
 0xed3   : > { %v4822_v43 = vpop.eup %4821  ;;  %v2270_v1 = vadd.f32 1.0, %v4820_v39  ;;  %4831 = vrcp.f32 %v2267_v16  ;;  %v2310_v39 = vpop.permute.xlu1 %2309 }
 0xed4   : > { %v2271_v21 = vadd.f32 1.0, %v4822_v43  ;;  %4833 = vrcp.f32 %v2269_v58 }
 0xed5   : > { %4835 = vrcp.f32 %v2270_v1 }
 0xed6   : > { %4837 = vrcp.f32 %v2271_v21 }
 0xed9   : > { %v6302_v3 = vpop.eup %4823 }
 0xeda   : > { %v6304_v41 = vpop.eup %4825 }
 0xedb   : > { %v6306_v48 = vpop.eup %4827  ;;  %v2319_v35 = vmul.f32 %v6304_v41, %v2296_v11 }
 0xedc   : > { %v6309_v8 = vpop.eup %4829  ;;  %v2320_v44 = vmul.f32 %v6306_v48, %v2298_v50 }
 0xedd   : > { %v6312_v40 = vpop.eup %4831  ;;  %v2321_v60 = vmul.f32 %v6309_v8, %v2300_v63  ;;  %v2335_v20 = vrot.slane %v2319_v35, 4  ;;  %v2323_v63 = vmul.f32 %v6302_v3, %v2304_v19 }
 0xede   : > { %v6315_v31 = vpop.eup %4833  ;;  %v2322_v26 = vmul.f32 %v6312_v40, %v2302_v62  ;;  %v2336_v34 = vrot.slane %v2320_v44, 3 }
 0xedf   : > { %v6318_v47 = vpop.eup %4835  ;;  %v2324_v36 = vmul.f32 %v6315_v31, %v2306_v0  ;;  %v2338_v11 = vrot.slane %v2321_v60, 2 }
 0xee0   : > { %v6321_v16 = vpop.eup %4837  ;;  %v2325_v50 = vmul.f32 %v6318_v47, %v2308_v33  ;;  %v2337_v58 = vsel %vm629_vm4, %v2336_v34, %v2335_v20  ;;  %v2340_v43 = vrot.slane %v2322_v26, 1 }
 0xee1   : > { %v2326_v1 = vmul.f32 %v6321_v16, %v2310_v39  ;;  %v2339_v62 = vsel %vm632_vm5, %v2338_v11, %v2337_v58  ;;  %v2343_v35 = vrot.slane %v2324_v36, 7  ;;  %v2476_v14 = vsub.f32 1.0, %v6321_v16 }
 0xee2   : > { %v2341_v21 = vsel %vm635_vm6, %v2340_v43, %v2339_v62  ;;  %v2345_v44 = vrot.slane %v2325_v50, 6 }
 0xee3   : > { %v2342_v0 = vsel %vm638_vm7, %v2323_v63, %v2341_v21  ;;  %v2347_v55 = vrot.slane %v2326_v1, 5 }
 0xee4   : > { %v2344_v60 = vsel %vm641_vm8, %v2343_v35, %v2342_v0 }
 0xee5   : > { %v2346_v33 = vsel %vm644_vm9, %v2345_v44, %v2344_v60 }
 0xee6   : > { %v2348_v20 = vsel %vm647_vm10, %v2347_v55, %v2346_v33 }
 0xee7   : > { %4357 = vmatmul.mubr.msk.f32.vlgmr.msra.gmra.mrb[12].mxu1 %vm451_vm3, %v2348_v20 }
 0xee8   : > { %4497 = vmatpush3.bf16.msra.mxu1 %v5525_v27  ;;  %4378 = vmatprep.mubr.msk.f32.mxu1 %vm5246_vm1, %v5245_v9 }
 0xee9   : > { %4498 = vmatprep.subr.bf16.mxu1 %v5244_v4 }
 0xeec   : > { %4500 = vmatpush3.bf16.msra.mxu1 %v5528_v29 }
 0xeed   : > { %4507 = vmatprep.subr.bf16.mxu1 %v5244_v4 }
 0xfba   : > { %v2417_v19 = vpop.f32.mrb[12].mxu1 }
 0xfbb   : > { %2437 = vrot.lane.b32.xlu1 %v2417_v19, %s5247_s8  ;;  %v4358_v26 = vpop.f32.mrb[13].mxu1  ;;  %v2422_v34 = vrot.slane %v2417_v19, 4  ;;  %v2423_v55 = vrot.slane %v2417_v19, 5  ;;  %v2424_v36 = vrot.slane %v2417_v19, 6  ;;  %v2425_v11 = vrot.slane %v2417_v19, 7 }
 0xfbc   : > { %v2426_v39 = vrot.slane %v2417_v19, 1  ;;  %v2428_v50 = vrot.slane %v2417_v19, 3  ;;  %v2427_v58 = vrot.slane %v2417_v19, 2 }
 0xfbd   : > { %2429 = vrot.lane.b32.xlu0 %v2422_v34, %s5247_s8 }
 0xfbf   : > { %2431 = vrot.lane.b32.xlu1 %v2423_v55, %s5247_s8 }
 0xfc1   : > { %2433 = vrot.lane.b32.xlu0 %v2424_v36, %s5247_s8 }
 0xfc3   : > { %2435 = vrot.lane.b32.xlu1 %v2425_v11, %s5247_s8 }
 0xfc5   : > { %2439 = vrot.lane.b32.xlu0 %v2426_v39, %s5247_s8 }
 0xfc7   : > { %2443 = vrot.lane.b32.xlu1 %v2428_v50, %s5247_s8 }
 0xfc9   : > { %2441 = vrot.lane.b32.xlu0 %v2427_v58, %s5247_s8 }
0x102d   : > { %v2438_v43 = vpop.permute.xlu1 %2437 }
0x102e   : > { %v2457_v63 = vadd.f32 %v2438_v43, %v5569_v2 }
0x102f   : > { %v2430_v1 = vpop.permute.xlu0 %2429 }
0x1030   : > { %4839 = vtanh.f32 %v2457_v63  ;;  %v2453_v62 = vadd.f32 %v2430_v1, %v5558_v56 }
0x1031   : > { %v2432_v21 = vpop.permute.xlu1 %2431 }
0x1032   : > { %4841 = vtanh.f32 %v2453_v62  ;;  %v2454_v35 = vadd.f32 %v2432_v21, %v5544_v45  ;;  %v2469_v21 = vsub.f32 1.0, %v6304_v41 }
0x1033   : > { %v2434_v0 = vpop.permute.xlu0 %2433 }
0x1034   : > { %4843 = vtanh.f32 %v2454_v35  ;;  %v2455_v44 = vadd.f32 %v2434_v0, %v5550_v49  ;;  %v2470_v0 = vsub.f32 1.0, %v6306_v48 }
0x1035   : > { %v2436_v60 = vpop.permute.xlu1 %2435 }
0x1036   : > { %4845 = vtanh.f32 %v2455_v44  ;;  %v2456_v33 = vadd.f32 %v2436_v60, %v5560_v57  ;;  %v2485_v60 = vmul.f32 %v2469_v21, %v2288_v12 }
0x1037   : > { %v2440_v20 = vpop.permute.xlu0 %2439 }
0x1038   : > { %4847 = vtanh.f32 %v2456_v33  ;;  %v2458_v19 = vadd.f32 %v2440_v20, %v5576_v13  ;;  %v2471_v20 = vsub.f32 1.0, %v6309_v8 }
0x1039   : > { %v2444_v26 = vpop.permute.xlu1 %2443 }
0x103a   : > { %v4840_v34 = vpop.eup %4839  ;;  %4849 = vtanh.f32 %v2458_v19  ;;  %v2460_v55 = vadd.f32 %v2444_v26, %v5590_v32  ;;  %v2473_v19 = vsub.f32 1.0, %v6302_v3 }
0x103b   : > { %2509 = vrot.lane.b32.xlu1 %v4840_v34, %s5249_s25  ;;  %v2442_v36 = vpop.permute.xlu0 %2441  ;;  %v2472_v34 = vsub.f32 1.0, %v6312_v40 }
0x103c   : > { %v4842_v11 = vpop.eup %4841  ;;  %4851 = vtanh.f32 %v2460_v55  ;;  %v2459_v39 = vadd.f32 %v2442_v36, %v5583_v22  ;;  %v2486_v36 = vmul.f32 %v2470_v0, %v2289_v42 }
0x103d   : > { %2501 = vrot.lane.b32.xlu0 %v4842_v11, %s5249_s25  ;;  %v2488_v61 = vmul.f32 %v2472_v34, %v2291_v5 }
0x103e   : > { %v4844_v50 = vpop.eup %4843  ;;  %4853 = vtanh.f32 %v2459_v39 }
0x103f   : > { %2503 = vrot.lane.b32.xlu1 %v4844_v50, %s5249_s25  ;;  %v2487_v50 = vmul.f32 %v2471_v20, %v2290_v28 }
0x1040   : > { %v4846_v58 = vpop.eup %4845 }
0x1041   : > { %2505 = vrot.lane.b32.xlu0 %v4846_v58, %s5249_s25 }
0x1042   : > { %v4848_v43 = vpop.eup %4847 }
0x1043   : > { %2507 = vrot.lane.b32.xlu1 %v4848_v43, %s5249_s25  ;;  %v2489_v43 = vmul.f32 %v2473_v19, %v6241_v24  ;;  %v2475_v24 = vsub.f32 1.0, %v6318_v47 }
0x1044   : > { %v4850_v63 = vpop.eup %4849 }
0x1045   : > { %2511 = vrot.lane.b32.xlu0 %v4850_v63, %s5249_s25 }
0x1046   : > { %v4852_v1 = vpop.eup %4851 }
0x1047   : > { %2515 = vrot.lane.b32.xlu1 %v4852_v1, %s5249_s25 }
0x1048   : > { %v4854_v62 = vpop.eup %4853 }
0x1049   : > { %2513 = vrot.lane.b32.xlu0 %v4854_v62, %s5249_s25 }
0x10ad   : > { %v2510_v35 = vpop.permute.xlu1 %2509 }
0x10ae   : > { %v2529_v39 = vmul.f32 %v6302_v3, %v2510_v35 }
0x10af   : > { %v2502_v44 = vpop.permute.xlu0 %2501 }
0x10b0   : > { %v2525_v33 = vmul.f32 %v6304_v41, %v2502_v44  ;;  %v6396_v53 = vadd.f32 %v2529_v39, %v2489_v43 }
0x10b1   : > { %v2504_v26 = vpop.permute.xlu1 %2503 }
0x10b2   : > { %v6372_v55 = vadd.f32 %v2525_v33, %v2485_v60  ;;  %v2526_v11 = vmul.f32 %v6306_v48, %v2504_v26  ;;  %v2474_v48 = vsub.f32 1.0, %v6315_v31  ;;  %v2492_v26 = vmul.f32 %v2476_v14, %v2294_v7 }
0x10b3   : > { %v2506_v54 = vpop.permute.xlu0 %2505  ;;  %v2713_v17 = vrot.slane %v6396_v53, 7 }
0x10b4   : > { %v2709_v12 = vrot.slane %v6372_v55, 7  ;;  %v6379_v41 = vadd.f32 %v2526_v11, %v2486_v36  ;;  %v2527_v58 = vmul.f32 %v6309_v8, %v2506_v54  ;;  %v2549_v3 = vrot.slane %v6372_v55, 4 }
0x10b5   : > { %v2508_v42 = vpop.permute.xlu1 %2507 }
0x10b6   : > { %v2550_v63 = vrot.slane %v6379_v41, 3  ;;  %v6390_v1 = vadd.f32 %v2527_v58, %v2487_v50  ;;  %v2528_v62 = vmul.f32 %v6312_v40, %v2508_v42  ;;  %2716 = vrot.lane.b32.xlu1 %v2709_v12, %s5249_s25  ;;  %v2490_v40 = vmul.f32 %v2474_v48, %v2292_v52 }
0x10b7   : > { %v2512_v28 = vpop.permute.xlu0 %2511  ;;  %v2710_v43 = vrot.slane %v6379_v41, 7 }
0x10b8   : > { %v2551_v5 = vsel %vm629_vm4, %v2550_v63, %v2549_v3  ;;  %v2552_v8 = vrot.slane %v6390_v1, 2  ;;  %v2711_v21 = vrot.slane %v6390_v1, 7  ;;  %v6403_v35 = vadd.f32 %v2528_v62, %v2488_v61 }
0x10b9   : > { %v2530_v0 = vmul.f32 %v6315_v31, %v2512_v28  ;;  %v2516_v44 = vpop.permute.xlu1 %2515  ;;  %v7005_v31 = vrot.slane %v6245_v23, 7 }
0x10ba   : > { %v2553_v60 = vsel %vm632_vm5, %v2552_v8, %v2551_v5  ;;  %v2554_v33 = vrot.slane %v6403_v35, 1  ;;  %v2532_v20 = vmul.f32 %v6321_v16, %v2516_v44  ;;  %2720 = vrot.lane.b32.xlu1 %v2711_v21, %s5249_s25  ;;  %v2712_v61 = vrot.slane %v6403_v35, 7 }
0x10bb   : > { %v2538_v19 = vadd.f32 %v2530_v0, %v2490_v40  ;;  %v2514_v34 = vpop.permute.xlu0 %2513  ;;  %v2491_v36 = vmul.f32 %v2475_v24, %v7005_v31 }
0x10bc   : > { %v2555_v52 = vsel %vm635_vm6, %v2554_v33, %v2553_v60  ;;  %v2531_v11 = vmul.f32 %v6318_v47, %v2514_v34  ;;  %v6423_v16 = vadd.f32 %v2532_v20, %v2492_v26 }
0x10bd   : > { %v6421_v39 = vrot.slane %v2538_v19, 7  ;;  %v2556_v54 = vsel %vm638_vm7, %v6396_v53, %v2555_v52 }
0x10be   : > { %v6427_v50 = vadd.f32 %v2531_v11, %v2491_v36  ;;  %2724 = vrot.lane.b32.xlu1 %v2713_v17, %s5249_s25  ;;  %v2561_v7 = vrot.slane %v6423_v16, 5  ;;  %v6983_v48 = vrot.slane %v6423_v16, 7 }
0x10bf   : > { %v2558_v23 = vsel %vm641_vm8, %v6421_v39, %v2556_v54 }
0x10c0   : > { %v2559_v30 = vrot.slane %v6427_v50, 6  ;;  %v2714_v42 = vrot.slane %v6427_v50, 7 }
0x10c2   : > { %2726 = vrot.lane.b32.xlu1 %v6421_v39, %s5249_s25  ;;  %v2560_v47 = vsel %vm644_vm9, %v2559_v30, %v2558_v23 }
0x10c3   : > { %v2562_v58 = vsel %vm647_vm10, %v2561_v7, %v2560_v47 }
0x10c4   : > { %2563 = vrot.lane.b32.xlu0 %v2562_v58, %s5249_s25 }
0x10c8   : > { %2718 = vrot.lane.b32.xlu0 %v2710_v43, %s5249_s25 }
0x10cc   : > { %2722 = vrot.lane.b32.xlu0 %v2712_v61, %s5249_s25 }
0x10d0   : > { %2728 = vrot.lane.b32.xlu0 %v2714_v42, %s5249_s25 }
0x10d4   : > { %2730 = vrot.lane.b32.xlu0 %v6983_v48, %s5249_s25 }
0x1136   : > { %v2564_v3 = vpop.permute.xlu0 %2563 }
0x1137   : > { %4368 = vmatmul.mubr.msk.f32.vlgmr.msra.gmra.mrb[22].mxu0 %vm451_vm3, %v2564_v3 }
0x1138   : > { %4503 = vmatpush3.bf16.msra.mxu0 %v5479_v10  ;;  %4389 = vmatprep.mubr.msk.f32.mxu0 %vm5246_vm1, %v5245_v9 }
0x1139   : > { %4504 = vmatprep.subr.bf16.mxu0 %v5244_v4 }
0x113c   : > { %4506 = vmatpush3.bf16.msra.mxu0 %v5485_v15 }
0x113d   : > { %4513 = vmatprep.subr.bf16.mxu0 %v5244_v4 }
0x120a   : > { %v2633_v63 = vpop.f32.mrb[22].mxu0 }
0x120b   : > { %v2638_v62 = vrot.slane %v2633_v63, 3  ;;  %v2639_v28 = vrot.slane %v2633_v63, 4  ;;  %v2640_v14 = vrot.slane %v2633_v63, 5  ;;  %v2641_v24 = vrot.slane %v2633_v63, 6  ;;  %v4369_v5 = vpop.f32.mrb[23].mxu0 }
0x120c   : > { %v2642_v8 = vrot.slane %v2633_v63, 7  ;;  %v2643_v40 = vrot.slane %v2633_v63, 1  ;;  %v2644_v0 = vrot.slane %v2633_v63, 2  ;;  %v2658_v44 = vadd.f32 %v2633_v63, %v5576_v13  ;;  %v2717_v5 = vpop.permute.xlu1 %2716 }
0x120d   : > { %v2653_v60 = vadd.f32 %v2638_v62, %v5558_v56  ;;  %v2654_v33 = vadd.f32 %v2639_v28, %v5544_v45  ;;  %v2655_v20 = vadd.f32 %v2640_v14, %v5550_v49  ;;  %v2656_v19 = vadd.f32 %v2641_v24, %v5560_v57  ;;  %v2719_v28 = vpop.permute.xlu0 %2718 }
0x120e   : > { %v2657_v26 = vadd.f32 %v2642_v8, %v5569_v2  ;;  %v2659_v34 = vadd.f32 %v2643_v40, %v5583_v22  ;;  %v4132_v52 = vmul.f32 -1.442695, %v2658_v44  ;;  %v2660_v31 = vadd.f32 %v2644_v0, %v5590_v32 }
0x120f   : > { %v4127_v36 = vmul.f32 -1.442695, %v2653_v60  ;;  %v4128_v11 = vmul.f32 -1.442695, %v2654_v33  ;;  %v4129_v54 = vmul.f32 -1.442695, %v2655_v20 }
0x1210   : > { %v4130_v30 = vmul.f32 -1.442695, %v2656_v19  ;;  %4855 = vpow2.f32 %v4132_v52  ;;  %v4131_v23 = vmul.f32 -1.442695, %v2657_v26  ;;  %v4133_v7 = vmul.f32 -1.442695, %v2659_v34 }
0x1211   : > { %4857 = vpow2.f32 %v4127_v36  ;;  %v4134_v47 = vmul.f32 -1.442695, %v2660_v31  ;;  %v2723_v34 = vpop.permute.xlu0 %2722  ;;  %v2721_v31 = vpop.permute.xlu1 %2720 }
0x1212   : > { %4859 = vpow2.f32 %v4128_v11 }
0x1213   : > { %4861 = vpow2.f32 %v4129_v54 }
0x1214   : > { %4863 = vpow2.f32 %v4130_v30 }
0x1215   : > { %4865 = vpow2.f32 %v4131_v23  ;;  %v2729_v54 = vpop.permute.xlu0 %2728  ;;  %v2725_v23 = vpop.permute.xlu1 %2724 }
0x1216   : > { %4867 = vpow2.f32 %v4133_v7 }
0x1217   : > { %4869 = vpow2.f32 %v4134_v47 }
0x121a   : > { %v4856_v58 = vpop.eup %4855 }
0x121b   : > { %v4858_v3 = vpop.eup %4857  ;;  %v2690_v63 = vadd.f32 1.0, %v4856_v58 }
0x121c   : > { %v4860_v62 = vpop.eup %4859  ;;  %v2685_v14 = vadd.f32 1.0, %v4858_v3 }
0x121d   : > { %v4862_v24 = vpop.eup %4861  ;;  %v2686_v8 = vadd.f32 1.0, %v4860_v62  ;;  %4871 = vrcp.f32 %v2690_v63 }
0x121e   : > { %v4864_v40 = vpop.eup %4863  ;;  %v2687_v0 = vadd.f32 1.0, %v4862_v24  ;;  %4873 = vrcp.f32 %v2685_v14 }
0x121f   : > { %v4866_v44 = vpop.eup %4865  ;;  %v2688_v60 = vadd.f32 1.0, %v4864_v40  ;;  %4875 = vrcp.f32 %v2686_v8 }
0x1220   : > { %v4868_v33 = vpop.eup %4867  ;;  %v2689_v20 = vadd.f32 1.0, %v4866_v44  ;;  %4877 = vrcp.f32 %v2687_v0 }
0x1221   : > { %v4870_v19 = vpop.eup %4869  ;;  %v2691_v26 = vadd.f32 1.0, %v4868_v33  ;;  %4879 = vrcp.f32 %v2688_v60  ;;  %v2731_v60 = vpop.permute.xlu0 %2730 }
0x1222   : > { %v2692_v52 = vadd.f32 1.0, %v4870_v19  ;;  %4881 = vrcp.f32 %v2689_v20  ;;  %v2727_v19 = vpop.permute.xlu1 %2726 }
0x1223   : > { %4883 = vrcp.f32 %v2691_v26 }
0x1224   : > { %4885 = vrcp.f32 %v2692_v52 }
0x1227   : > { %v6472_v36 = vpop.eup %4871 }
0x1228   : > { %v6474_v11 = vpop.eup %4873 }
0x1229   : > { %v6476_v30 = vpop.eup %4875  ;;  %v2740_v7 = vmul.f32 %v6474_v11, %v2717_v5 }
0x122a   : > { %v6479_v47 = vpop.eup %4877  ;;  %v2741_v58 = vmul.f32 %v6476_v30, %v2719_v28 }
0x122b   : > { %v6482_v3 = vpop.eup %4879  ;;  %v2742_v63 = vmul.f32 %v6479_v47, %v2721_v31  ;;  %v2756_v62 = vrot.slane %v2740_v7, 5  ;;  %v2745_v31 = vmul.f32 %v6472_v36, %v2727_v19 }
0x122c   : > { %v6485_v14 = vpop.eup %4881  ;;  %v2743_v24 = vmul.f32 %v6482_v3, %v2723_v34  ;;  %v2757_v8 = vrot.slane %v2741_v58, 4 }
0x122d   : > { %v6488_v40 = vpop.eup %4883  ;;  %v2744_v0 = vmul.f32 %v6485_v14, %v2725_v23  ;;  %v2759_v44 = vrot.slane %v2742_v63, 3 }
0x122e   : > { %v6491_v5 = vpop.eup %4885  ;;  %v2746_v28 = vmul.f32 %v6488_v40, %v2729_v54  ;;  %v2758_v33 = vsel %vm629_vm4, %v2757_v8, %v2756_v62  ;;  %v2761_v20 = vrot.slane %v2743_v24, 2  ;;  %v2896_v35 = vsub.f32 1.0, %v6488_v40 }
0x122f   : > { %v2747_v26 = vmul.f32 %v6491_v5, %v2731_v60  ;;  %v2760_v52 = vsel %vm632_vm5, %v2759_v44, %v2758_v33  ;;  %v2763_v34 = vrot.slane %v2744_v0, 1 }
0x1230   : > { %v2762_v7 = vsel %vm635_vm6, %v2761_v20, %v2760_v52  ;;  %v2766_v58 = vrot.slane %v2746_v28, 7 }
0x1231   : > { %v2764_v23 = vsel %vm638_vm7, %v2763_v34, %v2762_v7  ;;  %v2768_v48 = vrot.slane %v2747_v26, 6 }
0x1232   : > { %v2765_v63 = vsel %vm641_vm8, %v2745_v31, %v2764_v23 }
0x1233   : > { %v2767_v54 = vsel %vm644_vm9, %v2766_v58, %v2765_v63 }
0x1234   : > { %v2769_v62 = vsel %vm647_vm10, %v2768_v48, %v2767_v54 }
0x1235   : > { %4379 = vmatmul.mubr.msk.f32.vlgmr.msra.gmra.mrb[14].mxu1 %vm451_vm3, %v2769_v62 }
0x1236   : > { %4509 = vmatpush3.bf16.msra.mxu1 %v5525_v27  ;;  %4400 = vmatprep.mubr.msk.f32.mxu1 %vm5246_vm1, %v5245_v9 }
0x1237   : > { %4510 = vmatprep.subr.bf16.mxu1 %v5244_v4 }
0x123a   : > { %4512 = vmatpush3.bf16.msra.mxu1 %v5528_v29 }
0x123b   : > { %4519 = vmatprep.subr.bf16.mxu1 %v5244_v4 }
0x1308   : > { %v2838_v24 = vpop.f32.mrb[14].mxu1 }
0x1309   : > { %v4380_v8 = vpop.f32.mrb[15].mxu1  ;;  %v2844_v0 = vrot.slane %v2838_v24, 4  ;;  %v2843_v44 = vrot.slane %v2838_v24, 3  ;;  %v2846_v48 = vrot.slane %v2838_v24, 6  ;;  %v2845_v60 = vrot.slane %v2838_v24, 5 }
0x130a   : > { %v2848_v28 = vrot.slane %v2838_v24, 1  ;;  %v2847_v33 = vrot.slane %v2838_v24, 7  ;;  %v2849_v20 = vrot.slane %v2838_v24, 2 }
0x130b   : > { %2852 = vrot.lane.b32.xlu0 %v2844_v0, %s5247_s8  ;;  %2850 = vrot.lane.b32.xlu1 %v2843_v44, %s5247_s8 }
0x130f   : > { %2856 = vrot.lane.b32.xlu0 %v2846_v48, %s5247_s8  ;;  %2854 = vrot.lane.b32.xlu1 %v2845_v60, %s5247_s8 }
0x1313   : > { %2862 = vrot.lane.b32.xlu0 %v2848_v28, %s5247_s8  ;;  %2858 = vrot.lane.b32.xlu1 %v2847_v33, %s5247_s8 }
0x1317   : > { %2864 = vrot.lane.b32.xlu0 %v2849_v20, %s5247_s8  ;;  %2860 = vrot.lane.b32.xlu1 %v2838_v24, %s5247_s8 }
0x137d   : > { %v2853_v19 = vpop.permute.xlu0 %2852  ;;  %v2851_v26 = vpop.permute.xlu1 %2850 }
0x137e   : > { %v2875_v52 = vadd.f32 %v2853_v19, %v5544_v45  ;;  %v2874_v34 = vadd.f32 %v2851_v26, %v5558_v56 }
0x1380   : > { %4887 = vtanh.f32 %v2875_v52 }
0x1381   : > { %4889 = vtanh.f32 %v2874_v34  ;;  %v2857_v31 = vpop.permute.xlu0 %2856  ;;  %v2855_v7 = vpop.permute.xlu1 %2854 }
0x1382   : > { %v2877_v23 = vadd.f32 %v2857_v31, %v5560_v57  ;;  %v2876_v58 = vadd.f32 %v2855_v7, %v5550_v49  ;;  %v2891_v31 = vsub.f32 1.0, %v6476_v30  ;;  %v2890_v7 = vsub.f32 1.0, %v6474_v11 }
0x1384   : > { %4891 = vtanh.f32 %v2877_v23 }
0x1385   : > { %4893 = vtanh.f32 %v2876_v58  ;;  %v2863_v63 = vpop.permute.xlu0 %2862  ;;  %v2859_v54 = vpop.permute.xlu1 %2858  ;;  %v2907_v58 = vmul.f32 %v2891_v31, %v2710_v43 }
0x1386   : > { %v2880_v62 = vadd.f32 %v2863_v63, %v5583_v22  ;;  %v2878_v24 = vadd.f32 %v2859_v54, %v5569_v2 }
0x1388   : > { %4895 = vtanh.f32 %v2880_v62  ;;  %v2893_v62 = vsub.f32 1.0, %v6482_v3 }
0x1389   : > { %4897 = vtanh.f32 %v2878_v24  ;;  %v2865_v8 = vpop.permute.xlu0 %2864  ;;  %v2861_v0 = vpop.permute.xlu1 %2860  ;;  %v2906_v24 = vmul.f32 %v2890_v7, %v2709_v12 }
0x138a   : > { %v4888_v44 = vpop.eup %4887  ;;  %v2881_v48 = vadd.f32 %v2865_v8, %v5590_v32  ;;  %v2879_v60 = vadd.f32 %v2861_v0, %v5576_v13  ;;  %v2892_v0 = vsub.f32 1.0, %v6479_v47  ;;  %v2909_v41 = vmul.f32 %v2893_v62, %v2712_v61 }
0x138b   : > { %v4890_v28 = vpop.eup %4889  ;;  %2924 = vrot.lane.b32.xlu0 %v4888_v44, %s5249_s25 }
0x138c   : > { %4899 = vtanh.f32 %v2881_v48  ;;  %2922 = vrot.lane.b32.xlu1 %v4890_v28, %s5249_s25  ;;  %v2908_v55 = vmul.f32 %v2892_v0, %v2711_v21 }
0x138d   : > { %4901 = vtanh.f32 %v2879_v60 }
0x138e   : > { %v4892_v33 = vpop.eup %4891 }
0x138f   : > { %v4894_v20 = vpop.eup %4893  ;;  %2928 = vrot.lane.b32.xlu0 %v4892_v33, %s5249_s25 }
0x1390   : > { %2926 = vrot.lane.b32.xlu1 %v4894_v20, %s5249_s25 }
0x1392   : > { %v4896_v19 = vpop.eup %4895 }
0x1393   : > { %v4898_v26 = vpop.eup %4897  ;;  %2934 = vrot.lane.b32.xlu0 %v4896_v19, %s5249_s25 }
0x1394   : > { %2930 = vrot.lane.b32.xlu1 %v4898_v26, %s5249_s25  ;;  %v2895_v26 = vsub.f32 1.0, %v6472_v36 }
0x1396   : > { %v4900_v52 = vpop.eup %4899 }
0x1397   : > { %v4902_v34 = vpop.eup %4901  ;;  %2936 = vrot.lane.b32.xlu0 %v4900_v52, %s5249_s25 }
0x1398   : > { %2932 = vrot.lane.b32.xlu1 %v4902_v34, %s5249_s25 }
0x13fd   : > { %v2925_v23 = vpop.permute.xlu0 %2924 }
0x13fe   : > { %v2947_v63 = vmul.f32 %v6476_v30, %v2925_v23  ;;  %v2923_v54 = vpop.permute.xlu1 %2922 }
0x13ff   : > { %v2946_v8 = vmul.f32 %v6474_v11, %v2923_v54  ;;  %v2894_v11 = vsub.f32 1.0, %v6485_v14 }
0x1400   : > { %v6544_v44 = vadd.f32 %v2947_v63, %v2907_v58 }
0x1401   : > { %v6546_v48 = vadd.f32 %v2946_v8, %v2906_v24  ;;  %v2929_v60 = vpop.permute.xlu0 %2928  ;;  %v2910_v31 = vmul.f32 %v2894_v11, %v2713_v17  ;;  %v7006_v17 = vrot.slane %v6423_v16, 7 }
0x1402   : > { %v2949_v43 = vmul.f32 %v6482_v3, %v2929_v60  ;;  %v2927_v30 = vpop.permute.xlu1 %2926  ;;  %v2971_v33 = vrot.slane %v6544_v44, 4  ;;  %v2897_v3 = vsub.f32 1.0, %v6491_v5 }
0x1403   : > { %v3130_v28 = vrot.slane %v6546_v48, 7  ;;  %v2948_v12 = vmul.f32 %v6479_v47, %v2927_v30  ;;  %v2970_v20 = vrot.slane %v6546_v48, 5 }
0x1404   : > { %v6558_v19 = vadd.f32 %v2949_v43, %v2909_v41 }
0x1405   : > { %v6561_v61 = vadd.f32 %v2948_v12, %v2908_v55  ;;  %3137 = vrot.lane.b32.xlu0 %v3130_v28, %s5249_s25  ;;  %v2935_v1 = vpop.permute.xlu0 %2934  ;;  %v2972_v23 = vsel %vm629_vm4, %v2971_v33, %v2970_v20  ;;  %v3131_v33 = vrot.slane %v6544_v44, 7 }
0x1406   : > { %v2952_v21 = vmul.f32 %v6488_v40, %v2935_v1  ;;  %v2931_v47 = vpop.permute.xlu1 %2930  ;;  %v2975_v58 = vrot.slane %v6558_v19, 2  ;;  %v2912_v40 = vmul.f32 %v2896_v35, %v2714_v42  ;;  %v2911_v42 = vmul.f32 %v2895_v26, %v6421_v39 }
0x1407   : > { %v2973_v52 = vrot.slane %v6561_v61, 3  ;;  %v3132_v34 = vrot.slane %v6561_v61, 7  ;;  %v2950_v7 = vmul.f32 %v6485_v14, %v2931_v47  ;;  %v2913_v14 = vmul.f32 %v2897_v3, %v7006_v17 }
0x1408   : > { %v2960_v53 = vadd.f32 %v2952_v21, %v2912_v40  ;;  %v3133_v20 = vrot.slane %v6558_v19, 7 }
0x1409   : > { %v2974_v63 = vsel %vm632_vm5, %v2973_v52, %v2972_v23  ;;  %v6579_v54 = vadd.f32 %v2950_v7, %v2910_v31  ;;  %3141 = vrot.lane.b32.xlu0 %v3132_v34, %s5249_s25  ;;  %v2937_v62 = vpop.permute.xlu0 %2936 }
0x140a   : > { %v2953_v24 = vmul.f32 %v6491_v5, %v2937_v62  ;;  %v2933_v8 = vpop.permute.xlu1 %2932  ;;  %v2976_v41 = vsel %vm635_vm6, %v2975_v58, %v2974_v63  ;;  %v6600_v16 = vrot.slane %v2960_v53, 7 }
0x140b   : > { %v2977_v0 = vrot.slane %v6579_v54, 1  ;;  %v3134_v50 = vrot.slane %v6579_v54, 7  ;;  %v2951_v60 = vmul.f32 %v6472_v36, %v2933_v8 }
0x140c   : > { %v6592_v43 = vadd.f32 %v2953_v24, %v2913_v14 }
0x140d   : > { %v2978_v30 = vsel %vm638_vm7, %v2977_v0, %v2976_v41  ;;  %v6595_v55 = vadd.f32 %v2951_v60, %v2911_v42  ;;  %3145 = vrot.lane.b32.xlu0 %v3134_v50, %s5249_s25 }
0x140e   : > { %v2982_v5 = vrot.slane %v6592_v43, 6  ;;  %v3136_v39 = vrot.slane %v6592_v43, 7 }
0x140f   : > { %v2979_v36 = vsel %vm641_vm8, %v6595_v55, %v2978_v30  ;;  %v3135_v35 = vrot.slane %v6595_v55, 7 }
0x1410   : > { %v2981_v12 = vsel %vm644_vm9, %v6600_v16, %v2979_v36 }
0x1411   : > { %3151 = vrot.lane.b32.xlu0 %v3136_v39, %s5249_s25  ;;  %v2983_v11 = vsel %vm647_vm10, %v2982_v5, %v2981_v12 }
0x1412   : > { %2984 = vrot.lane.b32.xlu1 %v2983_v11, %s5249_s25 }
0x1416   : > { %3139 = vrot.lane.b32.xlu1 %v3131_v33, %s5249_s25 }
0x141a   : > { %3143 = vrot.lane.b32.xlu1 %v3133_v20, %s5249_s25 }
0x141e   : > { %3147 = vrot.lane.b32.xlu1 %v3135_v35, %s5249_s25 }
0x1422   : > { %3149 = vrot.lane.b32.xlu1 %v6600_v16, %s5249_s25 }
0x1484   : > { %v2985_v1 = vpop.permute.xlu1 %2984 }
0x1485   : > { %4390 = vmatmul.mubr.msk.f32.vlgmr.msra.gmra.mrb[24].mxu0 %vm451_vm3, %v2985_v1 }
0x1486   : > { %4515 = vmatpush3.bf16.msra.mxu0 %v5479_v10  ;;  %4411 = vmatprep.mubr.msk.f32.mxu0 %vm5246_vm1, %v5245_v9 }
0x1487   : > { %4516 = vmatprep.subr.bf16.mxu0 %v5244_v4 }
0x148a   : > { %4518 = vmatpush3.bf16.msra.mxu0 %v5485_v15 }
0x1558   : > { %v3054_v21 = vpop.f32.mrb[24].mxu0 }
0x1559   : > { %v3059_v47 = vrot.slane %v3054_v21, 2  ;;  %v3060_v3 = vrot.slane %v3054_v21, 3  ;;  %v3061_v26 = vrot.slane %v3054_v21, 4  ;;  %v3062_v52 = vrot.slane %v3054_v21, 5  ;;  %v4391_v31 = vpop.f32.mrb[25].mxu0 }
0x155a   : > { %v3063_v7 = vrot.slane %v3054_v21, 6  ;;  %v3064_v23 = vrot.slane %v3054_v21, 7  ;;  %v3065_v58 = vrot.slane %v3054_v21, 1  ;;  %v3080_v40 = vadd.f32 %v3054_v21, %v5583_v22  ;;  %v3138_v21 = vpop.permute.xlu0 %3137  ;;  %v3140_v31 = vpop.permute.xlu1 %3139 }
0x155b   : > { %v3074_v10 = vadd.f32 %v3059_v47, %v5558_v56  ;;  %v3075_v63 = vadd.f32 %v3060_v3, %v5544_v45  ;;  %v3076_v62 = vadd.f32 %v3061_v26, %v5550_v49  ;;  %v3077_v53 = vadd.f32 %v3062_v52, %v5560_v57 }
0x155c   : > { %v3078_v15 = vadd.f32 %v3063_v7, %v5569_v2  ;;  %v3079_v17 = vadd.f32 %v3064_v23, %v5576_v13  ;;  %v4143_v14 = vmul.f32 -1.442695, %v3080_v40  ;;  %v3081_v24 = vadd.f32 %v3065_v58, %v5590_v32 }
0x155d   : > { %v4137_v8 = vmul.f32 -1.442695, %v3074_v10  ;;  %v4138_v0 = vmul.f32 -1.442695, %v3075_v63  ;;  %v4139_v42 = vmul.f32 -1.442695, %v3076_v62 }
0x155e   : > { %v4140_v60 = vmul.f32 -1.442695, %v3077_v53  ;;  %4903 = vpow2.f32 %v4143_v14  ;;  %v4141_v41 = vmul.f32 -1.442695, %v3078_v15  ;;  %v4142_v30 = vmul.f32 -1.442695, %v3079_v17  ;;  %v3142_v53 = vpop.permute.xlu0 %3141  ;;  %v3144_v17 = vpop.permute.xlu1 %3143 }
0x155f   : > { %4905 = vpow2.f32 %v4137_v8  ;;  %v4144_v5 = vmul.f32 -1.442695, %v3081_v24 }
0x1560   : > { %4907 = vpow2.f32 %v4138_v0 }
0x1561   : > { %4909 = vpow2.f32 %v4139_v42 }
0x1562   : > { %4911 = vpow2.f32 %v4140_v60  ;;  %v3146_v8 = vpop.permute.xlu0 %3145 }
0x1563   : > { %4913 = vpow2.f32 %v4141_v41  ;;  %v3148_v41 = vpop.permute.xlu1 %3147 }
0x1564   : > { %4915 = vpow2.f32 %v4142_v30 }
0x1565   : > { %4917 = vpow2.f32 %v4144_v5 }
0x1568   : > { %v4904_v36 = vpop.eup %4903 }
0x1569   : > { %v4906_v12 = vpop.eup %4905  ;;  %v3112_v11 = vadd.f32 1.0, %v4904_v36 }
0x156a   : > { %v4908_v1 = vpop.eup %4907  ;;  %v3106_v47 = vadd.f32 1.0, %v4906_v12 }
0x156b   : > { %v4910_v3 = vpop.eup %4909  ;;  %v3107_v26 = vadd.f32 1.0, %v4908_v1  ;;  %4919 = vrcp.f32 %v3112_v11 }
0x156c   : > { %v4912_v52 = vpop.eup %4911  ;;  %v3108_v7 = vadd.f32 1.0, %v4910_v3  ;;  %4921 = vrcp.f32 %v3106_v47 }
0x156d   : > { %v4914_v23 = vpop.eup %4913  ;;  %v3109_v58 = vadd.f32 1.0, %v4912_v52  ;;  %4923 = vrcp.f32 %v3107_v26 }
0x156e   : > { %v4916_v40 = vpop.eup %4915  ;;  %v3110_v10 = vadd.f32 1.0, %v4914_v23  ;;  %4925 = vrcp.f32 %v3108_v7  ;;  %v3152_v7 = vpop.permute.xlu0 %3151 }
0x156f   : > { %v4918_v63 = vpop.eup %4917  ;;  %v3111_v62 = vadd.f32 1.0, %v4916_v40  ;;  %4927 = vrcp.f32 %v3109_v58 }
0x1570   : > { %v3113_v15 = vadd.f32 1.0, %v4918_v63  ;;  %4929 = vrcp.f32 %v3110_v10 }
0x1571   : > { %4931 = vrcp.f32 %v3111_v62  ;;  %v3150_v62 = vpop.permute.xlu1 %3149 }
0x1572   : > { %4933 = vrcp.f32 %v3113_v15 }
0x1575   : > { %v6641_v14 = vpop.eup %4919 }
0x1576   : > { %v6643_v24 = vpop.eup %4921 }
0x1577   : > { %v6645_v0 = vpop.eup %4923  ;;  %v3161_v42 = vmul.f32 %v6643_v24, %v3138_v21 }
0x1578   : > { %v6648_v60 = vpop.eup %4925  ;;  %v3162_v30 = vmul.f32 %v6645_v0, %v3140_v31 }
0x1579   : > { %v6651_v5 = vpop.eup %4927  ;;  %v3163_v36 = vmul.f32 %v6648_v60, %v3142_v53  ;;  %v3177_v12 = vrot.slane %v3161_v42, 6 }
0x157a   : > { %v6654_v11 = vpop.eup %4929  ;;  %v3164_v1 = vmul.f32 %v6651_v5, %v3144_v17  ;;  %v3178_v47 = vrot.slane %v3162_v30, 5  ;;  %v3167_v17 = vmul.f32 %v6641_v14, %v3150_v62 }
0x157b   : > { %v6657_v3 = vpop.eup %4931  ;;  %v3165_v26 = vmul.f32 %v6654_v11, %v3146_v8  ;;  %v3180_v21 = vrot.slane %v3163_v36, 4  ;;  %v3315_v48 = vsub.f32 1.0, %v6654_v11 }
0x157c   : > { %v6660_v52 = vpop.eup %4933  ;;  %v3166_v31 = vmul.f32 %v6657_v3, %v3148_v41  ;;  %v3179_v23 = vsel %vm629_vm4, %v3178_v47, %v3177_v12  ;;  %v3182_v58 = vrot.slane %v3164_v1, 3 }
0x157d   : > { %v3168_v40 = vmul.f32 %v6660_v52, %v3152_v7  ;;  %v3181_v10 = vsel %vm632_vm5, %v3180_v21, %v3179_v23  ;;  %v3184_v63 = vrot.slane %v3165_v26, 2 }
0x157e   : > { %v3183_v53 = vsel %vm635_vm6, %v3182_v58, %v3181_v10  ;;  %v3186_v15 = vrot.slane %v3166_v31, 1 }
0x157f   : > { %v3185_v8 = vsel %vm638_vm7, %v3184_v63, %v3183_v53  ;;  %v3189_v30 = vrot.slane %v3168_v40, 7 }
0x1580   : > { %v3187_v42 = vsel %vm641_vm8, %v3186_v15, %v3185_v8 }
0x1581   : > { %v3188_v41 = vsel %vm644_vm9, %v3167_v17, %v3187_v42 }
0x1582   : > { %v3190_v36 = vsel %vm647_vm10, %v3189_v30, %v3188_v41 }
0x1583   : > { %4401 = vmatmul.mubr.msk.f32.vlgmr.msra.gmra.mrb[16].mxu1 %vm451_vm3, %v3190_v36 }
0x1584   : > { %4521 = vmatpush3.bf16.msra.mxu1 %v5525_v27  ;;  %4422 = vmatprep.mubr.msk.f32.mxu1 %vm5246_vm1, %v5245_v9 }
0x1585   : > { %4522 = vmatprep.subr.bf16.mxu1 %v5244_v4 }
0x1588   : > { %4524 = vmatpush3.bf16.msra.mxu1 %v5528_v29 }
0x1656   : > { %v3259_v12 = vpop.f32.mrb[16].mxu1 }
0x1657   : > { %v4402_v1 = vpop.f32.mrb[17].mxu1  ;;  %v3265_v47 = vrot.slane %v3259_v12, 3  ;;  %v3264_v26 = vrot.slane %v3259_v12, 2  ;;  %v3267_v21 = vrot.slane %v3259_v12, 5  ;;  %v3266_v7 = vrot.slane %v3259_v12, 4 }
0x1658   : > { %v3269_v27 = vrot.slane %v3259_v12, 7  ;;  %v3268_v9 = vrot.slane %v3259_v12, 6  ;;  %v3270_v4 = vrot.slane %v3259_v12, 1 }
0x1659   : > { %3273 = vrot.lane.b32.xlu1 %v3265_v47, %s5247_s8  ;;  %3271 = vrot.lane.b32.xlu0 %v3264_v26, %s5247_s8 }
0x165d   : > { %3277 = vrot.lane.b32.xlu1 %v3267_v21, %s5247_s8  ;;  %3275 = vrot.lane.b32.xlu0 %v3266_v7, %s5247_s8 }
0x1661   : > { %3281 = vrot.lane.b32.xlu1 %v3269_v27, %s5247_s8  ;;  %3279 = vrot.lane.b32.xlu0 %v3268_v9, %s5247_s8 }
0x1665   : > { %3283 = vrot.lane.b32.xlu1 %v3259_v12, %s5247_s8  ;;  %3285 = vrot.lane.b32.xlu0 %v3270_v4, %s5247_s8  ;;  %v3312_v4 = vsub.f32 1.0, %v6645_v0 }
0x16cb   : > { %v3274_v29 = vpop.permute.xlu1 %3273  ;;  %v3272_v31 = vpop.permute.xlu0 %3271 }
0x16cc   : > { %v3296_v23 = vadd.f32 %v3274_v29, %v5544_v45  ;;  %v3295_v58 = vadd.f32 %v3272_v31, %v5558_v56  ;;  %v3311_v29 = vsub.f32 1.0, %v6643_v24 }
0x16ce   : > { %4935 = vtanh.f32 %v3296_v23  ;;  %v3328_v23 = vmul.f32 %v3312_v4, %v3131_v33 }
0x16cf   : > { %4937 = vtanh.f32 %v3295_v58  ;;  %v3278_v40 = vpop.permute.xlu1 %3277  ;;  %v3276_v10 = vpop.permute.xlu0 %3275 }
0x16d0   : > { %v3298_v63 = vadd.f32 %v3278_v40, %v5560_v57  ;;  %v3297_v62 = vadd.f32 %v3276_v10, %v5550_v49  ;;  %v3314_v10 = vsub.f32 1.0, %v6651_v5 }
0x16d2   : > { %4939 = vtanh.f32 %v3298_v63  ;;  %v3327_v63 = vmul.f32 %v3311_v29, %v3130_v28  ;;  %v3330_v44 = vmul.f32 %v3314_v10, %v3133_v20 }
0x16d3   : > { %4941 = vtanh.f32 %v3297_v62  ;;  %v3282_v53 = vpop.permute.xlu1 %3281  ;;  %v3280_v15 = vpop.permute.xlu0 %3279 }
0x16d4   : > { %v3300_v17 = vadd.f32 %v3282_v53, %v5576_v13  ;;  %v3299_v8 = vadd.f32 %v3280_v15, %v5569_v2  ;;  %v3313_v53 = vsub.f32 1.0, %v6648_v60 }
0x16d6   : > { %4943 = vtanh.f32 %v3300_v17 }
0x16d7   : > { %4945 = vtanh.f32 %v3299_v8  ;;  %v3284_v42 = vpop.permute.xlu1 %3283  ;;  %v3286_v30 = vpop.permute.xlu0 %3285 }
0x16d8   : > { %v4936_v41 = vpop.eup %4935  ;;  %v3301_v36 = vadd.f32 %v3284_v42, %v5583_v22  ;;  %v3302_v12 = vadd.f32 %v3286_v30, %v5590_v32  ;;  %v3316_v42 = vsub.f32 1.0, %v6657_v3 }
0x16d9   : > { %v4938_v1 = vpop.eup %4937  ;;  %3345 = vrot.lane.b32.xlu1 %v4936_v41, %s5249_s25 }
0x16da   : > { %4947 = vtanh.f32 %v3301_v36  ;;  %3343 = vrot.lane.b32.xlu0 %v4938_v1, %s5249_s25  ;;  %v3317_v1 = vsub.f32 1.0, %v6641_v14 }
0x16db   : > { %4949 = vtanh.f32 %v3302_v12  ;;  %v3332_v12 = vmul.f32 %v3316_v42, %v3135_v35 }
0x16dc   : > { %v4940_v47 = vpop.eup %4939 }
0x16dd   : > { %v4942_v26 = vpop.eup %4941  ;;  %3349 = vrot.lane.b32.xlu1 %v4940_v47, %s5249_s25 }
0x16de   : > { %3347 = vrot.lane.b32.xlu0 %v4942_v26, %s5249_s25 }
0x16e0   : > { %v4944_v21 = vpop.eup %4943 }
0x16e1   : > { %v4946_v7 = vpop.eup %4945  ;;  %3353 = vrot.lane.b32.xlu1 %v4944_v21, %s5249_s25 }
0x16e2   : > { %3351 = vrot.lane.b32.xlu0 %v4946_v7, %s5249_s25  ;;  %v3318_v7 = vsub.f32 1.0, %v6660_v52 }
0x16e4   : > { %v4948_v27 = vpop.eup %4947 }
0x16e5   : > { %v4950_v9 = vpop.eup %4949  ;;  %3355 = vrot.lane.b32.xlu1 %v4948_v27, %s5249_s25 }
0x16e6   : > { %3357 = vrot.lane.b32.xlu0 %v4950_v9, %s5249_s25 }
0x174b   : > { %v3346_v31 = vpop.permute.xlu1 %3345 }
0x174c   : > { %v3368_v58 = vmul.f32 %v6645_v0, %v3346_v31  ;;  %v3344_v40 = vpop.permute.xlu0 %3343 }
0x174d   : > { %v3367_v62 = vmul.f32 %v6643_v24, %v3344_v40  ;;  %v3329_v24 = vmul.f32 %v3313_v53, %v3132_v34  ;;  %v3331_v34 = vmul.f32 %v3315_v48, %v3134_v50 }
0x174e   : > { %v6712_v15 = vadd.f32 %v3368_v58, %v3328_v23  ;;  %v3334_v58 = vmul.f32 %v3318_v7, %v3136_v39 }
0x174f   : > { %v6714_v17 = vadd.f32 %v3367_v62, %v3327_v63  ;;  %v3350_v8 = vpop.permute.xlu1 %3349 }
0x1750   : > { %v3370_v33 = vmul.f32 %v6651_v5, %v3350_v8  ;;  %v3348_v0 = vpop.permute.xlu0 %3347  ;;  %v3392_v41 = vrot.slane %v6712_v15, 5 }
0x1751   : > { %v3551_v28 = vrot.slane %v6714_v17, 7  ;;  %v3369_v30 = vmul.f32 %v6648_v60, %v3348_v0  ;;  %v3391_v36 = vrot.slane %v6714_v17, 6 }
0x1752   : > { %v6727_v19 = vadd.f32 %v3370_v33, %v3330_v44 }
0x1753   : > { %v6729_v20 = vadd.f32 %v3369_v30, %v3329_v24  ;;  %3558 = vrot.lane.b32.xlu1 %v3551_v28, %s5249_s25  ;;  %v3354_v5 = vpop.permute.xlu1 %3353  ;;  %v3393_v27 = vsel %vm629_vm4, %v3392_v41, %v3391_v36 }
0x1754   : > { %v3372_v61 = vmul.f32 %v6657_v3, %v3354_v5  ;;  %v3352_v60 = vpop.permute.xlu0 %3351  ;;  %v3396_v55 = vrot.slane %v6727_v19, 3  ;;  %v3554_v44 = vrot.slane %v6727_v19, 7 }
0x1755   : > { %v3394_v47 = vrot.slane %v6729_v20, 4  ;;  %v3553_v26 = vrot.slane %v6729_v20, 7  ;;  %v3371_v21 = vmul.f32 %v6654_v11, %v3352_v60  ;;  %v3333_v11 = vmul.f32 %v3317_v1, %v6600_v16 }
0x1756   : > { %v6746_v35 = vadd.f32 %v3372_v61, %v3332_v12 }
0x1757   : > { %v3395_v54 = vsel %vm632_vm5, %v3394_v47, %v3393_v27  ;;  %v6749_v50 = vadd.f32 %v3371_v21, %v3331_v34  ;;  %3562 = vrot.lane.b32.xlu1 %v3553_v26, %s5249_s25  ;;  %v3356_v3 = vpop.permute.xlu1 %3355 }
0x1758   : > { %v3400_v9 = vrot.slane %v6746_v35, 1  ;;  %v3373_v4 = vmul.f32 %v6641_v14, %v3356_v3  ;;  %v3358_v29 = vpop.permute.xlu0 %3357  ;;  %v3397_v10 = vsel %vm635_vm6, %v3396_v55, %v3395_v54  ;;  %v3556_v33 = vrot.slane %v6746_v35, 7 }
0x1759   : > { %v3398_v31 = vrot.slane %v6749_v50, 2  ;;  %v3555_v23 = vrot.slane %v6749_v50, 7  ;;  %v3374_v40 = vmul.f32 %v6660_v52, %v3358_v29  ;;  %v3552_v52 = vrot.slane %v6712_v15, 7 }
0x175a   : > { %v6763_v63 = vadd.f32 %v3373_v4, %v3333_v11 }
0x175b   : > { %v3399_v62 = vsel %vm638_vm7, %v3398_v31, %v3397_v10  ;;  %v3382_v53 = vadd.f32 %v3374_v40, %v3334_v58  ;;  %3566 = vrot.lane.b32.xlu1 %v3555_v23, %s5249_s25 }
0x175c   : > { %v3557_v16 = vrot.slane %v6763_v63, 7  ;;  %v3401_v14 = vsel %vm641_vm8, %v3400_v9, %v3399_v62 }
0x175d   : > { %v6771_v8 = vrot.slane %v3382_v53, 7  ;;  %v3402_v43 = vsel %vm644_vm9, %v6763_v63, %v3401_v14 }
0x175f   : > { %3570 = vrot.lane.b32.xlu1 %v3557_v16, %s5249_s25  ;;  %v3404_v39 = vsel %vm647_vm10, %v6771_v8, %v3402_v43 }
0x1760   : > { %3405 = vrot.lane.b32.xlu0 %v3404_v39, %s5249_s25 }
0x1764   : > { %3560 = vrot.lane.b32.xlu0 %v3552_v52, %s5249_s25 }
0x1768   : > { %3564 = vrot.lane.b32.xlu0 %v3554_v44, %s5249_s25 }
0x176c   : > { %3568 = vrot.lane.b32.xlu0 %v3556_v33, %s5249_s25 }
0x1770   : > { %3572 = vrot.lane.b32.xlu0 %v6771_v8, %s5249_s25 }
0x17c5   : > { %v3559_v53 = vpop.permute.xlu1 %3558 }
0x17d2   : > { %v3406_v0 = vpop.permute.xlu0 %3405 }
0x17d3   : > { %4412 = vmatmul.mubr.msk.f32.vlgmr.msra.gmra.mrb[26].mxu0 %vm451_vm3, %v3406_v0 }
0x18a6   : > { %v3475_v42 = vpop.f32.mrb[26].mxu0 }
0x18a7   : > { %v3480_v48 = vrot.slane %v3475_v42, 1  ;;  %v3481_v24 = vrot.slane %v3475_v42, 2  ;;  %v3482_v30 = vrot.slane %v3475_v42, 3  ;;  %v3483_v41 = vrot.slane %v3475_v42, 4  ;;  %v4413_v36 = vpop.f32.mrb[27].mxu0 }
0x18a8   : > { %v3484_v5 = vrot.slane %v3475_v42, 5  ;;  %v3485_v12 = vrot.slane %v3475_v42, 6  ;;  %v3486_v61 = vrot.slane %v3475_v42, 7  ;;  %v3502_v34 = vadd.f32 %v3475_v42, %v5590_v32 }
0x18a9   : > { %v3495_v60 = vadd.f32 %v3480_v48, %v5558_v56  ;;  %v3496_v1 = vadd.f32 %v3481_v24, %v5544_v45  ;;  %v3497_v47 = vadd.f32 %v3482_v30, %v5550_v49  ;;  %v3498_v21 = vadd.f32 %v3483_v41, %v5560_v57  ;;  %v3561_v24 = vpop.permute.xlu0 %3560 }
0x18aa   : > { %v3499_v7 = vadd.f32 %v3484_v5, %v5569_v2  ;;  %v3500_v27 = vadd.f32 %v3485_v12, %v5576_v13  ;;  %v4154_v55 = vmul.f32 -1.442695, %v3502_v34  ;;  %v3501_v54 = vadd.f32 %v3486_v61, %v5583_v22  ;;  %v3563_v34 = vpop.permute.xlu1 %3562 }
0x18ab   : > { %v4147_v3 = vmul.f32 -1.442695, %v3495_v60  ;;  %v4148_v9 = vmul.f32 -1.442695, %v3496_v1  ;;  %v4149_v11 = vmul.f32 -1.442695, %v3497_v47 }
0x18ac   : > { %v4150_v4 = vmul.f32 -1.442695, %v3498_v21  ;;  %4951 = vpow2.f32 %v4154_v55  ;;  %v4151_v29 = vmul.f32 -1.442695, %v3499_v7  ;;  %v4152_v31 = vmul.f32 -1.442695, %v3500_v27 }
0x18ad   : > { %4953 = vpow2.f32 %v4147_v3  ;;  %v4153_v58 = vmul.f32 -1.442695, %v3501_v54  ;;  %v3565_v1 = vpop.permute.xlu0 %3564 }
0x18ae   : > { %4955 = vpow2.f32 %v4148_v9  ;;  %v3567_v21 = vpop.permute.xlu1 %3566 }
0x18af   : > { %4957 = vpow2.f32 %v4149_v11 }
0x18b0   : > { %4959 = vpow2.f32 %v4150_v4 }
0x18b1   : > { %4961 = vpow2.f32 %v4151_v29  ;;  %v3569_v9 = vpop.permute.xlu0 %3568 }
0x18b2   : > { %4963 = vpow2.f32 %v4152_v31 }
0x18b3   : > { %4965 = vpow2.f32 %v4153_v58 }
0x18b6   : > { %v4952_v40 = vpop.eup %4951 }
0x18b7   : > { %v4954_v10 = vpop.eup %4953  ;;  %v3534_v61 = vadd.f32 1.0, %v4952_v40 }
0x18b8   : > { %v4956_v62 = vpop.eup %4955  ;;  %v3527_v14 = vadd.f32 1.0, %v4954_v10 }
0x18b9   : > { %v4958_v43 = vpop.eup %4957  ;;  %v3528_v39 = vadd.f32 1.0, %v4956_v62 }
0x18ba   : > { %v4960_v0 = vpop.eup %4959  ;;  %v3529_v42 = vadd.f32 1.0, %v4958_v43  ;;  %4967 = vrcp.f32 %v3527_v14  ;;  %v3571_v14 = vpop.permute.xlu1 %3570 }
0x18bb   : > { %v4962_v48 = vpop.eup %4961  ;;  %v3530_v30 = vadd.f32 1.0, %v4960_v0  ;;  %4969 = vrcp.f32 %v3528_v39 }
0x18bc   : > { %v4964_v41 = vpop.eup %4963  ;;  %v3531_v36 = vadd.f32 1.0, %v4962_v48  ;;  %4971 = vrcp.f32 %v3529_v42 }
0x18bd   : > { %v4966_v5 = vpop.eup %4965  ;;  %v3532_v12 = vadd.f32 1.0, %v4964_v41  ;;  %4973 = vrcp.f32 %v3530_v30 }
0x18be   : > { %v3533_v60 = vadd.f32 1.0, %v4966_v5  ;;  %4975 = vrcp.f32 %v3531_v36  ;;  %v3573_v5 = vpop.permute.xlu0 %3572 }
0x18bf   : > { %4977 = vrcp.f32 %v3532_v12 }
0x18c0   : > { %4979 = vrcp.f32 %v3533_v60 }
0x18c1   : > { %4981 = vrcp.f32 %v3534_v61 }
0x18c4   : > { %v6804_v47 = vpop.eup %4967 }
0x18c5   : > { %v6806_v7 = vpop.eup %4969  ;;  %v3582_v27 = vmul.f32 %v6804_v47, %v3559_v53 }
0x18c6   : > { %v6809_v55 = vpop.eup %4971  ;;  %v3583_v54 = vmul.f32 %v6806_v7, %v3561_v24 }
0x18c7   : > { %v6812_v3 = vpop.eup %4973  ;;  %v3584_v11 = vmul.f32 %v6809_v55, %v3563_v34  ;;  %v3598_v4 = vrot.slane %v3582_v27, 7 }
0x18c8   : > { %v6815_v29 = vpop.eup %4975  ;;  %v3585_v31 = vmul.f32 %v6812_v3, %v3565_v1  ;;  %v3599_v58 = vrot.slane %v3583_v54, 6 }
0x18c9   : > { %v6818_v40 = vpop.eup %4977  ;;  %v3586_v10 = vmul.f32 %v6815_v29, %v3567_v21  ;;  %v3601_v62 = vrot.slane %v3584_v11, 5 }
0x18ca   : > { %v6821_v53 = vpop.eup %4979  ;;  %v3587_v43 = vmul.f32 %v6818_v40, %v3569_v9  ;;  %v3600_v39 = vsel %vm629_vm4, %v3599_v58, %v3598_v4  ;;  %v3603_v0 = vrot.slane %v3585_v31, 4 }
0x18cb   : > { %v6825_v42 = vpop.eup %4981  ;;  %v3588_v48 = vmul.f32 %v6821_v53, %v3571_v14  ;;  %v3602_v24 = vsel %vm632_vm5, %v3601_v62, %v3600_v39  ;;  %v3605_v30 = vrot.slane %v3586_v10, 3 }
0x18cc   : > { %v3604_v41 = vsel %vm635_vm6, %v3603_v0, %v3602_v24  ;;  %v3607_v36 = vrot.slane %v3587_v43, 2  ;;  %v3589_v34 = vmul.f32 %v6825_v42, %v3573_v5 }
0x18cd   : > { %v3606_v12 = vsel %vm638_vm7, %v3605_v30, %v3604_v41  ;;  %v3609_v61 = vrot.slane %v3588_v48, 1 }
0x18ce   : > { %v3608_v60 = vsel %vm641_vm8, %v3607_v36, %v3606_v12 }
0x18cf   : > { %v3610_v1 = vsel %vm644_vm9, %v3609_v61, %v3608_v60 }
0x18d0   : > { %v3611_v21 = vsel %vm647_vm10, %v3589_v34, %v3610_v1 }
0x18d1   : > { %4423 = vmatmul.mubr.msk.f32.vlgmr.msra.gmra.mrb[18].mxu1 %vm451_vm3, %v3611_v21 }
0x19a4   : > { %v3680_v27 = vpop.f32.mrb[18].mxu1 }
0x19a5   : > { %v4424_v54 = vpop.f32.mrb[19].mxu1  ;;  %v3687_v9 = vrot.slane %v3680_v27, 3  ;;  %v3686_v11 = vrot.slane %v3680_v27, 2  ;;  %v3689_v4 = vrot.slane %v3680_v27, 5  ;;  %v3688_v31 = vrot.slane %v3680_v27, 4 }
0x19a6   : > { %v3691_v58 = vrot.slane %v3680_v27, 7  ;;  %v3690_v10 = vrot.slane %v3680_v27, 6  ;;  %v3685_v62 = vrot.slane %v3680_v27, 1  ;;  %v3733_v54 = vsub.f32 1.0, %v6806_v7 }
0x19a7   : > { %3696 = vrot.lane.b32.xlu0 %v3687_v9, %s5247_s8  ;;  %3694 = vrot.lane.b32.xlu1 %v3686_v11, %s5247_s8 }
0x19ab   : > { %3700 = vrot.lane.b32.xlu0 %v3689_v4, %s5247_s8  ;;  %3698 = vrot.lane.b32.xlu1 %v3688_v31, %s5247_s8 }
0x19af   : > { %3704 = vrot.lane.b32.xlu0 %v3691_v58, %s5247_s8  ;;  %3702 = vrot.lane.b32.xlu1 %v3690_v10, %s5247_s8  ;;  %v3736_v58 = vsub.f32 1.0, %v6815_v29  ;;  %v3749_v10 = vmul.f32 %v3733_v54, %v3552_v52  ;;  %v3737_v52 = vsub.f32 1.0, %v6818_v40 }
0x19b1   : > { %v3753_v19 = vmul.f32 %v3737_v52, %v3556_v33 }
0x19b3   : > { %3706 = vrot.lane.b32.xlu1 %v3680_v27, %s5247_s8  ;;  %3692 = vrot.lane.b32.xlu0 %v3685_v62, %s5247_s8  ;;  %v3734_v27 = vsub.f32 1.0, %v6809_v55 }
0x19b5   : > { %v3750_v4 = vmul.f32 %v3734_v27, %v3553_v26  ;;  %v3738_v26 = vsub.f32 1.0, %v6821_v53 }
0x19b7   : > { %v3754_v50 = vmul.f32 %v3738_v26, %v3557_v16 }
0x1a19   : > { %v3697_v14 = vpop.permute.xlu0 %3696  ;;  %v3695_v43 = vpop.permute.xlu1 %3694 }
0x1a1a   : > { %v3718_v39 = vadd.f32 %v3697_v14, %v5550_v49  ;;  %v3717_v0 = vadd.f32 %v3695_v43, %v5544_v45  ;;  %v3735_v14 = vsub.f32 1.0, %v6812_v3 }
0x1a1c   : > { %4983 = vtanh.f32 %v3718_v39 }
0x1a1d   : > { %4985 = vtanh.f32 %v3717_v0  ;;  %v3701_v48 = vpop.permute.xlu0 %3700  ;;  %v3699_v24 = vpop.permute.xlu1 %3698 }
0x1a1e   : > { %v3720_v30 = vadd.f32 %v3701_v48, %v5569_v2  ;;  %v3719_v41 = vadd.f32 %v3699_v24, %v5560_v57  ;;  %v3752_v24 = vmul.f32 %v3736_v58, %v3555_v23 }
0x1a20   : > { %4987 = vtanh.f32 %v3720_v30 }
0x1a21   : > { %4989 = vtanh.f32 %v3719_v41  ;;  %v3705_v36 = vpop.permute.xlu0 %3704  ;;  %v3703_v5 = vpop.permute.xlu1 %3702 }
0x1a22   : > { %v3722_v12 = vadd.f32 %v3705_v36, %v5583_v22  ;;  %v3721_v61 = vadd.f32 %v3703_v5, %v5576_v13 }
0x1a24   : > { %4991 = vtanh.f32 %v3722_v12 }
0x1a25   : > { %4993 = vtanh.f32 %v3721_v61  ;;  %v3707_v49 = vpop.permute.xlu1 %3706  ;;  %v3693_v45 = vpop.permute.xlu0 %3692 }
0x1a26   : > { %v4984_v34 = vpop.eup %4983  ;;  %v3723_v60 = vadd.f32 %v3707_v49, %v5590_v32  ;;  %v3716_v1 = vadd.f32 %v3693_v45, %v5558_v56 }
0x1a27   : > { %v4986_v2 = vpop.eup %4985  ;;  %3768 = vrot.lane.b32.xlu0 %v4984_v34, %s5249_s25 }
0x1a28   : > { %4995 = vtanh.f32 %v3723_v60  ;;  %3766 = vrot.lane.b32.xlu1 %v4986_v2, %s5249_s25 }
0x1a29   : > { %4997 = vtanh.f32 %v3716_v1 }
0x1a2a   : > { %v4988_v57 = vpop.eup %4987  ;;  %4999 = vtanh.f32 (!%p4156_p7), %v5547_v46 }
0x1a2b   : > { %v4990_v22 = vpop.eup %4989  ;;  %3772 = vrot.lane.b32.xlu0 %v4988_v57, %s5249_s25  ;;  %5001 = vtanh.f32 (!%p4156_p7), %v5563_v59 }
0x1a2c   : > { %3770 = vrot.lane.b32.xlu1 %v4990_v22, %s5249_s25  ;;  %5003 = vtanh.f32 (!%p4156_p7), %v5553_v51 }
0x1a2d   : > { %5005 = vtanh.f32 (!%p4156_p7), %v5572_v6 }
0x1a2e   : > { %v4992_v13 = vpop.eup %4991  ;;  %5007 = vtanh.f32 (!%p4156_p7), %v5579_v18 }
0x1a2f   : > { %v4994_v21 = vpop.eup %4993  ;;  %3776 = vrot.lane.b32.xlu0 %v4992_v13, %s5249_s25  ;;  %5009 = vtanh.f32 (!%p4156_p7), %v5586_v25 }
0x1a30   : > { %3774 = vrot.lane.b32.xlu1 %v4994_v21, %s5249_s25  ;;  %5011 = vtanh.f32 (!%p4156_p7), %v5593_v37 }
0x1a31   : > { %5013 = vtanh.f32 (!%p4156_p7), %v5539_v38 }
0x1a32   : > { %v4996_v56 = vpop.eup %4995 }
0x1a33   : > { %v4998_v32 = vpop.eup %4997 }
0x1a34   : > { %3778 = vrot.lane.b32.xlu1 %v4996_v56, %s5249_s25  ;;  %3764 = vrot.lane.b32.xlu0 %v4998_v32, %s5249_s25 }
0x1a99   : > { %v3769_v9 = vpop.permute.xlu0 %3768 }
0x1a9a   : > { %v3767_v11 = vpop.permute.xlu1 %3766  ;;  %v3790_v31 = vmul.f32 %v6809_v55, %v3769_v9  ;;  %v3751_v55 = vmul.f32 %v3735_v14, %v3554_v44  ;;  %v4159_v14 = vmul.f32 (!%p4156_p7), -1.442695, %v5553_v51 }
0x1a9b   : > { %v3789_v62 = vmul.f32 %v6806_v7, %v3767_v11 }
0x1a9c   : > { %v3798_v43 = vadd.f32 %v3790_v31, %v3750_v4 }
0x1a9d   : > { %v3797_v39 = vadd.f32 %v3789_v62, %v3749_v10  ;;  %v3773_v0 = vpop.permute.xlu0 %3772  ;;  %v4158_v10 = vmul.f32 (!%p4156_p7), -1.442695, %v5547_v46  ;;  %v4160_v62 = vmul.f32 (!%p4156_p7), -1.442695, %v5563_v59  ;;  %v4157_v46 = vmul.f32 (!%p4156_p7), -1.442695, %v5539_v38 }
0x1a9e   : > { %v3771_v48 = vpop.permute.xlu1 %3770  ;;  %v3792_v20 = vmul.f32 %v6815_v29, %v3773_v0  ;;  %v3813_v30 = vrot.slane %v3798_v43, 6  ;;  %v3739_v29 = vsub.f32 1.0, %v6825_v42  ;;  %v4161_v43 = vmul.f32 (!%p4156_p7), -1.442695, %v5572_v6 }
0x1a9f   : > { %v3791_v15 = vmul.f32 %v6812_v3, %v3771_v48  ;;  %v3812_v7 = vrot.slane %v3797_v39, 7  ;;  %v3732_v3 = vsub.f32 1.0, %v6804_v47  ;;  %5015 = vpow2.f32 (!%p4156_p7), %v4158_v10 }
0x1aa0   : > { %v3800_v41 = vadd.f32 %v3792_v20, %v3752_v24  ;;  %v3755_v16 = vmul.f32 %v3739_v29, %v6771_v8  ;;  %5017 = vpow2.f32 (!%p4156_p7), %v4160_v62  ;;  %v4162_v39 = vmul.f32 (!%p4156_p7), -1.442695, %v5579_v18 }
0x1aa1   : > { %v3799_v36 = vadd.f32 %v3791_v15, %v3751_v55  ;;  %v3777_v5 = vpop.permute.xlu0 %3776  ;;  %v3814_v49 = vsel %vm629_vm4, %v3813_v30, %v3812_v7  ;;  %v3748_v35 = vmul.f32 %v3732_v3, %v3551_v28  ;;  %5019 = vpow2.f32 (!%p4156_p7), %v4159_v14 }
0x1aa2   : > { %v3775_v12 = vpop.permute.xlu1 %3774  ;;  %v3794_v23 = vmul.f32 %v6821_v53, %v3777_v5  ;;  %v3817_v45 = vrot.slane %v3800_v41, 4  ;;  %5021 = vpow2.f32 (!%p4156_p7), %v4161_v43  ;;  %v4163_v0 = vmul.f32 (!%p4156_p7), -1.442695, %v5586_v25 }
0x1aa3   : > { %v3815_v61 = vrot.slane %v3799_v36, 5  ;;  %v3793_v44 = vmul.f32 %v6818_v40, %v3775_v12  ;;  %5023 = vpow2.f32 (!%p4156_p7), %v4162_v39  ;;  %v4164_v48 = vmul.f32 (!%p4156_p7), -1.442695, %v5593_v37 }
0x1aa4   : > { %v3802_v34 = vadd.f32 %v3794_v23, %v3754_v50  ;;  %5025 = vpow2.f32 (!%p4156_p7), %v4163_v0 }
0x1aa5   : > { %v3816_v60 = vsel %vm632_vm5, %v3815_v61, %v3814_v49  ;;  %v3801_v63 = vadd.f32 %v3793_v44, %v3753_v19  ;;  %5027 = vpow2.f32 (!%p4156_p7), %v4164_v48 }
0x1aa6   : > { %v3779_v53 = vpop.permute.xlu1 %3778  ;;  %v3765_v1 = vpop.permute.xlu0 %3764  ;;  %v3818_v40 = vsel %vm635_vm6, %v3817_v45, %v3816_v60  ;;  %v3821_v22 = vrot.slane %v3802_v34, 2  ;;  %5029 = vpow2.f32 (!%p4156_p7), %v4157_v46 }
0x1aa7   : > { %v3819_v2 = vrot.slane %v3801_v63, 3  ;;  %v3795_v57 = vmul.f32 %v6825_v42, %v3779_v53  ;;  %v3788_v33 = vmul.f32 %v6804_v47, %v3765_v1  ;;  %v5000_v47 = vpop.eup (!%p4156_p7), %4999 }
0x1aa8   : > { %v5002_v42 = vpop.eup (!%p4156_p7), %5001 }
0x1aa9   : > { %v3820_v13 = vsel %vm638_vm7, %v3819_v2, %v3818_v40  ;;  %v3803_v21 = vadd.f32 %v3795_v57, %v3755_v16  ;;  %v3796_v56 = vadd.f32 %v3788_v33, %v3748_v35  ;;  %v5004_v54 = vpop.eup (!%p4156_p7), %5003 }
0x1aaa   : > { %v3822_v8 = vsel %vm641_vm8, %v3821_v22, %v3820_v13  ;;  %v5006_v9 = vpop.eup (!%p4156_p7), %5005 }
0x1aab   : > { %v3823_v32 = vrot.slane %v3803_v21, 1  ;;  %3825 = vrot.lane.b32.xlu1 %v3796_v56, %s5249_s25  ;;  %v5008_v11 = vpop.eup (!%p4156_p7), %5007 }
0x1aac   : > { %v5010_v4 = vpop.eup (!%p4156_p7), %5009 }
0x1aad   : > { %v3824_v27 = vsel %vm644_vm9, %v3823_v32, %v3822_v8  ;;  %v5012_v31 = vpop.eup (!%p4156_p7), %5011 }
0x1aae   : > { %3827 = vrot.lane.b32.xlu0 %v3824_v27, %s5249_s25  ;;  %v5014_v58 = vpop.eup (!%p4156_p7), %5013 }
0x1aaf   : > { %3909 = vrot.lane.b32.xlu1 (!%p4156_p7), %v5002_v42, %s5250_s30  ;;  %v5016_v24 = vpop.eup (!%p4156_p7), %5015 }
0x1ab0   : > { %v5018_v59 = vpop.eup (!%p4156_p7), %5017  ;;  %v3864_v20 = vadd.f32 (!%p4156_p7), 1.0, %v5016_v24 }
0x1ab1   : > { %v5020_v51 = vpop.eup (!%p4156_p7), %5019  ;;  %v3866_v26 = vadd.f32 (!%p4156_p7), 1.0, %v5018_v59 }
0x1ab2   : > { %3905 = vrot.lane.b32.xlu0 (!%p4156_p7), %v5000_v47, %s5250_s30  ;;  %v5022_v6 = vpop.eup (!%p4156_p7), %5021  ;;  %v3865_v55 = vadd.f32 (!%p4156_p7), 1.0, %v5020_v51  ;;  %5031 = vrcp.f32 (!%p4156_p7), %v3864_v20 }
0x1ab3   : > { %3911 = vrot.lane.b32.xlu1 (!%p4156_p7), %v5006_v9, %s5250_s30  ;;  %v5024_v15 = vpop.eup (!%p4156_p7), %5023  ;;  %v3867_v18 = vadd.f32 (!%p4156_p7), 1.0, %v5022_v6  ;;  %5033 = vrcp.f32 (!%p4156_p7), %v3866_v26 }
0x1ab4   : > { %v5026_v52 = vpop.eup (!%p4156_p7), %5025  ;;  %5035 = vrcp.f32 (!%p4156_p7), %v3865_v55  ;;  %v3868_v25 = vadd.f32 (!%p4156_p7), 1.0, %v5024_v15 }
0x1ab5   : > { %v5028_v37 = vpop.eup (!%p4156_p7), %5027  ;;  %5037 = vrcp.f32 (!%p4156_p7), %v3867_v18  ;;  %v3869_v7 = vadd.f32 (!%p4156_p7), 1.0, %v5026_v52 }
0x1ab6   : > { %3907 = vrot.lane.b32.xlu0 (!%p4156_p7), %v5004_v54, %s5250_s30  ;;  %v5030_v38 = vpop.eup (!%p4156_p7), %5029  ;;  %5039 = vrcp.f32 (!%p4156_p7), %v3868_v25  ;;  %v3870_v30 = vadd.f32 (!%p4156_p7), 1.0, %v5028_v37 }
0x1ab7   : > { %3915 = vrot.lane.b32.xlu1 (!%p4156_p7), %v5010_v4, %s5250_s30  ;;  %5041 = vrcp.f32 (!%p4156_p7), %v3869_v7  ;;  %v3863_v41 = vadd.f32 (!%p4156_p7), 1.0, %v5030_v38 }
0x1ab8   : > { %5043 = vrcp.f32 (!%p4156_p7), %v3870_v30 }
0x1ab9   : > { %5045 = vrcp.f32 (!%p4156_p7), %v3863_v41 }
0x1aba   : > { %3913 = vrot.lane.b32.xlu0 (!%p4156_p7), %v5008_v11, %s5250_s30 }
0x1abb   : > { %3903 = vrot.lane.b32.xlu1 (!%p4156_p7), %v5014_v58, %s5250_s30 }
0x1abc   : > { %v5032_v36 = vpop.eup (!%p4156_p7), %5031 }
0x1abd   : > { %v5034_v12 = vpop.eup (!%p4156_p7), %5033 }
0x1abe   : > { %3917 = vrot.lane.b32.xlu0 (!%p4156_p7), %v5012_v31, %s5250_s30  ;;  %v5036_v23 = vpop.eup (!%p4156_p7), %5035 }
0x1abf   : > { %v5038_v29 = vpop.eup (!%p4156_p7), %5037 }
0x1ac0   : > { %v5040_v45 = vpop.eup (!%p4156_p7), %5039 }
0x1ac1   : > { %v5042_v60 = vpop.eup (!%p4156_p7), %5041 }
0x1ac2   : > { %v5044_v40 = vpop.eup (!%p4156_p7), %5043 }
0x1ac3   : > { %v5046_v21 = vpop.eup (!%p4156_p7), %5045 }
0x1b1b   : > { %3838 = sbr.rel (%p4156_p7) target bundleno = 7083 (0x1bab), region = 64 }
0x1b1d   : > { %v6899_v17 = vpop.permute.xlu1 %3825 }
0x1b1e   : > { %3832 = vst.msk [vmem:[#allocation2 - $0x7] sm:$0x80] %vm3831_vm11, %v6899_v17 }
0x1b20   : > { %v6902_v28 = vpop.permute.xlu0 %3827 }
0x1b21   : > { %3834 = vst.msk [vmem:[#allocation2 + $0x1] sm:$0x7f] %vm3833_vm12, %v6902_v28  ;;  %v3910_v50 = vpop.permute.xlu1 (!%p4156_p7), %3909 }
0x1b22   : > { %v3930_v19 = vmul.f32 %v5034_v12, %v3910_v50 }
0x1b24   : > { %v3906_v5 = vpop.permute.xlu0 %3905  ;;  %v3946_v53 = vrot.slane %v3930_v19, 5 }
0x1b25   : > { %v3928_v61 = vmul.f32 %v5032_v36, %v3906_v5  ;;  %v3912_v49 = vpop.permute.xlu1 %3911 }
0x1b26   : > { %v3931_v34 = vmul.f32 %v5038_v29, %v3912_v49 }
0x1b27   : > { %v3943_v63 = vrot.slane %v3928_v61, 7 }
0x1b28   : > { %v3908_v44 = vpop.permute.xlu0 %3907  ;;  %v3948_v1 = vrot.slane %v3931_v34, 4 }
0x1b29   : > { %v3929_v3 = vmul.f32 %v5036_v23, %v3908_v44  ;;  %v3916_v33 = vpop.permute.xlu1 %3915 }
0x1b2a   : > { %v3933_v13 = vmul.f32 %v5042_v60, %v3916_v33 }
0x1b2b   : > { %v3944_v16 = vrot.slane %v3929_v3, 6 }
0x1b2c   : > { %v3914_v2 = vpop.permute.xlu0 %3913  ;;  %v3952_v8 = vrot.slane %v3933_v13, 2 }
0x1b2d   : > { %v3945_v57 = vsel %vm629_vm4, %v3944_v16, %v3943_v63  ;;  %v3932_v35 = vmul.f32 %v5040_v45, %v3914_v2  ;;  %v3904_v54 = vpop.permute.xlu1 %3903 }
0x1b2e   : > { %v3947_v22 = vsel %vm632_vm5, %v3946_v53, %v3945_v57  ;;  %v3927_v9 = vmul.f32 %v5046_v21, %v3904_v54 }
0x1b2f   : > { %v3949_v56 = vsel %vm635_vm6, %v3948_v1, %v3947_v22  ;;  %v3950_v32 = vrot.slane %v3932_v35, 3 }
0x1b30   : > { %v3918_v27 = vpop.permute.xlu0 %3917  ;;  %3956 = vrot.lane.b32.xlu0 %v3927_v9, %s5251_s11 }
0x1b31   : > { %v3951_v47 = vsel %vm638_vm7, %v3950_v32, %v3949_v56  ;;  %v3934_v42 = vmul.f32 %v5044_v40, %v3918_v27 }
0x1b32   : > { %v3953_v4 = vsel %vm641_vm8, %v3952_v8, %v3951_v47 }
0x1b33   : > { %v3954_v11 = vrot.slane %v3934_v42, 1 }
0x1b35   : > { %v3955_v31 = vsel %vm644_vm9, %v3954_v11, %v3953_v4 }
0x1b36   : > { %3958 = vrot.lane.b32.xlu1 %v3955_v31, %s5251_s11 }
0x1ba2   : > { %v3957_v58 = vpop.permute.xlu0 %3956 }
0x1ba3   : > { %v3962_v10 = vsel %vm451_vm3, %v6899_v17, %v3957_v58 }
0x1ba4   : > { %3965 = vst.msk [vmem:[#allocation11 - $0x7] sm:$0x80] %vm3964_vm13, %v3962_v10 }
0x1ba8   : > { %v3959_v62 = vpop.permute.xlu1 %3958 }
0x1ba9   : > { %v3963_v14 = vsel %vm451_vm3, %v6902_v28, %v3959_v62 }
0x1baa   : > { %3967 = vst.msk [vmem:[#allocation11 + $0x1] sm:$0x7f] %vm3966_vm14, %v3963_v14 }
0x1bab PF: > { %p4564_p11 = scmp.eq.s32.totalorder %s5302_s22, 1  ;;  %s5252_s15 = smov [#allocation11]  }
0x1bac   : > { %s3975_s21 = sshll.u32 %s5252_s15, 4  ;;  %s3976_s21 = int_to_ptr.vmem [resolvable:$true] %s3975_s21 }
0x1bad   : > { %s5161_s12 = scalar_lea.vmem %s3976_s21, 128  ;;  %p5168_p10 = scmp.lt.s32.totalorder %s3976_s21, %s3976_s21 }
0x1bae   : > { %p5162_p13 = scmp.ne.s32.totalorder %s3976_s21, %s5161_s12  ;;  %p5169_p0 = scmp.lt.s32.totalorder %s5161_s12, %s5161_s12 }
0x1bb0   : > { %p5163_p2 = pnand %p5162_p13, %p4564_p11  ;;  %p5170_p12 = por %p5169_p0, %p5168_p10 }
0x1bb2   : > { %p5164_p8 = pneg %p5163_p2 }
0x1bb4   : > { %p5171_p9 = pnand %p5170_p12, %p5164_p8 }
0x1bb6   : > { %5174 = shalt.err (!%p5171_p9)
}
0x1bb7   : > { %s5175_s9 = scalar_lea.hbm %s6973_s5, 128 }
0x1bb8   : > { %p5176_p1 = scmp.ne.s32.totalorder %s6973_s5, %s5175_s9  ;;  %p5181_p4 = scmp.lt.u32.totalorder %s5175_s9, %s6973_s5 }
0x1bba   : > { %p5177_p5 = pnand %p5176_p1, %p4564_p11 }
0x1bbc   : > { %p5178_p3 = pneg %p5177_p5 }
0x1bbe   : > { %p5183_p6 = pnand %p5181_p4, %p5178_p3 }
0x1bc0   : > { %5186 = shalt.err (!%p5183_p6)
}
0x1bc1   : > { %4540 = dma.vmem_to_hbm [thread:$0]  (%p4564_p11), %s3976_s21, 128, %s6973_s5, [#allocation5]  }
0x1bc2   : > { %5216 = dma.done.wait (%p4564_p11), [#allocation5], 128  }
0x1bc3   : > { %5218 = vsyncadd (%p4564_p11), [#allocation5], 4294967168 }
0x1bc4 PF: > { %s7007_s27 = sld [smem:[#allocation16_spill]]  ;;  %p18_p7 = scmp.ge.s32.totalorder %s5305_s23, 4  }
0x1bc5   : > { %s7008_s18 = smov %s5225_s19  ;;  %s7009_s19 = smov %s5229_s20 }
0x1bc6   : > { %s7011_s21 = smov %s5305_s23  ;;  %20 = sbr.rel (!%p18_p7) target bundleno = 8 (0x8), region = 97 }
0x1bca   : > { %s7010_s20 = smov %s7007_s27 }
0x1bcd   :  { %3988 = vsyncpa [#allocation4], 1 }
0x1bce   :  { %3990 = vsyncpa [#allocation4 + $0x1], 1 }
0x1bcf   :  { %3991 = vsyncpa [#allocation7], 1 }
0x1bd0   :  { %3992 = vsyncpa [#allocation10], 1 }
0x1bd1   :  { %3993 = vsyncpa [#allocation5], 1 }
0x1bd2   :  { %3995 = vsyncpa [#allocation5 + $0x1], 1 }

</bundles_post_ra>
